<compile_context>
chip_gen: v7x
topology: tpu7x:2x2x1
jax: 0.10.0
libtpu: 0.0.40
codegen_flags: <defaults>
</compile_context>

<pallas_src>
import functools
import math

import numpy as np
import jax
import jax.numpy as jnp
from jax.experimental import pallas as pl
from jax.experimental.pallas import tpu as pltpu

# ----------------------------------------------------------------------------
# Config (small but consistent with MAE_Encoder's forward)
# ----------------------------------------------------------------------------
IMG_SIZE = 16
PATCH_SIZE = 2
IN_CHANS = 3
EMBED_DIM = 32
DEPTH = 2
NUM_HEADS = 4
MLP_RATIO = 4
MASK_RATIO = 0.75
LN_EPS = 1e-5

GRID = IMG_SIZE // PATCH_SIZE                      # 8
NUM_PATCHES = GRID * GRID                          # 64
CPP = IN_CHANS * PATCH_SIZE * PATCH_SIZE           # 12
LEN_KEEP = int(NUM_PATCHES * (1 - MASK_RATIO))     # 16
SEQ = LEN_KEEP + 1                                 # 17 (cls token + kept patches)
HEAD_DIM = EMBED_DIM // NUM_HEADS                  # 8
SLAB_W = 128                                       # lane-dense parameter slab width


def _round_up(x, m):
    return ((x + m - 1) // m) * m


# ----------------------------------------------------------------------------
# 2D sin/cos positional embedding (same as MAE's get_2d_sincos_pos_embed)
# ----------------------------------------------------------------------------
def _get_1d_sincos(embed_dim, pos):
    omega = np.arange(embed_dim // 2, dtype=np.float64)
    omega /= embed_dim / 2.0
    omega = 1.0 / 10000 ** omega
    pos = pos.reshape(-1)
    out = np.einsum("m,d->md", pos, omega)
    return np.concatenate([np.sin(out), np.cos(out)], axis=1)


def get_2d_sincos_pos_embed(embed_dim, grid_size, cls_token=False):
    grid_h = np.arange(grid_size, dtype=np.float32)
    grid_w = np.arange(grid_size, dtype=np.float32)
    grid = np.meshgrid(grid_w, grid_h)
    grid = np.stack(grid, axis=0).reshape([2, 1, grid_size, grid_size])
    emb_h = _get_1d_sincos(embed_dim // 2, grid[0])
    emb_w = _get_1d_sincos(embed_dim // 2, grid[1])
    pos = np.concatenate([emb_h, emb_w], axis=1)
    if cls_token:
        pos = np.concatenate([np.zeros([1, embed_dim]), pos], axis=0)
    return pos.astype(np.float32)


# ----------------------------------------------------------------------------
# Deterministic parameter init (mirrors MAE_Encoder.initial_weights)
# ----------------------------------------------------------------------------
def xavier_uniform(key, shape, fan_in, fan_out):
    a = math.sqrt(6.0 / (fan_in + fan_out))
    return jax.random.uniform(key, shape, jnp.float32, -a, a)


def init_params(key):
    keys = jax.random.split(key, 4 + DEPTH * 4)
    ki = iter(keys)
    params = {}

    # patch-embed conv, stored as (C*p*p, D) matmul weight.
    # torch xavier_uniform_ on the 4D conv weight: fan_in=C*p*p, fan_out=D*p*p.
    params["pe_w"] = xavier_uniform(next(ki), (CPP, EMBED_DIM),
                                    fan_in=CPP,
                                    fan_out=EMBED_DIM * PATCH_SIZE * PATCH_SIZE)
    params["pe_b"] = jnp.zeros((1, EMBED_DIM), jnp.float32)

    params["cls_token"] = 0.02 * jax.random.normal(next(ki), (1, 1, EMBED_DIM), jnp.float32)
    params["pos_embed"] = jnp.asarray(
        get_2d_sincos_pos_embed(EMBED_DIM, GRID, cls_token=True))[None]  # (1, L+1, D)

    blocks = []
    for _ in range(DEPTH):
        kq, kp, k1, k2 = jax.random.split(next(ki), 4)
        D, Hm = EMBED_DIM, EMBED_DIM * MLP_RATIO
        blocks.append(dict(
            ln1w=jnp.ones((1, D), jnp.float32), ln1b=jnp.zeros((1, D), jnp.float32),
            qkvw=xavier_uniform(kq, (D, 3 * D), D, 3 * D),
            qkvb=jnp.zeros((1, 3 * D), jnp.float32),
            projw=xavier_uniform(kp, (D, D), D, D),
            projb=jnp.zeros((1, D), jnp.float32),
            ln2w=jnp.ones((1, D), jnp.float32), ln2b=jnp.zeros((1, D), jnp.float32),
            fc1w=xavier_uniform(k1, (D, Hm), D, Hm),
            fc1b=jnp.zeros((1, Hm), jnp.float32),
            fc2w=xavier_uniform(k2, (Hm, D), Hm, D),
            fc2b=jnp.zeros((1, D), jnp.float32),
        ))
    params["blocks"] = blocks
    params["norm_w"] = jnp.ones((1, EMBED_DIM), jnp.float32)
    params["norm_b"] = jnp.zeros((1, EMBED_DIM), jnp.float32)
    return params


# ----------------------------------------------------------------------------
# Parameter packing: one contiguous (R, 128) f32 slab + static row layout
# ----------------------------------------------------------------------------
def pack_params(params):
    """Pack every encoder weight into a single lane-dense f32 slab.

    Each parameter starts at an 8-row-aligned offset (sublane-tile aligned) and
    is zero-padded to 128 lanes; the kernel recovers it with a static slice.
    Returns (slab, layout) with layout[name] = (row_start, n_rows, n_cols).
    """
    D = EMBED_DIM
    scale = 1.0 / math.sqrt(HEAD_DIM)

    items = [("pe_w", params["pe_w"]),
             ("norm_w", params["norm_w"]),
             ("norm_b", params["norm_b"])]
    for i, bp in enumerate(params["blocks"]):
        # fold the 1/sqrt(Dh) attention scale into Wq / bq
        qkvw = bp["qkvw"].at[:, :D].multiply(scale)
        qkvb = bp["qkvb"].at[:, :D].multiply(scale)
        items += [(f"b{i}_ln1w", bp["ln1w"]), (f"b{i}_ln1b", bp["ln1b"]),
                  (f"b{i}_qkvw", qkvw), (f"b{i}_qkvb", qkvb),
                  (f"b{i}_projw", bp["projw"]), (f"b{i}_projb", bp["projb"]),
                  (f"b{i}_ln2w", bp["ln2w"]), (f"b{i}_ln2b", bp["ln2b"]),
                  (f"b{i}_fc1w", bp["fc1w"]), (f"b{i}_fc1b", bp["fc1b"]),
                  (f"b{i}_fc2w", bp["fc2w"]), (f"b{i}_fc2b", bp["fc2b"])]

    layout = {}
    pieces = []
    row = 0
    for name, arr in items:
        arr = jnp.asarray(arr, jnp.float32)
        if arr.ndim == 1:
            arr = arr[None, :]
        r, c = arr.shape
        rp = _round_up(r, 8)
        piece = jnp.zeros((rp, SLAB_W), jnp.float32).at[:r, :c].set(arr)
        pieces.append(piece)
        layout[name] = (row, r, c)
        row += rp
    slab = jnp.concatenate(pieces, axis=0)
    return slab, layout


# ----------------------------------------------------------------------------
# Fused Pallas kernel: patch-embed(+bias) -> 2 transformer blocks -> LayerNorm
# ----------------------------------------------------------------------------
def _layernorm(v, w, b):
    mu = jnp.mean(v, axis=-1, keepdims=True)
    var = jnp.mean((v - mu) ** 2, axis=-1, keepdims=True)
    return (v - mu) * jax.lax.rsqrt(var + LN_EPS) * w + b


def fused_encoder_kernel(patches_ref, addend_ref, bias_ref, slab_ref, out_ref,
                         *, layout, depth, num_heads):
    D = EMBED_DIM
    Dh = D // num_heads

    def get(name):
        r, nr, nc = layout[name]          # static Python ints -> zero-cost view
        return slab_ref[r:r + nr, 0:nc]

    # Block-diagonal additive bias (0 within a sample, -1e30 across samples):
    # lets attention run sample-batched on the flattened activation.
    bias = bias_ref[...]                                            # (NS, NS)

    # --- 1) Patch embed for kept tokens (cls row has an all-zero patch; its
    #        cls+pos[0] value and pe_b/pos for patch rows are pre-folded into
    #        addend on the wrapper side). One 2-D MXU matmul. ---
    x = (jnp.dot(patches_ref[...], get("pe_w"),
                 preferred_element_type=jnp.float32)
         + addend_ref[...])                                         # (NS, D)

    # --- 2) Transformer blocks (all weights resident in the VMEM slab) ---
    for b in range(depth):
        p_ = f"b{b}_"

        # attention branch
        xn = _layernorm(x, get(p_ + "ln1w"), get(p_ + "ln1b"))
        qkv = (jnp.dot(xn, get(p_ + "qkvw"),
                       preferred_element_type=jnp.float32)
               + get(p_ + "qkvb"))                                  # (NS, 3D)

        ctx_heads = []
        for h in range(num_heads):                                  # 4 static iters
            qh = qkv[:, 0 * D + h * Dh: 0 * D + (h + 1) * Dh]       # (NS, Dh)
            kh = qkv[:, 1 * D + h * Dh: 1 * D + (h + 1) * Dh]
            vh = qkv[:, 2 * D + h * Dh: 2 * D + (h + 1) * Dh]
            # q @ k^T over the whole batch at once; cross-sample entries are
            # pushed to -1e30 by the bias so the softmax zeroes them.
            s = jax.lax.dot_general(qh, kh, (((1,), (1,)), ((), ())),
                                    preferred_element_type=jnp.float32) + bias
            s = s - jnp.max(s, axis=-1, keepdims=True)
            e = jnp.exp(s)
            pattn = e * pl.reciprocal(jnp.sum(e, axis=-1, keepdims=True),
                                      approx=True)
            ctx_heads.append(jnp.dot(pattn, vh,
                                     preferred_element_type=jnp.float32))
        ctx = jnp.concatenate(ctx_heads, axis=-1)                   # (NS, D)
        attn_out = (jnp.dot(ctx, get(p_ + "projw"),
                            preferred_element_type=jnp.float32)
                    + get(p_ + "projb"))
        x = x + attn_out

        # MLP branch
        xn2 = _layernorm(x, get(p_ + "ln2w"), get(p_ + "ln2b"))
        h1 = (jnp.dot(xn2, get(p_ + "fc1w"),
                      preferred_element_type=jnp.float32)
              + get(p_ + "fc1b"))
        # TODO(synk): tanh-approx GELU (EUP slot) per perf review; switch back
        # to approximate=False if bit-parity with nn.GELU(approximate='none')
        # is required.
        h1 = jax.nn.gelu(h1, approximate=True)
        h2 = (jnp.dot(h1, get(p_ + "fc2w"),
                      preferred_element_type=jnp.float32)
              + get(p_ + "fc2b"))
        x = x + h2

    # --- 3) final LayerNorm ---
    out_ref[...] = _layernorm(x, get("norm_w"), get("norm_b"))


def fused_encoder(patches_flat, addend_flat, attn_bias, slab, layout):
    """Single grid-less pallas_call for the whole (post-masking) encoder."""
    NS = patches_flat.shape[0]
    kernel = functools.partial(fused_encoder_kernel, layout=layout,
                               depth=DEPTH, num_heads=NUM_HEADS)
    return pl.pallas_call(
        kernel,
        out_shape=jax.ShapeDtypeStruct((NS, EMBED_DIM), jnp.float32),
        in_specs=[pl.BlockSpec(memory_space=pltpu.MemorySpace.VMEM)] * 4,
        out_specs=pl.BlockSpec(memory_space=pltpu.MemorySpace.VMEM),
    )(patches_flat, addend_flat, attn_bias, slab)


# ----------------------------------------------------------------------------
# Full forward (MAE_Encoder.forward semantics)
# ----------------------------------------------------------------------------
def mae_encoder_forward(x_nchw, params, mask_key):
    N, C, H, W = x_nchw.shape
    p = PATCH_SIZE
    Hp, Wp = H // p, W // p
    L = Hp * Wp
    D = EMBED_DIM

    # PatchEmbed: Conv2d(k=p, stride=p) == per-patch matmul; patch extraction
    # is plain-JAX layout glue ((c, ph, pw) flatten order matches Conv2d).
    patches = (x_nchw.reshape(N, C, Hp, p, Wp, p)
               .transpose(0, 2, 4, 1, 3, 5)
               .reshape(N, L, C * p * p))

    # random_masking index generation (mask_ratio=0.75).
    # TODO(synk): argsort of random noise stays in plain JAX (no clean Pallas
    # equivalent); only the kept tokens are handed to the fused kernel.
    noise = jax.random.uniform(mask_key, (N, L), jnp.float32)
    ids_shuffle = jnp.argsort(noise, axis=1)
    ids_restore = jnp.argsort(ids_shuffle, axis=1)
    ids_keep = ids_shuffle[:, :LEN_KEEP]
    mask = jnp.ones((N, L), jnp.float32).at[:, :LEN_KEEP].set(0.0)
    mask = jnp.take_along_axis(mask, ids_restore, axis=1)

    # Gather kept raw 12-wide patches and pos rows in the wrapper (cheap);
    # the linear patch-embed projection itself runs inside the kernel, so no
    # embedding HBM round-trip is reintroduced.
    kept_patches = jnp.take_along_axis(
        patches, ids_keep[:, :, None], axis=1)                        # (N, K, CPP)
    pos = params["pos_embed"][0]                                      # (L+1, D)
    pos_kept = jnp.take(pos[1:], ids_keep, axis=0)                    # (N, K, D)
    cls_row = params["cls_token"][0] + pos[:1]                        # (1, D)

    # Per-token kernel inputs: cls row has a zero patch vector; its additive
    # term is cls+pos[0].  Patch rows get pos[1+id] + pe_b folded in.
    patches_full = jnp.concatenate(
        [jnp.zeros((N, 1, CPP), jnp.float32), kept_patches], axis=1)  # (N, SEQ, CPP)
    addend = jnp.concatenate(
        [jnp.broadcast_to(cls_row[None], (N, 1, D)),
         pos_kept + params["pe_b"]], axis=1)                          # (N, SEQ, D)

    NS = N * SEQ
    row_sample = np.arange(NS) // SEQ
    attn_bias = jnp.asarray(
        np.where(row_sample[:, None] == row_sample[None, :], 0.0, -1e30)
        .astype(np.float32))                                          # (NS, NS)

    slab, layout = pack_params(params)

    out_flat = fused_encoder(patches_full.reshape(NS, CPP),
                             addend.reshape(NS, D), attn_bias, slab, layout)
    # row-major (NS, D) == (N, SEQ, D): metadata-only reshape outside kernel
    return out_flat.reshape(N, SEQ, D), mask, ids_restore


# ----------------------------------------------------------------------------
if __name__ == "__main__":
    root = jax.random.PRNGKey(0)
    k_param, k_input, k_mask = jax.random.split(root, 3)

    params = init_params(k_param)
    x = jax.random.normal(k_input, (2, IN_CHANS, IMG_SIZE, IMG_SIZE), jnp.float32)

    out, mask, ids_restore = mae_encoder_forward(x, params, k_mask)
    jax.block_until_ready(out)
    jax.block_until_ready(mask)
    jax.block_until_ready(ids_restore)

    assert out.shape == (2, SEQ, EMBED_DIM)
    assert mask.shape == (2, NUM_PATCHES)
    assert ids_restore.shape == (2, NUM_PATCHES)
    assert bool(jnp.all(jnp.isfinite(out)))
    print("KERNEL_OK")
</pallas_src>

<mosaic_0001>
module attributes {stable_mosaic.version = 11 : i64} {
  func.func @fused_encoder_kernel(%arg0: memref<34x12xf32, #tpu.memory_space<vmem>>, %arg1: memref<34x32xf32, #tpu.memory_space<vmem>>, %arg2: memref<34x34xf32, #tpu.memory_space<vmem>>, %arg3: memref<608x128xf32, #tpu.memory_space<vmem>>, %arg4: memref<34x32xf32, #tpu.memory_space<vmem>>) attributes {dimension_semantics = [], scalar_prefetch = 0 : i64, scratch_operands = 0 : i64, tpu.core_type = #tpu.core_type<tc>} {
    %c0 = arith.constant 0 : index
    %c0_0 = arith.constant 0 : index
    %0 = vector.load %arg2[%c0, %c0_0] : memref<34x34xf32, #tpu.memory_space<vmem>>, vector<34x34xf32>
    %c0_1 = arith.constant 0 : index
    %c0_2 = arith.constant 0 : index
    %1 = vector.load %arg0[%c0_1, %c0_2] : memref<34x12xf32, #tpu.memory_space<vmem>>, vector<34x12xf32>
    %c0_3 = arith.constant 0 : index
    %c0_4 = arith.constant 0 : index
    %2 = vector.load %arg3[%c0_3, %c0_4] : memref<608x128xf32, #tpu.memory_space<vmem>>, vector<12x32xf32>
    %cst = arith.constant dense<0.000000e+00> : vector<34x32xf32>
    %3 = tpu.matmul %1, %2, %cst {dimension_numbers = #tpu.dot_dimension_numbers<[1], [0], [0], [1], [0, 0, 1, 1], [], []>} : vector<34x12xf32>, vector<12x32xf32>, vector<34x32xf32> -> vector<34x32xf32>
    %c0_5 = arith.constant 0 : index
    %c0_6 = arith.constant 0 : index
    %4 = vector.load %arg1[%c0_5, %c0_6] : memref<34x32xf32, #tpu.memory_space<vmem>>, vector<34x32xf32>
    %5 = arith.addf %3, %4 : vector<34x32xf32>
    %c32 = arith.constant 32 : index
    %c0_7 = arith.constant 0 : index
    %6 = vector.load %arg3[%c32, %c0_7] : memref<608x128xf32, #tpu.memory_space<vmem>>, vector<1x32xf32>
    %c40 = arith.constant 40 : index
    %c0_8 = arith.constant 0 : index
    %7 = vector.load %arg3[%c40, %c0_8] : memref<608x128xf32, #tpu.memory_space<vmem>>, vector<1x32xf32>
    %cst_9 = arith.constant dense<0.000000e+00> : vector<34xf32>
    %8 = vector.multi_reduction <add>, %5, %cst_9 [1] : vector<34x32xf32> to vector<34xf32>
    %9 = vector.shape_cast %8 : vector<34xf32> to vector<34x1xf32>
    %cst_10 = arith.constant 3.200000e+01 : f32
    %10 = vector.broadcast %cst_10 : f32 to vector<34x1xf32>
    %11 = arith.divf %9, %10 : vector<34x1xf32>
    %12 = vector.broadcast %11 : vector<34x1xf32> to vector<34x32xf32>
    %13 = arith.subf %5, %12 : vector<34x32xf32>
    %14 = arith.mulf %13, %13 : vector<34x32xf32>
    %cst_11 = arith.constant dense<0.000000e+00> : vector<34xf32>
    %15 = vector.multi_reduction <add>, %14, %cst_11 [1] : vector<34x32xf32> to vector<34xf32>
    %16 = vector.shape_cast %15 : vector<34xf32> to vector<34x1xf32>
    %cst_12 = arith.constant 3.200000e+01 : f32
    %17 = vector.broadcast %cst_12 : f32 to vector<34x1xf32>
    %18 = arith.divf %16, %17 : vector<34x1xf32>
    %19 = vector.broadcast %11 : vector<34x1xf32> to vector<34x32xf32>
    %20 = arith.subf %5, %19 : vector<34x32xf32>
    %cst_13 = arith.constant 9.99999974E-6 : f32
    %21 = vector.broadcast %cst_13 : f32 to vector<34x1xf32>
    %22 = arith.addf %18, %21 : vector<34x1xf32>
    %23 = math.rsqrt %22 : vector<34x1xf32>
    %24 = vector.broadcast %23 : vector<34x1xf32> to vector<34x32xf32>
    %25 = arith.mulf %20, %24 : vector<34x32xf32>
    %26 = vector.broadcast %6 : vector<1x32xf32> to vector<34x32xf32>
    %27 = arith.mulf %25, %26 : vector<34x32xf32>
    %28 = vector.broadcast %7 : vector<1x32xf32> to vector<34x32xf32>
    %29 = arith.addf %27, %28 : vector<34x32xf32>
    %c48 = arith.constant 48 : index
    %c0_14 = arith.constant 0 : index
    %30 = vector.load %arg3[%c48, %c0_14] : memref<608x128xf32, #tpu.memory_space<vmem>>, vector<32x96xf32>
    %cst_15 = arith.constant dense<0.000000e+00> : vector<34x96xf32>
    %31 = tpu.matmul %29, %30, %cst_15 {dimension_numbers = #tpu.dot_dimension_numbers<[1], [0], [0], [1], [0, 0, 1, 1], [], []>} : vector<34x32xf32>, vector<32x96xf32>, vector<34x96xf32> -> vector<34x96xf32>
    %c80 = arith.constant 80 : index
    %c0_16 = arith.constant 0 : index
    %32 = vector.load %arg3[%c80, %c0_16] : memref<608x128xf32, #tpu.memory_space<vmem>>, vector<1x96xf32>
    %33 = vector.broadcast %32 : vector<1x96xf32> to vector<34x96xf32>
    %34 = arith.addf %31, %33 : vector<34x96xf32>
    %35 = vector.extract_strided_slice %34 {offsets = [0, 0], sizes = [34, 8], strides = [1, 1]} : vector<34x96xf32> to vector<34x8xf32>
    %36 = vector.extract_strided_slice %34 {offsets = [0, 32], sizes = [34, 8], strides = [1, 1]} : vector<34x96xf32> to vector<34x8xf32>
    %37 = vector.extract_strided_slice %34 {offsets = [0, 64], sizes = [34, 8], strides = [1, 1]} : vector<34x96xf32> to vector<34x8xf32>
    %cst_17 = arith.constant dense<0.000000e+00> : vector<34x34xf32>
    %38 = tpu.matmul %35, %36, %cst_17 {dimension_numbers = #tpu.dot_dimension_numbers<[1], [1], [0], [0], [0, 0, 1, 0], [], []>} : vector<34x8xf32>, vector<34x8xf32>, vector<34x34xf32> -> vector<34x34xf32>
    %39 = arith.addf %38, %0 : vector<34x34xf32>
    %cst_18 = arith.constant dense<0xFF800000> : vector<34xf32>
    %40 = vector.multi_reduction <maximumf>, %39, %cst_18 [1] : vector<34x34xf32> to vector<34xf32>
    %41 = vector.shape_cast %40 : vector<34xf32> to vector<34x1xf32>
    %42 = vector.broadcast %41 : vector<34x1xf32> to vector<34x34xf32>
    %43 = arith.subf %39, %42 : vector<34x34xf32>
    %44 = math.exp %43 : vector<34x34xf32>
    %cst_19 = arith.constant dense<0.000000e+00> : vector<34xf32>
    %45 = vector.multi_reduction <add>, %44, %cst_19 [1] : vector<34x34xf32> to vector<34xf32>
    %46 = vector.shape_cast %45 : vector<34xf32> to vector<34x1xf32>
    %47 = tpu.reciprocal %46 {approx = true} : vector<34x1xf32> -> vector<34x1xf32>
    %48 = vector.broadcast %47 : vector<34x1xf32> to vector<34x34xf32>
    %49 = arith.mulf %44, %48 : vector<34x34xf32>
    %cst_20 = arith.constant dense<0.000000e+00> : vector<34x8xf32>
    %50 = tpu.matmul %49, %37, %cst_20 {dimension_numbers = #tpu.dot_dimension_numbers<[1], [0], [0], [1], [0, 0, 1, 1], [], []>} : vector<34x34xf32>, vector<34x8xf32>, vector<34x8xf32> -> vector<34x8xf32>
    %51 = vector.extract_strided_slice %34 {offsets = [0, 8], sizes = [34, 8], strides = [1, 1]} : vector<34x96xf32> to vector<34x8xf32>
    %52 = vector.extract_strided_slice %34 {offsets = [0, 40], sizes = [34, 8], strides = [1, 1]} : vector<34x96xf32> to vector<34x8xf32>
    %53 = vector.extract_strided_slice %34 {offsets = [0, 72], sizes = [34, 8], strides = [1, 1]} : vector<34x96xf32> to vector<34x8xf32>
    %cst_21 = arith.constant dense<0.000000e+00> : vector<34x34xf32>
    %54 = tpu.matmul %51, %52, %cst_21 {dimension_numbers = #tpu.dot_dimension_numbers<[1], [1], [0], [0], [0, 0, 1, 0], [], []>} : vector<34x8xf32>, vector<34x8xf32>, vector<34x34xf32> -> vector<34x34xf32>
    %55 = arith.addf %54, %0 : vector<34x34xf32>
    %cst_22 = arith.constant dense<0xFF800000> : vector<34xf32>
    %56 = vector.multi_reduction <maximumf>, %55, %cst_22 [1] : vector<34x34xf32> to vector<34xf32>
    %57 = vector.shape_cast %56 : vector<34xf32> to vector<34x1xf32>
    %58 = vector.broadcast %57 : vector<34x1xf32> to vector<34x34xf32>
    %59 = arith.subf %55, %58 : vector<34x34xf32>
    %60 = math.exp %59 : vector<34x34xf32>
    %cst_23 = arith.constant dense<0.000000e+00> : vector<34xf32>
    %61 = vector.multi_reduction <add>, %60, %cst_23 [1] : vector<34x34xf32> to vector<34xf32>
    %62 = vector.shape_cast %61 : vector<34xf32> to vector<34x1xf32>
    %63 = tpu.reciprocal %62 {approx = true} : vector<34x1xf32> -> vector<34x1xf32>
    %64 = vector.broadcast %63 : vector<34x1xf32> to vector<34x34xf32>
    %65 = arith.mulf %60, %64 : vector<34x34xf32>
    %cst_24 = arith.constant dense<0.000000e+00> : vector<34x8xf32>
    %66 = tpu.matmul %65, %53, %cst_24 {dimension_numbers = #tpu.dot_dimension_numbers<[1], [0], [0], [1], [0, 0, 1, 1], [], []>} : vector<34x34xf32>, vector<34x8xf32>, vector<34x8xf32> -> vector<34x8xf32>
    %67 = vector.extract_strided_slice %34 {offsets = [0, 16], sizes = [34, 8], strides = [1, 1]} : vector<34x96xf32> to vector<34x8xf32>
    %68 = vector.extract_strided_slice %34 {offsets = [0, 48], sizes = [34, 8], strides = [1, 1]} : vector<34x96xf32> to vector<34x8xf32>
    %69 = vector.extract_strided_slice %34 {offsets = [0, 80], sizes = [34, 8], strides = [1, 1]} : vector<34x96xf32> to vector<34x8xf32>
    %cst_25 = arith.constant dense<0.000000e+00> : vector<34x34xf32>
    %70 = tpu.matmul %67, %68, %cst_25 {dimension_numbers = #tpu.dot_dimension_numbers<[1], [1], [0], [0], [0, 0, 1, 0], [], []>} : vector<34x8xf32>, vector<34x8xf32>, vector<34x34xf32> -> vector<34x34xf32>
    %71 = arith.addf %70, %0 : vector<34x34xf32>
    %cst_26 = arith.constant dense<0xFF800000> : vector<34xf32>
    %72 = vector.multi_reduction <maximumf>, %71, %cst_26 [1] : vector<34x34xf32> to vector<34xf32>
    %73 = vector.shape_cast %72 : vector<34xf32> to vector<34x1xf32>
    %74 = vector.broadcast %73 : vector<34x1xf32> to vector<34x34xf32>
    %75 = arith.subf %71, %74 : vector<34x34xf32>
    %76 = math.exp %75 : vector<34x34xf32>
    %cst_27 = arith.constant dense<0.000000e+00> : vector<34xf32>
    %77 = vector.multi_reduction <add>, %76, %cst_27 [1] : vector<34x34xf32> to vector<34xf32>
    %78 = vector.shape_cast %77 : vector<34xf32> to vector<34x1xf32>
    %79 = tpu.reciprocal %78 {approx = true} : vector<34x1xf32> -> vector<34x1xf32>
    %80 = vector.broadcast %79 : vector<34x1xf32> to vector<34x34xf32>
    %81 = arith.mulf %76, %80 : vector<34x34xf32>
    %cst_28 = arith.constant dense<0.000000e+00> : vector<34x8xf32>
    %82 = tpu.matmul %81, %69, %cst_28 {dimension_numbers = #tpu.dot_dimension_numbers<[1], [0], [0], [1], [0, 0, 1, 1], [], []>} : vector<34x34xf32>, vector<34x8xf32>, vector<34x8xf32> -> vector<34x8xf32>
    %83 = vector.extract_strided_slice %34 {offsets = [0, 24], sizes = [34, 8], strides = [1, 1]} : vector<34x96xf32> to vector<34x8xf32>
    %84 = vector.extract_strided_slice %34 {offsets = [0, 56], sizes = [34, 8], strides = [1, 1]} : vector<34x96xf32> to vector<34x8xf32>
    %85 = vector.extract_strided_slice %34 {offsets = [0, 88], sizes = [34, 8], strides = [1, 1]} : vector<34x96xf32> to vector<34x8xf32>
    %cst_29 = arith.constant dense<0.000000e+00> : vector<34x34xf32>
    %86 = tpu.matmul %83, %84, %cst_29 {dimension_numbers = #tpu.dot_dimension_numbers<[1], [1], [0], [0], [0, 0, 1, 0], [], []>} : vector<34x8xf32>, vector<34x8xf32>, vector<34x34xf32> -> vector<34x34xf32>
    %87 = arith.addf %86, %0 : vector<34x34xf32>
    %cst_30 = arith.constant dense<0xFF800000> : vector<34xf32>
    %88 = vector.multi_reduction <maximumf>, %87, %cst_30 [1] : vector<34x34xf32> to vector<34xf32>
    %89 = vector.shape_cast %88 : vector<34xf32> to vector<34x1xf32>
    %90 = vector.broadcast %89 : vector<34x1xf32> to vector<34x34xf32>
    %91 = arith.subf %87, %90 : vector<34x34xf32>
    %92 = math.exp %91 : vector<34x34xf32>
    %cst_31 = arith.constant dense<0.000000e+00> : vector<34xf32>
    %93 = vector.multi_reduction <add>, %92, %cst_31 [1] : vector<34x34xf32> to vector<34xf32>
    %94 = vector.shape_cast %93 : vector<34xf32> to vector<34x1xf32>
    %95 = tpu.reciprocal %94 {approx = true} : vector<34x1xf32> -> vector<34x1xf32>
    %96 = vector.broadcast %95 : vector<34x1xf32> to vector<34x34xf32>
    %97 = arith.mulf %92, %96 : vector<34x34xf32>
    %cst_32 = arith.constant dense<0.000000e+00> : vector<34x8xf32>
    %98 = tpu.matmul %97, %85, %cst_32 {dimension_numbers = #tpu.dot_dimension_numbers<[1], [0], [0], [1], [0, 0, 1, 1], [], []>} : vector<34x34xf32>, vector<34x8xf32>, vector<34x8xf32> -> vector<34x8xf32>
    %99 = tpu.concatenate %50, %66, %82, %98 in 1 : vector<34x8xf32>, vector<34x8xf32>, vector<34x8xf32>, vector<34x8xf32> -> vector<34x32xf32>
    %c88 = arith.constant 88 : index
    %c0_33 = arith.constant 0 : index
    %100 = vector.load %arg3[%c88, %c0_33] : memref<608x128xf32, #tpu.memory_space<vmem>>, vector<32x32xf32>
    %cst_34 = arith.constant dense<0.000000e+00> : vector<34x32xf32>
    %101 = tpu.matmul %99, %100, %cst_34 {dimension_numbers = #tpu.dot_dimension_numbers<[1], [0], [0], [1], [0, 0, 1, 1], [], []>} : vector<34x32xf32>, vector<32x32xf32>, vector<34x32xf32> -> vector<34x32xf32>
    %c120 = arith.constant 120 : index
    %c0_35 = arith.constant 0 : index
    %102 = vector.load %arg3[%c120, %c0_35] : memref<608x128xf32, #tpu.memory_space<vmem>>, vector<1x32xf32>
    %103 = vector.broadcast %102 : vector<1x32xf32> to vector<34x32xf32>
    %104 = arith.addf %101, %103 : vector<34x32xf32>
    %105 = arith.addf %5, %104 : vector<34x32xf32>
    %c128 = arith.constant 128 : index
    %c0_36 = arith.constant 0 : index
    %106 = vector.load %arg3[%c128, %c0_36] : memref<608x128xf32, #tpu.memory_space<vmem>>, vector<1x32xf32>
    %c136 = arith.constant 136 : index
    %c0_37 = arith.constant 0 : index
    %107 = vector.load %arg3[%c136, %c0_37] : memref<608x128xf32, #tpu.memory_space<vmem>>, vector<1x32xf32>
    %cst_38 = arith.constant dense<0.000000e+00> : vector<34xf32>
    %108 = vector.multi_reduction <add>, %105, %cst_38 [1] : vector<34x32xf32> to vector<34xf32>
    %109 = vector.shape_cast %108 : vector<34xf32> to vector<34x1xf32>
    %cst_39 = arith.constant 3.200000e+01 : f32
    %110 = vector.broadcast %cst_39 : f32 to vector<34x1xf32>
    %111 = arith.divf %109, %110 : vector<34x1xf32>
    %112 = vector.broadcast %111 : vector<34x1xf32> to vector<34x32xf32>
    %113 = arith.subf %105, %112 : vector<34x32xf32>
    %114 = arith.mulf %113, %113 : vector<34x32xf32>
    %cst_40 = arith.constant dense<0.000000e+00> : vector<34xf32>
    %115 = vector.multi_reduction <add>, %114, %cst_40 [1] : vector<34x32xf32> to vector<34xf32>
    %116 = vector.shape_cast %115 : vector<34xf32> to vector<34x1xf32>
    %cst_41 = arith.constant 3.200000e+01 : f32
    %117 = vector.broadcast %cst_41 : f32 to vector<34x1xf32>
    %118 = arith.divf %116, %117 : vector<34x1xf32>
    %119 = vector.broadcast %111 : vector<34x1xf32> to vector<34x32xf32>
    %120 = arith.subf %105, %119 : vector<34x32xf32>
    %cst_42 = arith.constant 9.99999974E-6 : f32
    %121 = vector.broadcast %cst_42 : f32 to vector<34x1xf32>
    %122 = arith.addf %118, %121 : vector<34x1xf32>
    %123 = math.rsqrt %122 : vector<34x1xf32>
    %124 = vector.broadcast %123 : vector<34x1xf32> to vector<34x32xf32>
    %125 = arith.mulf %120, %124 : vector<34x32xf32>
    %126 = vector.broadcast %106 : vector<1x32xf32> to vector<34x32xf32>
    %127 = arith.mulf %125, %126 : vector<34x32xf32>
    %128 = vector.broadcast %107 : vector<1x32xf32> to vector<34x32xf32>
    %129 = arith.addf %127, %128 : vector<34x32xf32>
    %c144 = arith.constant 144 : index
    %c0_43 = arith.constant 0 : index
    %130 = vector.load %arg3[%c144, %c0_43] : memref<608x128xf32, #tpu.memory_space<vmem>>, vector<32x128xf32>
    %cst_44 = arith.constant dense<0.000000e+00> : vector<34x128xf32>
    %131 = tpu.matmul %129, %130, %cst_44 {dimension_numbers = #tpu.dot_dimension_numbers<[1], [0], [0], [1], [0, 0, 1, 1], [], []>} : vector<34x32xf32>, vector<32x128xf32>, vector<34x128xf32> -> vector<34x128xf32>
    %c176 = arith.constant 176 : index
    %c0_45 = arith.constant 0 : index
    %132 = vector.load %arg3[%c176, %c0_45] : memref<608x128xf32, #tpu.memory_space<vmem>>, vector<1x128xf32>
    %133 = vector.broadcast %132 : vector<1x128xf32> to vector<34x128xf32>
    %134 = arith.addf %131, %133 : vector<34x128xf32>
    %135 = arith.mulf %134, %134 : vector<34x128xf32>
    %136 = arith.mulf %134, %135 : vector<34x128xf32>
    %cst_46 = arith.constant 4.471500e-02 : f32
    %137 = vector.broadcast %cst_46 : f32 to vector<34x128xf32>
    %138 = arith.mulf %137, %136 : vector<34x128xf32>
    %139 = arith.addf %134, %138 : vector<34x128xf32>
    %cst_47 = arith.constant 0.797884583 : f32
    %140 = vector.broadcast %cst_47 : f32 to vector<34x128xf32>
    %141 = arith.mulf %140, %139 : vector<34x128xf32>
    %142 = math.tanh %141 : vector<34x128xf32>
    %cst_48 = arith.constant 1.000000e+00 : f32
    %143 = vector.broadcast %cst_48 : f32 to vector<34x128xf32>
    %144 = arith.addf %143, %142 : vector<34x128xf32>
    %cst_49 = arith.constant 5.000000e-01 : f32
    %145 = vector.broadcast %cst_49 : f32 to vector<34x128xf32>
    %146 = arith.mulf %145, %144 : vector<34x128xf32>
    %147 = arith.mulf %134, %146 : vector<34x128xf32>
    %c184 = arith.constant 184 : index
    %c0_50 = arith.constant 0 : index
    %148 = vector.load %arg3[%c184, %c0_50] : memref<608x128xf32, #tpu.memory_space<vmem>>, vector<128x32xf32>
    %cst_51 = arith.constant dense<0.000000e+00> : vector<34x32xf32>
    %149 = tpu.matmul %147, %148, %cst_51 {dimension_numbers = #tpu.dot_dimension_numbers<[1], [0], [0], [1], [0, 0, 1, 1], [], []>} : vector<34x128xf32>, vector<128x32xf32>, vector<34x32xf32> -> vector<34x32xf32>
    %c312 = arith.constant 312 : index
    %c0_52 = arith.constant 0 : index
    %150 = vector.load %arg3[%c312, %c0_52] : memref<608x128xf32, #tpu.memory_space<vmem>>, vector<1x32xf32>
    %151 = vector.broadcast %150 : vector<1x32xf32> to vector<34x32xf32>
    %152 = arith.addf %149, %151 : vector<34x32xf32>
    %153 = arith.addf %105, %152 : vector<34x32xf32>
    %c320 = arith.constant 320 : index
    %c0_53 = arith.constant 0 : index
    %154 = vector.load %arg3[%c320, %c0_53] : memref<608x128xf32, #tpu.memory_space<vmem>>, vector<1x32xf32>
    %c328 = arith.constant 328 : index
    %c0_54 = arith.constant 0 : index
    %155 = vector.load %arg3[%c328, %c0_54] : memref<608x128xf32, #tpu.memory_space<vmem>>, vector<1x32xf32>
    %cst_55 = arith.constant dense<0.000000e+00> : vector<34xf32>
    %156 = vector.multi_reduction <add>, %153, %cst_55 [1] : vector<34x32xf32> to vector<34xf32>
    %157 = vector.shape_cast %156 : vector<34xf32> to vector<34x1xf32>
    %cst_56 = arith.constant 3.200000e+01 : f32
    %158 = vector.broadcast %cst_56 : f32 to vector<34x1xf32>
    %159 = arith.divf %157, %158 : vector<34x1xf32>
    %160 = vector.broadcast %159 : vector<34x1xf32> to vector<34x32xf32>
    %161 = arith.subf %153, %160 : vector<34x32xf32>
    %162 = arith.mulf %161, %161 : vector<34x32xf32>
    %cst_57 = arith.constant dense<0.000000e+00> : vector<34xf32>
    %163 = vector.multi_reduction <add>, %162, %cst_57 [1] : vector<34x32xf32> to vector<34xf32>
    %164 = vector.shape_cast %163 : vector<34xf32> to vector<34x1xf32>
    %cst_58 = arith.constant 3.200000e+01 : f32
    %165 = vector.broadcast %cst_58 : f32 to vector<34x1xf32>
    %166 = arith.divf %164, %165 : vector<34x1xf32>
    %167 = vector.broadcast %159 : vector<34x1xf32> to vector<34x32xf32>
    %168 = arith.subf %153, %167 : vector<34x32xf32>
    %cst_59 = arith.constant 9.99999974E-6 : f32
    %169 = vector.broadcast %cst_59 : f32 to vector<34x1xf32>
    %170 = arith.addf %166, %169 : vector<34x1xf32>
    %171 = math.rsqrt %170 : vector<34x1xf32>
    %172 = vector.broadcast %171 : vector<34x1xf32> to vector<34x32xf32>
    %173 = arith.mulf %168, %172 : vector<34x32xf32>
    %174 = vector.broadcast %154 : vector<1x32xf32> to vector<34x32xf32>
    %175 = arith.mulf %173, %174 : vector<34x32xf32>
    %176 = vector.broadcast %155 : vector<1x32xf32> to vector<34x32xf32>
    %177 = arith.addf %175, %176 : vector<34x32xf32>
    %c336 = arith.constant 336 : index
    %c0_60 = arith.constant 0 : index
    %178 = vector.load %arg3[%c336, %c0_60] : memref<608x128xf32, #tpu.memory_space<vmem>>, vector<32x96xf32>
    %cst_61 = arith.constant dense<0.000000e+00> : vector<34x96xf32>
    %179 = tpu.matmul %177, %178, %cst_61 {dimension_numbers = #tpu.dot_dimension_numbers<[1], [0], [0], [1], [0, 0, 1, 1], [], []>} : vector<34x32xf32>, vector<32x96xf32>, vector<34x96xf32> -> vector<34x96xf32>
    %c368 = arith.constant 368 : index
    %c0_62 = arith.constant 0 : index
    %180 = vector.load %arg3[%c368, %c0_62] : memref<608x128xf32, #tpu.memory_space<vmem>>, vector<1x96xf32>
    %181 = vector.broadcast %180 : vector<1x96xf32> to vector<34x96xf32>
    %182 = arith.addf %179, %181 : vector<34x96xf32>
    %183 = vector.extract_strided_slice %182 {offsets = [0, 0], sizes = [34, 8], strides = [1, 1]} : vector<34x96xf32> to vector<34x8xf32>
    %184 = vector.extract_strided_slice %182 {offsets = [0, 32], sizes = [34, 8], strides = [1, 1]} : vector<34x96xf32> to vector<34x8xf32>
    %185 = vector.extract_strided_slice %182 {offsets = [0, 64], sizes = [34, 8], strides = [1, 1]} : vector<34x96xf32> to vector<34x8xf32>
    %cst_63 = arith.constant dense<0.000000e+00> : vector<34x34xf32>
    %186 = tpu.matmul %183, %184, %cst_63 {dimension_numbers = #tpu.dot_dimension_numbers<[1], [1], [0], [0], [0, 0, 1, 0], [], []>} : vector<34x8xf32>, vector<34x8xf32>, vector<34x34xf32> -> vector<34x34xf32>
    %187 = arith.addf %186, %0 : vector<34x34xf32>
    %cst_64 = arith.constant dense<0xFF800000> : vector<34xf32>
    %188 = vector.multi_reduction <maximumf>, %187, %cst_64 [1] : vector<34x34xf32> to vector<34xf32>
    %189 = vector.shape_cast %188 : vector<34xf32> to vector<34x1xf32>
    %190 = vector.broadcast %189 : vector<34x1xf32> to vector<34x34xf32>
    %191 = arith.subf %187, %190 : vector<34x34xf32>
    %192 = math.exp %191 : vector<34x34xf32>
    %cst_65 = arith.constant dense<0.000000e+00> : vector<34xf32>
    %193 = vector.multi_reduction <add>, %192, %cst_65 [1] : vector<34x34xf32> to vector<34xf32>
    %194 = vector.shape_cast %193 : vector<34xf32> to vector<34x1xf32>
    %195 = tpu.reciprocal %194 {approx = true} : vector<34x1xf32> -> vector<34x1xf32>
    %196 = vector.broadcast %195 : vector<34x1xf32> to vector<34x34xf32>
    %197 = arith.mulf %192, %196 : vector<34x34xf32>
    %cst_66 = arith.constant dense<0.000000e+00> : vector<34x8xf32>
    %198 = tpu.matmul %197, %185, %cst_66 {dimension_numbers = #tpu.dot_dimension_numbers<[1], [0], [0], [1], [0, 0, 1, 1], [], []>} : vector<34x34xf32>, vector<34x8xf32>, vector<34x8xf32> -> vector<34x8xf32>
    %199 = vector.extract_strided_slice %182 {offsets = [0, 8], sizes = [34, 8], strides = [1, 1]} : vector<34x96xf32> to vector<34x8xf32>
    %200 = vector.extract_strided_slice %182 {offsets = [0, 40], sizes = [34, 8], strides = [1, 1]} : vector<34x96xf32> to vector<34x8xf32>
    %201 = vector.extract_strided_slice %182 {offsets = [0, 72], sizes = [34, 8], strides = [1, 1]} : vector<34x96xf32> to vector<34x8xf32>
    %cst_67 = arith.constant dense<0.000000e+00> : vector<34x34xf32>
    %202 = tpu.matmul %199, %200, %cst_67 {dimension_numbers = #tpu.dot_dimension_numbers<[1], [1], [0], [0], [0, 0, 1, 0], [], []>} : vector<34x8xf32>, vector<34x8xf32>, vector<34x34xf32> -> vector<34x34xf32>
    %203 = arith.addf %202, %0 : vector<34x34xf32>
    %cst_68 = arith.constant dense<0xFF800000> : vector<34xf32>
    %204 = vector.multi_reduction <maximumf>, %203, %cst_68 [1] : vector<34x34xf32> to vector<34xf32>
    %205 = vector.shape_cast %204 : vector<34xf32> to vector<34x1xf32>
    %206 = vector.broadcast %205 : vector<34x1xf32> to vector<34x34xf32>
    %207 = arith.subf %203, %206 : vector<34x34xf32>
    %208 = math.exp %207 : vector<34x34xf32>
    %cst_69 = arith.constant dense<0.000000e+00> : vector<34xf32>
    %209 = vector.multi_reduction <add>, %208, %cst_69 [1] : vector<34x34xf32> to vector<34xf32>
    %210 = vector.shape_cast %209 : vector<34xf32> to vector<34x1xf32>
    %211 = tpu.reciprocal %210 {approx = true} : vector<34x1xf32> -> vector<34x1xf32>
    %212 = vector.broadcast %211 : vector<34x1xf32> to vector<34x34xf32>
    %213 = arith.mulf %208, %212 : vector<34x34xf32>
    %cst_70 = arith.constant dense<0.000000e+00> : vector<34x8xf32>
    %214 = tpu.matmul %213, %201, %cst_70 {dimension_numbers = #tpu.dot_dimension_numbers<[1], [0], [0], [1], [0, 0, 1, 1], [], []>} : vector<34x34xf32>, vector<34x8xf32>, vector<34x8xf32> -> vector<34x8xf32>
    %215 = vector.extract_strided_slice %182 {offsets = [0, 16], sizes = [34, 8], strides = [1, 1]} : vector<34x96xf32> to vector<34x8xf32>
    %216 = vector.extract_strided_slice %182 {offsets = [0, 48], sizes = [34, 8], strides = [1, 1]} : vector<34x96xf32> to vector<34x8xf32>
    %217 = vector.extract_strided_slice %182 {offsets = [0, 80], sizes = [34, 8], strides = [1, 1]} : vector<34x96xf32> to vector<34x8xf32>
    %cst_71 = arith.constant dense<0.000000e+00> : vector<34x34xf32>
    %218 = tpu.matmul %215, %216, %cst_71 {dimension_numbers = #tpu.dot_dimension_numbers<[1], [1], [0], [0], [0, 0, 1, 0], [], []>} : vector<34x8xf32>, vector<34x8xf32>, vector<34x34xf32> -> vector<34x34xf32>
    %219 = arith.addf %218, %0 : vector<34x34xf32>
    %cst_72 = arith.constant dense<0xFF800000> : vector<34xf32>
    %220 = vector.multi_reduction <maximumf>, %219, %cst_72 [1] : vector<34x34xf32> to vector<34xf32>
    %221 = vector.shape_cast %220 : vector<34xf32> to vector<34x1xf32>
    %222 = vector.broadcast %221 : vector<34x1xf32> to vector<34x34xf32>
    %223 = arith.subf %219, %222 : vector<34x34xf32>
    %224 = math.exp %223 : vector<34x34xf32>
    %cst_73 = arith.constant dense<0.000000e+00> : vector<34xf32>
    %225 = vector.multi_reduction <add>, %224, %cst_73 [1] : vector<34x34xf32> to vector<34xf32>
    %226 = vector.shape_cast %225 : vector<34xf32> to vector<34x1xf32>
    %227 = tpu.reciprocal %226 {approx = true} : vector<34x1xf32> -> vector<34x1xf32>
    %228 = vector.broadcast %227 : vector<34x1xf32> to vector<34x34xf32>
    %229 = arith.mulf %224, %228 : vector<34x34xf32>
    %cst_74 = arith.constant dense<0.000000e+00> : vector<34x8xf32>
    %230 = tpu.matmul %229, %217, %cst_74 {dimension_numbers = #tpu.dot_dimension_numbers<[1], [0], [0], [1], [0, 0, 1, 1], [], []>} : vector<34x34xf32>, vector<34x8xf32>, vector<34x8xf32> -> vector<34x8xf32>
    %231 = vector.extract_strided_slice %182 {offsets = [0, 24], sizes = [34, 8], strides = [1, 1]} : vector<34x96xf32> to vector<34x8xf32>
    %232 = vector.extract_strided_slice %182 {offsets = [0, 56], sizes = [34, 8], strides = [1, 1]} : vector<34x96xf32> to vector<34x8xf32>
    %233 = vector.extract_strided_slice %182 {offsets = [0, 88], sizes = [34, 8], strides = [1, 1]} : vector<34x96xf32> to vector<34x8xf32>
    %cst_75 = arith.constant dense<0.000000e+00> : vector<34x34xf32>
    %234 = tpu.matmul %231, %232, %cst_75 {dimension_numbers = #tpu.dot_dimension_numbers<[1], [1], [0], [0], [0, 0, 1, 0], [], []>} : vector<34x8xf32>, vector<34x8xf32>, vector<34x34xf32> -> vector<34x34xf32>
    %235 = arith.addf %234, %0 : vector<34x34xf32>
    %cst_76 = arith.constant dense<0xFF800000> : vector<34xf32>
    %236 = vector.multi_reduction <maximumf>, %235, %cst_76 [1] : vector<34x34xf32> to vector<34xf32>
    %237 = vector.shape_cast %236 : vector<34xf32> to vector<34x1xf32>
    %238 = vector.broadcast %237 : vector<34x1xf32> to vector<34x34xf32>
    %239 = arith.subf %235, %238 : vector<34x34xf32>
    %240 = math.exp %239 : vector<34x34xf32>
    %cst_77 = arith.constant dense<0.000000e+00> : vector<34xf32>
    %241 = vector.multi_reduction <add>, %240, %cst_77 [1] : vector<34x34xf32> to vector<34xf32>
    %242 = vector.shape_cast %241 : vector<34xf32> to vector<34x1xf32>
    %243 = tpu.reciprocal %242 {approx = true} : vector<34x1xf32> -> vector<34x1xf32>
    %244 = vector.broadcast %243 : vector<34x1xf32> to vector<34x34xf32>
    %245 = arith.mulf %240, %244 : vector<34x34xf32>
    %cst_78 = arith.constant dense<0.000000e+00> : vector<34x8xf32>
    %246 = tpu.matmul %245, %233, %cst_78 {dimension_numbers = #tpu.dot_dimension_numbers<[1], [0], [0], [1], [0, 0, 1, 1], [], []>} : vector<34x34xf32>, vector<34x8xf32>, vector<34x8xf32> -> vector<34x8xf32>
    %247 = tpu.concatenate %198, %214, %230, %246 in 1 : vector<34x8xf32>, vector<34x8xf32>, vector<34x8xf32>, vector<34x8xf32> -> vector<34x32xf32>
    %c376 = arith.constant 376 : index
    %c0_79 = arith.constant 0 : index
    %248 = vector.load %arg3[%c376, %c0_79] : memref<608x128xf32, #tpu.memory_space<vmem>>, vector<32x32xf32>
    %cst_80 = arith.constant dense<0.000000e+00> : vector<34x32xf32>
    %249 = tpu.matmul %247, %248, %cst_80 {dimension_numbers = #tpu.dot_dimension_numbers<[1], [0], [0], [1], [0, 0, 1, 1], [], []>} : vector<34x32xf32>, vector<32x32xf32>, vector<34x32xf32> -> vector<34x32xf32>
    %c408 = arith.constant 408 : index
    %c0_81 = arith.constant 0 : index
    %250 = vector.load %arg3[%c408, %c0_81] : memref<608x128xf32, #tpu.memory_space<vmem>>, vector<1x32xf32>
    %251 = vector.broadcast %250 : vector<1x32xf32> to vector<34x32xf32>
    %252 = arith.addf %249, %251 : vector<34x32xf32>
    %253 = arith.addf %153, %252 : vector<34x32xf32>
    %c416 = arith.constant 416 : index
    %c0_82 = arith.constant 0 : index
    %254 = vector.load %arg3[%c416, %c0_82] : memref<608x128xf32, #tpu.memory_space<vmem>>, vector<1x32xf32>
    %c424 = arith.constant 424 : index
    %c0_83 = arith.constant 0 : index
    %255 = vector.load %arg3[%c424, %c0_83] : memref<608x128xf32, #tpu.memory_space<vmem>>, vector<1x32xf32>
    %cst_84 = arith.constant dense<0.000000e+00> : vector<34xf32>
    %256 = vector.multi_reduction <add>, %253, %cst_84 [1] : vector<34x32xf32> to vector<34xf32>
    %257 = vector.shape_cast %256 : vector<34xf32> to vector<34x1xf32>
    %cst_85 = arith.constant 3.200000e+01 : f32
    %258 = vector.broadcast %cst_85 : f32 to vector<34x1xf32>
    %259 = arith.divf %257, %258 : vector<34x1xf32>
    %260 = vector.broadcast %259 : vector<34x1xf32> to vector<34x32xf32>
    %261 = arith.subf %253, %260 : vector<34x32xf32>
    %262 = arith.mulf %261, %261 : vector<34x32xf32>
    %cst_86 = arith.constant dense<0.000000e+00> : vector<34xf32>
    %263 = vector.multi_reduction <add>, %262, %cst_86 [1] : vector<34x32xf32> to vector<34xf32>
    %264 = vector.shape_cast %263 : vector<34xf32> to vector<34x1xf32>
    %cst_87 = arith.constant 3.200000e+01 : f32
    %265 = vector.broadcast %cst_87 : f32 to vector<34x1xf32>
    %266 = arith.divf %264, %265 : vector<34x1xf32>
    %267 = vector.broadcast %259 : vector<34x1xf32> to vector<34x32xf32>
    %268 = arith.subf %253, %267 : vector<34x32xf32>
    %cst_88 = arith.constant 9.99999974E-6 : f32
    %269 = vector.broadcast %cst_88 : f32 to vector<34x1xf32>
    %270 = arith.addf %266, %269 : vector<34x1xf32>
    %271 = math.rsqrt %270 : vector<34x1xf32>
    %272 = vector.broadcast %271 : vector<34x1xf32> to vector<34x32xf32>
    %273 = arith.mulf %268, %272 : vector<34x32xf32>
    %274 = vector.broadcast %254 : vector<1x32xf32> to vector<34x32xf32>
    %275 = arith.mulf %273, %274 : vector<34x32xf32>
    %276 = vector.broadcast %255 : vector<1x32xf32> to vector<34x32xf32>
    %277 = arith.addf %275, %276 : vector<34x32xf32>
    %c432 = arith.constant 432 : index
    %c0_89 = arith.constant 0 : index
    %278 = vector.load %arg3[%c432, %c0_89] : memref<608x128xf32, #tpu.memory_space<vmem>>, vector<32x128xf32>
    %cst_90 = arith.constant dense<0.000000e+00> : vector<34x128xf32>
    %279 = tpu.matmul %277, %278, %cst_90 {dimension_numbers = #tpu.dot_dimension_numbers<[1], [0], [0], [1], [0, 0, 1, 1], [], []>} : vector<34x32xf32>, vector<32x128xf32>, vector<34x128xf32> -> vector<34x128xf32>
    %c464 = arith.constant 464 : index
    %c0_91 = arith.constant 0 : index
    %280 = vector.load %arg3[%c464, %c0_91] : memref<608x128xf32, #tpu.memory_space<vmem>>, vector<1x128xf32>
    %281 = vector.broadcast %280 : vector<1x128xf32> to vector<34x128xf32>
    %282 = arith.addf %279, %281 : vector<34x128xf32>
    %283 = arith.mulf %282, %282 : vector<34x128xf32>
    %284 = arith.mulf %282, %283 : vector<34x128xf32>
    %cst_92 = arith.constant 4.471500e-02 : f32
    %285 = vector.broadcast %cst_92 : f32 to vector<34x128xf32>
    %286 = arith.mulf %285, %284 : vector<34x128xf32>
    %287 = arith.addf %282, %286 : vector<34x128xf32>
    %cst_93 = arith.constant 0.797884583 : f32
    %288 = vector.broadcast %cst_93 : f32 to vector<34x128xf32>
    %289 = arith.mulf %288, %287 : vector<34x128xf32>
    %290 = math.tanh %289 : vector<34x128xf32>
    %cst_94 = arith.constant 1.000000e+00 : f32
    %291 = vector.broadcast %cst_94 : f32 to vector<34x128xf32>
    %292 = arith.addf %291, %290 : vector<34x128xf32>
    %cst_95 = arith.constant 5.000000e-01 : f32
    %293 = vector.broadcast %cst_95 : f32 to vector<34x128xf32>
    %294 = arith.mulf %293, %292 : vector<34x128xf32>
    %295 = arith.mulf %282, %294 : vector<34x128xf32>
    %c472 = arith.constant 472 : index
    %c0_96 = arith.constant 0 : index
    %296 = vector.load %arg3[%c472, %c0_96] : memref<608x128xf32, #tpu.memory_space<vmem>>, vector<128x32xf32>
    %cst_97 = arith.constant dense<0.000000e+00> : vector<34x32xf32>
    %297 = tpu.matmul %295, %296, %cst_97 {dimension_numbers = #tpu.dot_dimension_numbers<[1], [0], [0], [1], [0, 0, 1, 1], [], []>} : vector<34x128xf32>, vector<128x32xf32>, vector<34x32xf32> -> vector<34x32xf32>
    %c600 = arith.constant 600 : index
    %c0_98 = arith.constant 0 : index
    %298 = vector.load %arg3[%c600, %c0_98] : memref<608x128xf32, #tpu.memory_space<vmem>>, vector<1x32xf32>
    %299 = vector.broadcast %298 : vector<1x32xf32> to vector<34x32xf32>
    %300 = arith.addf %297, %299 : vector<34x32xf32>
    %301 = arith.addf %253, %300 : vector<34x32xf32>
    %c16 = arith.constant 16 : index
    %c0_99 = arith.constant 0 : index
    %302 = vector.load %arg3[%c16, %c0_99] : memref<608x128xf32, #tpu.memory_space<vmem>>, vector<1x32xf32>
    %c24 = arith.constant 24 : index
    %c0_100 = arith.constant 0 : index
    %303 = vector.load %arg3[%c24, %c0_100] : memref<608x128xf32, #tpu.memory_space<vmem>>, vector<1x32xf32>
    %cst_101 = arith.constant dense<0.000000e+00> : vector<34xf32>
    %304 = vector.multi_reduction <add>, %301, %cst_101 [1] : vector<34x32xf32> to vector<34xf32>
    %305 = vector.shape_cast %304 : vector<34xf32> to vector<34x1xf32>
    %cst_102 = arith.constant 3.200000e+01 : f32
    %306 = vector.broadcast %cst_102 : f32 to vector<34x1xf32>
    %307 = arith.divf %305, %306 : vector<34x1xf32>
    %308 = vector.broadcast %307 : vector<34x1xf32> to vector<34x32xf32>
    %309 = arith.subf %301, %308 : vector<34x32xf32>
    %310 = arith.mulf %309, %309 : vector<34x32xf32>
    %cst_103 = arith.constant dense<0.000000e+00> : vector<34xf32>
    %311 = vector.multi_reduction <add>, %310, %cst_103 [1] : vector<34x32xf32> to vector<34xf32>
    %312 = vector.shape_cast %311 : vector<34xf32> to vector<34x1xf32>
    %cst_104 = arith.constant 3.200000e+01 : f32
    %313 = vector.broadcast %cst_104 : f32 to vector<34x1xf32>
    %314 = arith.divf %312, %313 : vector<34x1xf32>
    %315 = vector.broadcast %307 : vector<34x1xf32> to vector<34x32xf32>
    %316 = arith.subf %301, %315 : vector<34x32xf32>
    %cst_105 = arith.constant 9.99999974E-6 : f32
    %317 = vector.broadcast %cst_105 : f32 to vector<34x1xf32>
    %318 = arith.addf %314, %317 : vector<34x1xf32>
    %319 = math.rsqrt %318 : vector<34x1xf32>
    %320 = vector.broadcast %319 : vector<34x1xf32> to vector<34x32xf32>
    %321 = arith.mulf %316, %320 : vector<34x32xf32>
    %322 = vector.broadcast %302 : vector<1x32xf32> to vector<34x32xf32>
    %323 = arith.mulf %321, %322 : vector<34x32xf32>
    %324 = vector.broadcast %303 : vector<1x32xf32> to vector<34x32xf32>
    %325 = arith.addf %323, %324 : vector<34x32xf32>
    %c0_106 = arith.constant 0 : index
    %c0_107 = arith.constant 0 : index
    %326 = vector.load %arg4[%c0_106, %c0_107] : memref<34x32xf32, #tpu.memory_space<vmem>>, vector<34x32xf32>
    tpu.vector_store %arg4[%c0_106, %c0_107], %325 {strides = array<i32>} : memref<34x32xf32, #tpu.memory_space<vmem>>, vector<34x32xf32>,
    return
  }
}

</mosaic_0001>

<bundles_post_ra>
// kernel: tpu_custom_call.1
= control target key start
LH: loop header
LB: loop body
LE: loop exit
PB: predicated region body
PF: predicated region fallthrough
CT: control target
= control target key end

     0   :  { %9 = vsyncpa [#allocation3], 0  ;;  %s5947_s15 = smov [#allocation2]   ;;  %s7569_s0 = inlined_call_operand.vmem [shape: f32[34,12], index: 0, kind: input, shape index: {}]   ;;  %s7570_s1 = inlined_call_operand.vmem [shape: f32[34,32], index: 1, kind: input, shape index: {}]   ;;  %s7571_s2 = inlined_call_operand.vmem [shape: f32[34,34], index: 2, kind: input, shape index: {}]   ;;  %s7572_s3 = inlined_call_operand.hbm [shape: f32[608,128], index: 3, kind: input, shape index: {}]   ;;  %s7573_s4 = inlined_call_operand.vmem [shape: f32[34,32], index: 4, kind: output, shape index: {}]  }
   0x1   :  { %s21_s16 = sshll.u32 %s5947_s15, 4  ;;  %s5923_s19 = scalar_lea.hbm %s7572_s3, 9728  ;;  %s22_s16 = int_to_ptr.vmem [resolvable:$true] %s21_s16 }
   0x2   :  { %p5924_p0 = scmp.ne.s32.totalorder %s7572_s3, %s5923_s19  ;;  %p5927_p1 = scmp.lt.u32.totalorder %s5923_s19, %s7572_s3 }
   0x4   :  { %p5929_p2 = pnand %p5927_p1, %p5924_p0 }
   0x6   :  { %5932 = shalt.err (!%p5929_p2)
}
   0x7   :  { %s5933_s24 = scalar_lea.vmem %s22_s16, 9728  ;;  %p5938_p4 = scmp.lt.s32.totalorder %s22_s16, %s22_s16 }
   0x8   :  { %p5934_p3 = scmp.ne.s32.totalorder %s22_s16, %s5933_s24  ;;  %p5939_p5 = scmp.lt.s32.totalorder %s5933_s24, %s5933_s24 }
   0xa   :  { %p5940_p6 = por %p5939_p5, %p5938_p4 }
   0xc   :  { %p5941_p7 = pnand %p5940_p6, %p5934_p3 }
   0xe   :  { %5944 = shalt.err (!%p5941_p7)
}
   0xf   :  { %s5948_s25 = smov 128   ;;  %s5949_s26 = smov 8  }
  0x10   :  { %27 = dma.hbm_to_vmem [thread:$0]  %s7572_s3, 9728, %s22_s16, [#allocation3], %s5948_s25, %s5948_s25, %s5949_s26  }
  0x11   :  { %5945 = dma.done.wait [#allocation3], 9728  }
  0x12   :  { %5946 = vsyncadd [#allocation3], 4294957568  ;;  %v5950_v0 = vmov 0.0|0.0   ;;  %vm5951_vm0 = vmmov 0   ;;  %v5952_v1 = vmov 0.0   ;;  %vm64_vm1 = vcmask 1043456  }
  0x13   :  { %5302 = vmatprep.subr.bf16.mxu0 %v5950_v0  ;;  %5306 = vmatprep.subr.bf16.mxu1 %v5950_v0  ;;  %v41_v2 = vld [vmem:[#allocation2] sm:$0xff]  ;;  %v42_v3 = vld [vmem:[#allocation2 + $0x8] sm:$0xf]  ;;  %vm5953_vm2 = vmmov 1   ;;  %vm48_vm4 = vcmask 97280   ;;  %v38_v7 = vld [vmem:[%s7569_s0 + $0x10] sm:$0xff] }
  0x14   :  { %4655 = vmatprep.mubr.msk.f32.mxu0 %vm5951_vm0, %v5952_v1  ;;  %4678 = vmatprep.mubr.msk.f32.mxu1 %vm5951_vm0, %v5952_v1  ;;  %vm5304_vm3 = vmpackc.low %vm64_vm1, %vm5953_vm2  ;;  %v5303_v4 = vpack.c.bf16 %v42_v3, %v41_v2  ;;  %v36_v5 = vld [vmem:[%s7569_s0] sm:$0xff]  ;;  %v37_v6 = vld [vmem:[%s7569_s0 + $0x8] sm:$0xff]  ;;  %vm160_vm5 = vcmask 261120   ;;  %vm173_vm6 = vcmask 254976   ;;  %s5955_s21 = smov 88   ;;  %s5956_s22 = smov 80  }
  0x15   :  { %v39_v8 = vld [vmem:[%s7569_s0 + $0x18] sm:$0xff]  ;;  %v40_v9 = vld [vmem:[%s7569_s0 + $0x20] sm:$0x3]  ;;  %v44_v14 = vld [vmem:[%s7570_s1 + $0x8] sm:$0xff]  ;;  %s5957_s23 = smov 120   ;;  %s5958_s24 = smov 72  }
  0x16   :  { %5305 = vmatpush3.bf16.msk.msra.mxu0 %vm5304_vm3, %v5303_v4  ;;  %v43_v10 = vld [vmem:[%s7570_s1] sm:$0xff]  ;;  %v45_v19 = vld [vmem:[%s7570_s1 + $0x10] sm:$0xff]  ;;  %v46_v24 = vld [vmem:[%s7570_s1 + $0x18] sm:$0xff]  ;;  %s5959_s25 = smov 112   ;;  %s5960_s27 = smov 104   ;;  %vm375_vm7 = vcmask 64512  }
  0x17   :  { %5312 = vmatprep.subr.bf16.mxu0 %v5950_v0  ;;  %v47_v29 = vld [vmem:[%s7570_s1 + $0x20] sm:$0x3]  ;;  %v246_v60 = vld [vmem:[#allocation2 + $0x30] sm:$0xff]  ;;  %v247_v61 = vld [vmem:[#allocation2 + $0x38] sm:$0xff]  ;;  %s5954_s1 = smov 96   ;;  %s5961_s28 = smov 64  }
  0x18   :  { %v5307_v62 = vpack.c.bf16 %v247_v61, %v246_v60  ;;  %v248_v63 = vld [vmem:[#allocation2 + $0x40] sm:$0xff]  ;;  %v249_v2 = vld [vmem:[#allocation2 + $0x48] sm:$0xff]  ;;  %s5962_s3 = smov 56   ;;  %vm6183_vm8 = vmpackc.low %vm375_vm7, %vm375_vm7  ;;  %vm572_vm9 = vcmask 1041408   ;;  %vm486_vm10 = vcmask 277504   ;;  %vm499_vm11 = vcmask 271360  }
  0x19   :  { %4656 = vmatmul.mubr.msk.f32.vlgmr.msra.gmra.mrb[0].mxu0 %vm48_vm4, %v36_v5  ;;  %v5310_v3 = vpack.c.bf16 %v249_v2, %v248_v63  ;;  %s5963_s13 = smov 48   ;;  %s5964_s14 = smov 40   ;;  %vm1648_vm12 = vcmask 130048   ;;  %vm1654_vm13 = vcmask 195584  }
  0x1a   :  { %4658 = vmatprep.mubr.msk.f32.mxu0 %vm5951_vm0, %v5952_v1  ;;  %5308 = vmatpush3.bf16.msra.mxu1 %v5307_v62  ;;  %s5965_s15 = smov 16   ;;  %s5966_s0 = smov 24  }
  0x1b   :  { %5309 = vmatprep.subr.bf16.mxu1 %v5950_v0 }
  0x1d   :  { %4659 = vmatmul.mubr.msk.f32.gmra.mrb[2].mxu0 %vm48_vm4, %v37_v6 }
  0x1e   :  { %4661 = vmatprep.mubr.msk.f32.mxu0 %vm5951_vm0, %v5952_v1  ;;  %5311 = vmatpush3.bf16.msra.mxu1 %v5310_v3 }
  0x1f   :  { %5320 = vmatprep.subr.bf16.mxu1 %v5950_v0 }
  0x21   :  { %4662 = vmatmul.mubr.msk.f32.gmra.mrb[4].mxu0 %vm48_vm4, %v38_v7 }
  0x22   :  { %4664 = vmatprep.mubr.msk.f32.mxu0 %vm5951_vm0, %v5952_v1 }
  0x25   :  { %4665 = vmatmul.mubr.msk.f32.gmra.mrb[6].mxu0 %vm48_vm4, %v39_v8 }
  0x26   :  { %4667 = vmatprep.mubr.msk.f32.mxu0 %vm5951_vm0, %v5952_v1 }
  0x29   :  { %4668 = vmatmul.mubr.msk.f32.gmra.mrb[8].mxu0 %vm48_vm4, %v40_v9 }
  0x2a   :  { %4703 = vmatprep.mubr.msk.f32.mxu0 %vm5951_vm0, %v5952_v1 }
  0xec   :  { %v134_v11 = vpop.f32.mrb[0].mxu0 }
  0xed   :  { %v6040_v12 = vadd.f32 %v134_v11, %v43_v10  ;;  %v4657_v13 = vpop.f32.mrb[1].mxu0 }
  0xef   :  { %v161_v15 = vsel %vm160_vm5, %v6040_v12, 0.0 }
  0xf0   :  { %162 = vadd.xlane.f32.xlu0 %v161_v15  ;;  %v139_v16 = vpop.f32.mrb[2].mxu0 }
  0xf1   :  { %v6047_v17 = vadd.f32 %v139_v16, %v44_v14  ;;  %v4660_v18 = vpop.f32.mrb[3].mxu0 }
  0xf3   :  { %v164_v20 = vsel %vm160_vm5, %v6047_v17, 0.0 }
  0xf4   :  { %165 = vadd.xlane.f32.xlu0 %v164_v20  ;;  %v144_v21 = vpop.f32.mrb[4].mxu0 }
  0xf5   :  { %v6054_v22 = vadd.f32 %v144_v21, %v45_v19  ;;  %v4663_v23 = vpop.f32.mrb[5].mxu0  ;;  %v4212_v19 = vld [vmem:[#allocation2 + $0x20] ss:$0 sm:$0xff] }
  0xf7   :  { %v167_v25 = vsel %vm160_vm5, %v6054_v22, 0.0 }
  0xf8   :  { %168 = vadd.xlane.f32.xlu1 %v167_v25  ;;  %v149_v26 = vpop.f32.mrb[6].mxu0 }
  0xf9   :  { %v6061_v27 = vadd.f32 %v149_v26, %v46_v24  ;;  %v4666_v28 = vpop.f32.mrb[7].mxu0  ;;  %v4213_v24 = vld [vmem:[#allocation2 + $0x28] ss:$0 sm:$0xff] }
  0xfb   :  { %v170_v30 = vsel %vm160_vm5, %v6061_v27, 0.0 }
  0xfc   :  { %171 = vadd.xlane.f32.xlu1 %v170_v30  ;;  %v154_v31 = vpop.f32.mrb[8].mxu0 }
  0xfd   :  { %v6068_v32 = vadd.f32 %v154_v31, %v47_v29  ;;  %v4669_v33 = vpop.f32.mrb[9].mxu0 }
  0xff   :  { %v174_v34 = vsel %vm173_vm6, %v6068_v32, 0.0 }
 0x100   :  { %175 = vadd.xlane.f32.xlu0 %v174_v34 }
 0x17d   :  { %v163_v35 = vpop.xlane.xlu0 %162 }
 0x17e   :  { %v178_v36 = vmul.f32 0.03125, %v163_v35 }
 0x180   :  { %v183_v37 = vsub.f32 %v6040_v12, %v178_v36 }
 0x181   :  { %v166_v38 = vpop.xlane.xlu0 %165 }
 0x182   :  { %v179_v39 = vmul.f32 0.03125, %v166_v38  ;;  %v188_v40 = vmul.f32 %v183_v37, %v183_v37 }
 0x184   :  { %v184_v41 = vsub.f32 %v6047_v17, %v179_v39  ;;  %v193_v42 = vsel %vm160_vm5, %v188_v40, 0.0 }
 0x185   :  { %v169_v43 = vpop.xlane.xlu1 %168  ;;  %194 = vadd.xlane.f32.xlu1 %v193_v42 }
 0x186   :  { %v180_v44 = vmul.f32 0.03125, %v169_v43  ;;  %v189_v45 = vmul.f32 %v184_v41, %v184_v41 }
 0x188   :  { %v185_v46 = vsub.f32 %v6054_v22, %v180_v44  ;;  %v196_v47 = vsel %vm160_vm5, %v189_v45, 0.0 }
 0x189   :  { %v172_v48 = vpop.xlane.xlu1 %171  ;;  %197 = vadd.xlane.f32.xlu0 %v196_v47 }
 0x18a   :  { %v181_v49 = vmul.f32 0.03125, %v172_v48  ;;  %v190_v50 = vmul.f32 %v185_v46, %v185_v46  ;;  %v4214_v48 = vld [vmem:[#allocation2 + $0x50] ss:$0 sm:$0xff] }
 0x18c   :  { %v186_v51 = vsub.f32 %v6061_v27, %v181_v49  ;;  %v199_v52 = vsel %vm160_vm5, %v190_v50, 0.0 }
 0x18d   :  { %200 = vadd.xlane.f32.xlu1 %v199_v52  ;;  %v176_v53 = vpop.xlane.xlu0 %175 }
 0x18e   :  { %v182_v54 = vmul.f32 0.03125, %v176_v53  ;;  %v191_v55 = vmul.f32 %v186_v51, %v186_v51 }
 0x190   :  { %v187_v56 = vsub.f32 %v6068_v32, %v182_v54  ;;  %v202_v57 = vsel %vm160_vm5, %v191_v55, 0.0 }
 0x191   :  { %203 = vadd.xlane.f32.xlu0 %v202_v57 }
 0x192   :  { %v192_v58 = vmul.f32 %v187_v56, %v187_v56 }
 0x194   :  { %v205_v59 = vsel %vm173_vm6, %v192_v58, 0.0 }
 0x195   :  { %206 = vadd.xlane.f32.xlu1 %v205_v59 }
 0x212   :  { %v195_v4 = vpop.xlane.xlu1 %194 }
 0x213   :  { %v208_v5 = vmul.f32 0.03125, %v195_v4 }
 0x215   :  { %v213_v6 = vadd.f32 1e-05, %v208_v5 }
 0x216   :  { %v198_v7 = vpop.xlane.xlu0 %197 }
 0x217   :  { %5688 = vrsqrt.f32 %v213_v6  ;;  %v209_v8 = vmul.f32 0.03125, %v198_v7 }
 0x219   :  { %v214_v9 = vadd.f32 1e-05, %v209_v8 }
 0x21a   :  { %v201_v10 = vpop.xlane.xlu1 %200 }
 0x21b   :  { %5690 = vrsqrt.f32 %v214_v9  ;;  %v210_v11 = vmul.f32 0.03125, %v201_v10 }
 0x21d   :  { %v215_v13 = vadd.f32 1e-05, %v210_v11 }
 0x21e   :  { %v204_v14 = vpop.xlane.xlu0 %203 }
 0x21f   :  { %5692 = vrsqrt.f32 %v215_v13  ;;  %v211_v15 = vmul.f32 0.03125, %v204_v14 }
 0x221   :  { %v5689_v16 = vpop.eup %5688  ;;  %v216_v18 = vadd.f32 1e-05, %v211_v15 }
 0x222   :  { %v207_v20 = vpop.xlane.xlu1 %206  ;;  %v223_v21 = vmul.f32 %v5689_v16, %v183_v37 }
 0x223   :  { %5694 = vrsqrt.f32 %v216_v18  ;;  %v212_v23 = vmul.f32 0.03125, %v207_v20 }
 0x224   :  { %v232_v25 = vmul.f32 %v4212_v19, %v223_v21 }
 0x225   :  { %v5691_v26 = vpop.eup %5690  ;;  %v217_v28 = vadd.f32 1e-05, %v212_v23 }
 0x226   :  { %v241_v29 = vadd.f32 %v4213_v24, %v232_v25  ;;  %v224_v30 = vmul.f32 %v5691_v26, %v184_v41 }
 0x227   :  { %5696 = vrsqrt.f32 %v217_v28 }
 0x228   :  { %4679 = vmatmul.mubr.msk.f32.vlgmr.msra.gmra.mrb[0].mxu1 %vm160_vm5, %v241_v29  ;;  %v233_v31 = vmul.f32 %v4212_v19, %v224_v30 }
 0x229   :  { %v5693_v33 = vpop.eup %5692  ;;  %4681 = vmatprep.mubr.msk.f32.mxu1 %vm5951_vm0, %v5952_v1 }
 0x22a   :  { %v242_v34 = vadd.f32 %v4213_v24, %v233_v31  ;;  %v225_v35 = vmul.f32 %v5693_v33, %v185_v46 }
 0x22c   :  { %4682 = vmatmul.mubr.msk.f32.gmra.mrb[2].mxu1 %vm160_vm5, %v242_v34  ;;  %v234_v36 = vmul.f32 %v4212_v19, %v225_v35 }
 0x22d   :  { %v5695_v37 = vpop.eup %5694  ;;  %4684 = vmatprep.mubr.msk.f32.mxu1 %vm5951_vm0, %v5952_v1 }
 0x22e   :  { %v243_v38 = vadd.f32 %v4213_v24, %v234_v36  ;;  %v226_v39 = vmul.f32 %v5695_v37, %v186_v51 }
 0x230   :  { %4685 = vmatmul.mubr.msk.f32.gmra.mrb[4].mxu1 %vm160_vm5, %v243_v38  ;;  %v235_v40 = vmul.f32 %v4212_v19, %v226_v39 }
 0x231   :  { %v5697_v41 = vpop.eup %5696  ;;  %4687 = vmatprep.mubr.msk.f32.mxu1 %vm5951_vm0, %v5952_v1 }
 0x232   :  { %v244_v42 = vadd.f32 %v4213_v24, %v235_v40  ;;  %v227_v43 = vmul.f32 %v5697_v41, %v187_v56 }
 0x234   :  { %4688 = vmatmul.mubr.msk.f32.gmra.mrb[6].mxu1 %vm160_vm5, %v244_v42  ;;  %v236_v44 = vmul.f32 %v4212_v19, %v227_v43 }
 0x235   :  { %4690 = vmatprep.mubr.msk.f32.mxu1 %vm5951_vm0, %v5952_v1 }
 0x236   :  { %v245_v45 = vadd.f32 %v4213_v24, %v236_v44 }
 0x238   :  { %4691 = vmatmul.mubr.msk.f32.gmra.mrb[8].mxu1 %vm160_vm5, %v245_v45 }
 0x239   :  { %4728 = vmatprep.mubr.msk.f32.mxu1 %vm5951_vm0, %v5952_v1 }
 0x2fb   :  { %v336_v46 = vpop.f32.mrb[0].mxu1 }
 0x2fc   :  { %v4680_v47 = vpop.f32.mrb[1].mxu1  ;;  %v6099_v50 = vadd.f32 %v4214_v48, %v336_v46 }
 0x2ff   :  { %v341_v49 = vpop.f32.mrb[2].mxu1 }
 0x300   :  { %v6101_v51 = vadd.f32 %v4214_v48, %v341_v49  ;;  %v4683_v52 = vpop.f32.mrb[3].mxu1 }
 0x302   :  { %v6105_v53 = vpack.i.bf16 %v6101_v51, %v6099_v50 }
 0x303   :  { %v346_v54 = vpop.f32.mrb[4].mxu1 }
 0x304   :  { %5529 = vrot.lane.b32.xlu0 %v6105_v53, %s5954_s1  ;;  %v4686_v55 = vpop.f32.mrb[5].mxu1  ;;  %v6109_v57 = vadd.f32 %v4214_v48, %v346_v54 }
 0x307   :  { %v351_v56 = vpop.f32.mrb[6].mxu1 }
 0x308   :  { %v6111_v58 = vadd.f32 %v4214_v48, %v351_v56  ;;  %v4689_v59 = vpop.f32.mrb[7].mxu1 }
 0x30a   :  { %v6115_v60 = vpack.i.bf16 %v6111_v58, %v6109_v57 }
 0x30b   :  { %v356_v61 = vpop.f32.mrb[8].mxu1 }
 0x30c   :  { %5544 = vrot.lane.b32.xlu0 %v6115_v60, %s5955_s21  ;;  %5534 = vrot.lane.b32.xlu1 %v6115_v60, %s5954_s1  ;;  %v4692_v62 = vpop.f32.mrb[9].mxu1  ;;  %v6121_v63 = vadd.f32 %v4214_v48, %v356_v61 }
 0x310   :  { %5549 = vrot.lane.b32.xlu0 %v6105_v53, %s5956_s22  ;;  %373 = vrot.lane.b32.xlu1 %v6121_v63, %s5954_s1 }
 0x314   :  { %667 = vrot.lane.b32.xlu0 %v6101_v51, %s5957_s23  ;;  %5539 = vrot.lane.b32.xlu1 %v6105_v53, %s5955_s21 }
 0x318   :  { %669 = vrot.lane.b32.xlu0 %v6109_v57, %s5957_s23  ;;  %683 = vrot.lane.b32.xlu1 %v6121_v63, %s5955_s21 }
 0x31c   :  { %673 = vrot.lane.b32.xlu0 %v6121_v63, %s5957_s23  ;;  %665 = vrot.lane.b32.xlu1 %v6099_v50, %s5957_s23 }
 0x320   :  { %5559 = vrot.lane.b32.xlu0 %v6105_v53, %s5958_s24  ;;  %5554 = vrot.lane.b32.xlu1 %v6115_v60, %s5956_s22 }
 0x324   :  { %973 = vrot.lane.b32.xlu0 %v6101_v51, %s5959_s25  ;;  %671 = vrot.lane.b32.xlu1 %v6111_v58, %s5957_s23 }
 0x328   :  { %975 = vrot.lane.b32.xlu0 %v6109_v57, %s5959_s25  ;;  %989 = vrot.lane.b32.xlu1 %v6121_v63, %s5956_s22 }
 0x32c   :  { %979 = vrot.lane.b32.xlu0 %v6121_v63, %s5959_s25  ;;  %971 = vrot.lane.b32.xlu1 %v6099_v50, %s5959_s25 }
 0x330   :  { %1277 = vrot.lane.b32.xlu0 %v6099_v50, %s5960_s27  ;;  %5564 = vrot.lane.b32.xlu1 %v6115_v60, %s5958_s24 }
 0x334   :  { %1281 = vrot.lane.b32.xlu0 %v6109_v57, %s5960_s27  ;;  %977 = vrot.lane.b32.xlu1 %v6111_v58, %s5959_s25 }
 0x338   :  { %1285 = vrot.lane.b32.xlu0 %v6121_v63, %s5960_s27  ;;  %1295 = vrot.lane.b32.xlu1 %v6121_v63, %s5958_s24 }
 0x33c   :  { %5569 = vrot.lane.b32.xlu0 %v6105_v53, %s5961_s28  ;;  %1279 = vrot.lane.b32.xlu1 %v6101_v51, %s5960_s27 }
 0x340   :  { %5584 = vrot.lane.b32.xlu0 %v6115_v60, %s5962_s3  ;;  %1283 = vrot.lane.b32.xlu1 %v6111_v58, %s5960_s27 }
 0x344   :  { %551 = vrot.lane.b32.xlu0 %v6121_v63, %s5961_s28  ;;  %5574 = vrot.lane.b32.xlu1 %v6115_v60, %s5961_s28 }
 0x348   :  { %5579 = vrot.lane.b32.xlu1 %v6105_v53, %s5962_s3 }
 0x376   :  { %v5530_v2 = vpop.permute.xlu0 %5529 }
 0x377   :  { %v5532_v3 = vunpack.i.h.bf16 %v5530_v2  ;;  %v5531_v4 = vunpack.i.l.bf16 %v5530_v2 }
 0x379   :  { %v5313_v6 = vpack.c.bf16 %v5532_v3, %v5531_v4 }
 0x37b   :  { %5315 = vmatpush3.bf16.xpose.msk.msra.mxu0 %vm6183_vm8, %v5313_v6 }
 0x37c   :  { %5316 = vmatprep.subr.bf16.mxu0 %v5950_v0 }
 0x37e   :  { %v5535_v7 = vpop.permute.xlu1 %5534  ;;  %v5545_v8 = vpop.permute.xlu0 %5544 }
 0x37f   :  { %v5537_v9 = vunpack.i.h.bf16 %v5535_v7  ;;  %v5536_v10 = vunpack.i.l.bf16 %v5535_v7  ;;  %v5547_v26 = vunpack.i.h.bf16 %v5545_v8  ;;  %v5546_v28 = vunpack.i.l.bf16 %v5545_v8 }
 0x381   :  { %v5317_v11 = vpack.c.bf16 %v5537_v9, %v5536_v10  ;;  %v5331_v31 = vpack.c.bf16 %v5547_v26, %v5546_v28 }
 0x382   :  { %v374_v13 = vpop.permute.xlu1 %373  ;;  %v5550_v14 = vpop.permute.xlu0 %5549 }
 0x383   :  { %5319 = vmatpush3.bf16.xpose.msk.msra.mxu0 %vm6183_vm8, %v5317_v11  ;;  %v5552_v37 = vunpack.i.h.bf16 %v5550_v14  ;;  %v5551_v38 = vunpack.i.l.bf16 %v5550_v14  ;;  %v6305_v11 = vld [vmem:[%s7571_s2] sm:$0xff] }
 0x384   :  { %4701 = vmatprep.subr.mxu0 %v5952_v1 }
 0x385   :  { %v5341_v41 = vpack.c.bf16 %v5552_v37, %v5551_v38 }
 0x386   :  { %v5540_v15 = vpop.permute.xlu1 %5539  ;;  %v668_v16 = vpop.permute.xlu0 %667 }
 0x387   :  { %v5542_v18 = vunpack.i.h.bf16 %v5540_v15  ;;  %v5541_v19 = vunpack.i.l.bf16 %v5540_v15 }
 0x389   :  { %v5327_v23 = vpack.c.bf16 %v5542_v18, %v5541_v19 }
 0x38a   :  { %v684_v20 = vpop.permute.xlu1 %683  ;;  %v670_v21 = vpop.permute.xlu0 %669 }
 0x38b   :  { %4702 = vmatpush3.xpose.msk.msra.mxu0 %vm375_vm7, %v374_v13 }
 0x38c   :  { %5326 = vmatprep.subr.bf16.mxu0 %v5950_v0 }
 0x38e   :  { %v666_v24 = vpop.permute.xlu1 %665  ;;  %v674_v25 = vpop.permute.xlu0 %673  ;;  %4704 = vmatmul.mubr.msk.f32.vlgmr.msra.gmra.mrb[10].mxu0 %vm375_vm7, %v6099_v50 }
 0x38f   :  { %5329 = vmatpush3.bf16.xpose.msk.msra.mxu0 %vm6183_vm8, %v5327_v23  ;;  %4706 = vmatprep.mubr.msk.f32.mxu0 %vm5951_vm0, %v5952_v1  ;;  %v6323_v23 = vld [vmem:[%s7571_s2 + $0x10] sm:$0xff] }
 0x390   :  { %5330 = vmatprep.subr.bf16.mxu0 %v5950_v0 }
 0x392   :  { %v5555_v29 = vpop.permute.xlu1 %5554  ;;  %v5560_v30 = vpop.permute.xlu0 %5559  ;;  %4707 = vmatmul.mubr.msk.f32.gmra.mrb[12].mxu0 %vm375_vm7, %v6101_v51 }
 0x393   :  { %4709 = vmatprep.mubr.msk.f32.mxu0 %vm5951_vm0, %v5952_v1  ;;  %v5557_v44 = vunpack.i.h.bf16 %v5555_v29  ;;  %v5556_v45 = vunpack.i.l.bf16 %v5555_v29  ;;  %v5562_v56 = vunpack.i.h.bf16 %v5560_v30  ;;  %v6333_v29 = vld [vmem:[%s7571_s2 + $0x18] sm:$0xff] }
 0x395   :  { %v5345_v48 = vpack.c.bf16 %v5557_v44, %v5556_v45 }
 0x396   :  { %v672_v33 = vpop.permute.xlu1 %671  ;;  %v6206_v34 = vpop.permute.xlu0 %973  ;;  %4710 = vmatmul.mubr.msk.f32.gmra.mrb[14].mxu0 %vm375_vm7, %v6109_v57  ;;  %v5561_v57 = vunpack.i.l.bf16 %v5560_v30 }
 0x397   :  { %5333 = vmatpush3.bf16.xpose.msk.msra.mxu0 %vm6183_vm8, %v5331_v31  ;;  %4712 = vmatprep.mubr.msk.f32.mxu0 %vm5951_vm0, %v5952_v1 }
 0x398   :  { %4751 = vmatprep.subr.mxu0 %v5952_v1  ;;  %v5355_v61 = vpack.c.bf16 %v5562_v56, %v5561_v57 }
 0x39a   :  { %v990_v35 = vpop.permute.xlu1 %989  ;;  %v6215_v36 = vpop.permute.xlu0 %975  ;;  %4713 = vmatmul.mubr.msk.f32.gmra.mrb[16].mxu0 %vm375_vm7, %v6111_v58 }
 0x39b   :  { %4715 = vmatprep.mubr.msk.f32.mxu0 %vm5951_vm0, %v5952_v1 }
 0x39e   :  { %v972_v39 = vpop.permute.xlu1 %971  ;;  %v6221_v40 = vpop.permute.xlu0 %979  ;;  %4716 = vmatmul.mubr.msk.f32.gmra.mrb[18].mxu0 %vm375_vm7, %v6121_v63 }
 0x39f   :  { %4752 = vmatpush3.xpose.msk.msra.mxu0 %vm375_vm7, %v684_v20  ;;  %4753 = vmatprep.mubr.msk.f32.mxu0 %vm5951_vm0, %v5952_v1 }
 0x3a0   :  { %5340 = vmatprep.subr.bf16.mxu0 %v5950_v0 }
 0x3a2   :  { %v5565_v42 = vpop.permute.xlu1 %5564  ;;  %v6229_v43 = vpop.permute.xlu0 %1277  ;;  %4754 = vmatmul.mubr.msk.f32.vlgmr.msra.gmra.mrb[20].mxu0 %vm375_vm7, %v666_v24 }
 0x3a3   :  { %5343 = vmatpush3.bf16.xpose.msk.msra.mxu0 %vm6183_vm8, %v5341_v41  ;;  %4756 = vmatprep.mubr.msk.f32.mxu0 %vm5951_vm0, %v5952_v1  ;;  %v5567_v6 = vunpack.i.h.bf16 %v5565_v42  ;;  %v5566_v7 = vunpack.i.l.bf16 %v5565_v42 }
 0x3a4   :  { %5344 = vmatprep.subr.bf16.mxu0 %v5950_v0 }
 0x3a5   :  { %v5359_v9 = vpack.c.bf16 %v5567_v6, %v5566_v7 }
 0x3a6   :  { %v978_v46 = vpop.permute.xlu1 %977  ;;  %v1282_v47 = vpop.permute.xlu0 %1281  ;;  %4757 = vmatmul.mubr.msk.f32.gmra.mrb[22].mxu0 %vm375_vm7, %v668_v16  ;;  %v6313_v16 = vld [vmem:[%s7571_s2 + $0x8] sm:$0xff] }
 0x3a7   :  { %4759 = vmatprep.mubr.msk.f32.mxu0 %vm5951_vm0, %v5952_v1 }
 0x3aa   :  { %v1296_v49 = vpop.permute.xlu1 %1295  ;;  %v1286_v50 = vpop.permute.xlu0 %1285  ;;  %4760 = vmatmul.mubr.msk.f32.gmra.mrb[24].mxu0 %vm375_vm7, %v670_v21 }
 0x3ab   :  { %5347 = vmatpush3.bf16.xpose.msk.msra.mxu0 %vm6183_vm8, %v5345_v48  ;;  %4762 = vmatprep.mubr.msk.f32.mxu0 %vm5951_vm0, %v5952_v1 }
 0x3ac   :  { %4801 = vmatprep.subr.mxu0 %v5952_v1 }
 0x3ae   :  { %v1280_v51 = vpop.permute.xlu1 %1279  ;;  %v5570_v52 = vpop.permute.xlu0 %5569  ;;  %4763 = vmatmul.mubr.msk.f32.gmra.mrb[26].mxu0 %vm375_vm7, %v672_v33 }
 0x3af   :  { %v5572_v54 = vunpack.i.h.bf16 %v5570_v52  ;;  %v5571_v55 = vunpack.i.l.bf16 %v5570_v52  ;;  %4765 = vmatprep.mubr.msk.f32.mxu0 %vm5951_vm0, %v5952_v1 }
 0x3b1   :  { %v5321_v58 = vpack.c.bf16 %v5572_v54, %v5571_v55 }
 0x3b2   :  { %v1284_v59 = vpop.permute.xlu1 %1283  ;;  %4766 = vmatmul.mubr.msk.f32.gmra.mrb[28].mxu0 %vm375_vm7, %v674_v25  ;;  %v6260_v4 = vpop.permute.xlu0 %5584 }
 0x3b3   :  { %5322 = vmatpush3.bf16.msra.mxu1 %v5321_v58  ;;  %4802 = vmatpush3.xpose.msk.msra.mxu0 %vm375_vm7, %v990_v35  ;;  %v6343_v35 = vld [vmem:[%s7571_s2 + $0x20] sm:$0x3] }
 0x3b4   :  { %4803 = vmatprep.mubr.msk.f32.mxu0 %vm5951_vm0, %v5952_v1  ;;  %5354 = vmatprep.subr.bf16.mxu0 %v5950_v0 }
 0x3b5   :  { %5323 = vmatprep.subr.bf16.mxu1 %v5950_v0 }
 0x3b6   :  { %v5575_v62 = vpop.permute.xlu1 %5574  ;;  %4804 = vmatmul.mubr.msk.f32.vlgmr.msra.gmra.mrb[30].mxu0 %vm375_vm7, %v972_v39  ;;  %v552_v10 = vpop.permute.xlu0 %551 }
 0x3b7   :  { %v5577_v2 = vunpack.i.h.bf16 %v5575_v62  ;;  %v5576_v3 = vunpack.i.l.bf16 %v5575_v62  ;;  %5357 = vmatpush3.bf16.xpose.msk.msra.mxu0 %vm6183_vm8, %v5355_v61  ;;  %4806 = vmatprep.mubr.msk.f32.mxu0 %vm5951_vm0, %v5952_v1 }
 0x3b8   :  { %5358 = vmatprep.subr.bf16.mxu0 %v5950_v0 }
 0x3b9   :  { %v5324_v8 = vpack.c.bf16 %v5577_v2, %v5576_v3 }
 0x3ba   :  { %4807 = vmatmul.mubr.msk.f32.gmra.mrb[32].mxu0 %vm375_vm7, %v6206_v34 }
 0x3bb   :  { %5325 = vmatpush3.bf16.msra.mxu1 %v5324_v8  ;;  %4809 = vmatprep.mubr.msk.f32.mxu0 %vm5951_vm0, %v5952_v1 }
 0x3bc   :  { %4726 = vmatprep.subr.mxu1 %v5952_v1 }
 0x3be   :  { %4810 = vmatmul.mubr.msk.f32.gmra.mrb[34].mxu0 %vm375_vm7, %v6215_v36 }
 0x3bf   :  { %4727 = vmatpush3.msk.msra.mxu1 %vm572_vm9, %v552_v10  ;;  %5361 = vmatpush3.bf16.xpose.msk.msra.mxu0 %vm6183_vm8, %v5359_v9 }
 0x3c0   :  { %4812 = vmatprep.mubr.msk.f32.mxu0 %vm5951_vm0, %v5952_v1  ;;  %4851 = vmatprep.subr.mxu0 %v5952_v1 }
 0x3c1   :  { %5334 = vmatprep.subr.bf16.mxu1 %v5950_v0 }
 0x3c2   :  { %4813 = vmatmul.mubr.msk.f32.gmra.mrb[36].mxu0 %vm375_vm7, %v978_v46 }
 0x3c3   :  { %4815 = vmatprep.mubr.msk.f32.mxu0 %vm5951_vm0, %v5952_v1 }
 0x3c6   :  { %4816 = vmatmul.mubr.msk.f32.gmra.mrb[38].mxu0 %vm375_vm7, %v6221_v40 }
 0x3c7   :  { %4852 = vmatpush3.xpose.msk.msra.mxu0 %vm375_vm7, %v1296_v49  ;;  %4853 = vmatprep.mubr.msk.f32.mxu0 %vm5951_vm0, %v5952_v1 }
 0x3c8   :  { %5362 = vmatprep.subr.bf16.mxu0 %v5950_v0 }
 0x3ca   :  { %4854 = vmatmul.mubr.msk.f32.vlgmr.msra.gmra.mrb[40].mxu0 %vm375_vm7, %v6229_v43 }
 0x3cb   :  { %4856 = vmatprep.mubr.msk.f32.mxu0 %vm5951_vm0, %v5952_v1 }
 0x3ce   :  { %4857 = vmatmul.mubr.msk.f32.gmra.mrb[42].mxu0 %vm375_vm7, %v1280_v51 }
 0x3cf   :  { %4859 = vmatprep.mubr.msk.f32.mxu0 %vm5951_vm0, %v5952_v1 }
 0x3d2   :  { %4860 = vmatmul.mubr.msk.f32.gmra.mrb[44].mxu0 %vm375_vm7, %v1282_v47 }
 0x3d3   :  { %4862 = vmatprep.mubr.msk.f32.mxu0 %vm5951_vm0, %v5952_v1 }
 0x3d6   :  { %4863 = vmatmul.mubr.msk.f32.gmra.mrb[46].mxu0 %vm375_vm7, %v1284_v59 }
 0x3d7   :  { %4865 = vmatprep.mubr.msk.f32.mxu0 %vm5951_vm0, %v5952_v1 }
 0x3da   :  { %4866 = vmatmul.mubr.msk.f32.gmra.mrb[48].mxu0 %vm375_vm7, %v1286_v50 }
 0x3db   :  { %4878 = vmatprep.mubr.msk.f32.mxu0 %vm5951_vm0, %v5952_v1 }
 0x461   :  { %v462_v13 = vpop.f32.mrb[10].mxu0 }
 0x462   :  { %v6308_v14 = vadd.f32 %v462_v13, %v6305_v11  ;;  %v4705_v15 = vpop.f32.mrb[11].mxu0 }
 0x464   :  { %v487_v18 = vsel %vm486_vm10, %v6308_v14, -inf }
 0x465   :  { %v467_v19 = vpop.f32.mrb[12].mxu0  ;;  %488 = vmax.xlane.f32.xlu1 %v487_v18 }
 0x466   :  { %v6318_v20 = vadd.f32 %v467_v19, %v6313_v16  ;;  %v4708_v21 = vpop.f32.mrb[13].mxu0 }
 0x468   :  { %v490_v24 = vsel %vm486_vm10, %v6318_v20, -inf }
 0x469   :  { %v472_v25 = vpop.f32.mrb[14].mxu0  ;;  %491 = vmax.xlane.f32.xlu0 %v490_v24 }
 0x46a   :  { %v6328_v26 = vadd.f32 %v472_v25, %v6323_v23  ;;  %v4711_v28 = vpop.f32.mrb[15].mxu0 }
 0x46c   :  { %v493_v30 = vsel %vm486_vm10, %v6328_v26, -inf }
 0x46d   :  { %v477_v31 = vpop.f32.mrb[16].mxu0  ;;  %494 = vmax.xlane.f32.xlu0 %v493_v30 }
 0x46e   :  { %v6338_v33 = vadd.f32 %v477_v31, %v6333_v29  ;;  %v4714_v34 = vpop.f32.mrb[17].mxu0 }
 0x470   :  { %v496_v36 = vsel %vm486_vm10, %v6338_v33, -inf }
 0x471   :  { %v482_v37 = vpop.f32.mrb[18].mxu0  ;;  %497 = vmax.xlane.f32.xlu0 %v496_v36 }
 0x472   :  { %v6348_v38 = vadd.f32 %v482_v37, %v6343_v35  ;;  %v4717_v39 = vpop.f32.mrb[19].mxu0 }
 0x474   :  { %v500_v40 = vsel %vm499_vm11, %v6348_v38, -inf }
 0x475   :  { %v771_v41 = vpop.f32.mrb[20].mxu0  ;;  %501 = vmax.xlane.f32.xlu1 %v500_v40 }
 0x476   :  { %v6353_v42 = vadd.f32 %v771_v41, %v6305_v11  ;;  %v4755_v43 = vpop.f32.mrb[21].mxu0 }
 0x478   :  { %v795_v44 = vsel %vm486_vm10, %v6353_v42, -inf }
 0x479   :  { %v776_v45 = vpop.f32.mrb[22].mxu0  ;;  %796 = vmax.xlane.f32.xlu0 %v795_v44 }
 0x47a   :  { %v6358_v46 = vadd.f32 %v776_v45, %v6313_v16  ;;  %v4758_v47 = vpop.f32.mrb[23].mxu0 }
 0x47c   :  { %v798_v48 = vsel %vm486_vm10, %v6358_v46, -inf }
 0x47d   :  { %v781_v49 = vpop.f32.mrb[24].mxu0  ;;  %799 = vmax.xlane.f32.xlu1 %v798_v48 }
 0x47e   :  { %v6363_v50 = vadd.f32 %v781_v49, %v6323_v23  ;;  %v4761_v51 = vpop.f32.mrb[25].mxu0 }
 0x480   :  { %v801_v52 = vsel %vm486_vm10, %v6363_v50, -inf }
 0x481   :  { %v786_v54 = vpop.f32.mrb[26].mxu0  ;;  %802 = vmax.xlane.f32.xlu0 %v801_v52 }
 0x482   :  { %v6368_v55 = vadd.f32 %v786_v54, %v6333_v29  ;;  %v4764_v56 = vpop.f32.mrb[27].mxu0 }
 0x484   :  { %v804_v57 = vsel %vm486_vm10, %v6368_v55, -inf }
 0x485   :  { %v791_v58 = vpop.f32.mrb[28].mxu0  ;;  %805 = vmax.xlane.f32.xlu1 %v804_v57 }
 0x486   :  { %v6373_v59 = vadd.f32 %v791_v58, %v6343_v35  ;;  %v4767_v61 = vpop.f32.mrb[29].mxu0 }
 0x488   :  { %v807_v62 = vsel %vm499_vm11, %v6373_v59, -inf }
 0x489   :  { %v1077_v2 = vpop.f32.mrb[30].mxu0  ;;  %808 = vmax.xlane.f32.xlu0 %v807_v62  ;;  %v6431_v62 = vpop.permute.xlu1 %5579 }
 0x48a   :  { %v4805_v3 = vpop.f32.mrb[31].mxu0  ;;  %v6382_v39 = vadd.f32 %v1077_v2, %v6305_v11 }
 0x48c   :  { %v1101_v43 = vsel %vm486_vm10, %v6382_v39, -inf }
 0x48d   :  { %v1082_v6 = vpop.f32.mrb[32].mxu0 }
 0x48e   :  { %v4808_v7 = vpop.f32.mrb[33].mxu0  ;;  %v6385_v40 = vadd.f32 %v1082_v6, %v6313_v16 }
 0x490   :  { %v1104_v47 = vsel %vm486_vm10, %v6385_v40, -inf }
 0x491   :  { %v1087_v8 = vpop.f32.mrb[34].mxu0 }
 0x492   :  { %v4811_v9 = vpop.f32.mrb[35].mxu0  ;;  %v6388_v41 = vadd.f32 %v1087_v8, %v6323_v23 }
 0x494   :  { %v1107_v48 = vsel %vm486_vm10, %v6388_v41, -inf }
 0x495   :  { %v1092_v10 = vpop.f32.mrb[36].mxu0 }
 0x496   :  { %v4814_v13 = vpop.f32.mrb[37].mxu0  ;;  %5589 = vrot.lane.b32.xlu1 %v6105_v53, %s5963_s13  ;;  %v6393_v44 = vadd.f32 %v1092_v10, %v6333_v29 }
 0x499   :  { %v1097_v15 = vpop.f32.mrb[38].mxu0 }
 0x49a   :  { %v4817_v18 = vpop.f32.mrb[39].mxu0  ;;  %v6403_v49 = vadd.f32 %v1097_v15, %v6343_v35 }
 0x49d   :  { %v1383_v19 = vpop.f32.mrb[40].mxu0 }
 0x49e   :  { %v4855_v21 = vpop.f32.mrb[41].mxu0  ;;  %v6396_v45 = vadd.f32 %v1383_v19, %v6305_v11  ;;  %v1110_v11 = vsel %vm486_vm10, %v6393_v44, -inf }
 0x49f   :  { %858 = vrot.lane.b32.xlu0 %v6121_v63, %s5962_s3 }
 0x4a0   :  { %v1407_v52 = vsel %vm486_vm10, %v6396_v45, -inf }
 0x4a1   :  { %v1388_v24 = vpop.f32.mrb[42].mxu0 }
 0x4a2   :  { %v4858_v25 = vpop.f32.mrb[43].mxu0  ;;  %v6406_v51 = vadd.f32 %v1388_v24, %v6313_v16  ;;  %v1113_v16 = vsel %vm499_vm11, %v6403_v49, -inf }
 0x4a4   :  { %v1410_v57 = vsel %vm486_vm10, %v6406_v51, -inf }
 0x4a5   :  { %v1393_v28 = vpop.f32.mrb[44].mxu0 }
 0x4a6   :  { %v4861_v30 = vpop.f32.mrb[45].mxu0  ;;  %v6413_v54 = vadd.f32 %v1393_v28, %v6323_v23 }
 0x4a8   :  { %v1413_v61 = vsel %vm486_vm10, %v6413_v54, -inf }
 0x4a9   :  { %v1398_v31 = vpop.f32.mrb[46].mxu0 }
 0x4aa   :  { %v4864_v34 = vpop.f32.mrb[47].mxu0  ;;  %v6416_v56 = vadd.f32 %v1398_v31, %v6333_v29 }
 0x4ac   :  { %v1416_v23 = vsel %vm486_vm10, %v6416_v56, -inf }
 0x4ad   :  { %v1403_v36 = vpop.f32.mrb[48].mxu0 }
 0x4ae   :  { %v4867_v37 = vpop.f32.mrb[49].mxu0  ;;  %v6423_v58 = vadd.f32 %v1403_v36, %v6343_v35 }
 0x4b0   :  { %v1419_v29 = vsel %vm499_vm11, %v6423_v58, -inf }
 0x4ba   :  { %1102 = vmax.xlane.f32.xlu1 %v1101_v43 }
 0x4be   :  { %1105 = vmax.xlane.f32.xlu0 %v1104_v47  ;;  %1108 = vmax.xlane.f32.xlu1 %v1107_v48 }
 0x4c2   :  { %1408 = vmax.xlane.f32.xlu0 %v1407_v52  ;;  %1111 = vmax.xlane.f32.xlu1 %v1110_v11 }
 0x4c6   :  { %1411 = vmax.xlane.f32.xlu0 %v1410_v57  ;;  %1114 = vmax.xlane.f32.xlu1 %v1113_v16 }
 0x4ca   :  { %1414 = vmax.xlane.f32.xlu0 %v1413_v61  ;;  %1417 = vmax.xlane.f32.xlu1 %v1416_v23 }
 0x4ce   :  { %1420 = vmax.xlane.f32.xlu0 %v1419_v29 }
 0x4f2   :  { %v489_v2 = vpop.xlane.xlu1 %488 }
 0x4f3   :  { %v503_v3 = vsub.f32 %v6308_v14, %v489_v2 }
 0x4f5   :  { %v508_v6 = vmul.f32 1.442695, %v503_v3 }
 0x4f6   :  { %v492_v35 = vpop.xlane.xlu0 %491 }
 0x4f7   :  { %5698 = vpow2.f32 %v508_v6  ;;  %v504_v7 = vsub.f32 %v6318_v20, %v492_v35 }
 0x4f9   :  { %v510_v8 = vmul.f32 1.442695, %v504_v7 }
 0x4fa   :  { %v495_v9 = vpop.xlane.xlu0 %494 }
 0x4fb   :  { %5700 = vpow2.f32 %v510_v8  ;;  %v505_v10 = vsub.f32 %v6328_v26, %v495_v9 }
 0x4fd   :  { %v512_v13 = vmul.f32 1.442695, %v505_v10 }
 0x4fe   :  { %v498_v15 = vpop.xlane.xlu0 %497 }
 0x4ff   :  { %5702 = vpow2.f32 %v512_v13  ;;  %v506_v18 = vsub.f32 %v6338_v33, %v498_v15 }
 0x501   :  { %v6437_v19 = vpop.eup %5698  ;;  %v514_v21 = vmul.f32 1.442695, %v506_v18 }
 0x502   :  { %v502_v24 = vpop.xlane.xlu1 %501  ;;  %v518_v14 = vsel %vm486_vm10, %v6437_v19, 0.0 }
 0x503   :  { %5704 = vpow2.f32 %v514_v21  ;;  %v507_v20 = vsub.f32 %v6348_v38, %v502_v24  ;;  %519 = vadd.xlane.f32.xlu1 %v518_v14 }
 0x505   :  { %v6442_v25 = vpop.eup %5700  ;;  %v516_v28 = vmul.f32 1.442695, %v507_v20 }
 0x506   :  { %v797_v26 = vpop.xlane.xlu0 %796  ;;  %v521_v30 = vsel %vm486_vm10, %v6442_v25, 0.0 }
 0x507   :  { %5706 = vpow2.f32 %v516_v28  ;;  %v810_v33 = vsub.f32 %v6353_v42, %v797_v26  ;;  %522 = vadd.xlane.f32.xlu0 %v521_v30 }
 0x509   :  { %v6447_v31 = vpop.eup %5702  ;;  %v815_v34 = vmul.f32 1.442695, %v810_v33 }
 0x50a   :  { %v800_v36 = vpop.xlane.xlu1 %799  ;;  %v524_v37 = vsel %vm486_vm10, %v6447_v31, 0.0 }
 0x50b   :  { %5708 = vpow2.f32 %v815_v34  ;;  %v811_v38 = vsub.f32 %v6358_v46, %v800_v36  ;;  %525 = vadd.xlane.f32.xlu1 %v524_v37 }
 0x50d   :  { %v6452_v43 = vpop.eup %5704  ;;  %v817_v47 = vmul.f32 1.442695, %v811_v38 }
 0x50e   :  { %v527_v48 = vsel %vm486_vm10, %v6452_v43, 0.0  ;;  %v803_v61 = vpop.xlane.xlu0 %802 }
 0x50f   :  { %5710 = vpow2.f32 %v817_v47  ;;  %528 = vadd.xlane.f32.xlu0 %v527_v48  ;;  %v812_v23 = vsub.f32 %v6363_v50, %v803_v61 }
 0x511   :  { %v6456_v42 = vpop.eup %5706  ;;  %v819_v2 = vmul.f32 1.442695, %v812_v23 }
 0x512   :  { %v530_v52 = vsel %vm499_vm11, %v6456_v42, 0.0  ;;  %v806_v29 = vpop.xlane.xlu1 %805 }
 0x513   :  { %531 = vadd.xlane.f32.xlu1 %v530_v52  ;;  %v813_v3 = vsub.f32 %v6368_v55, %v806_v29  ;;  %5712 = vpow2.f32 %v819_v2 }
 0x515   :  { %v6460_v11 = vpop.eup %5708  ;;  %v821_v35 = vmul.f32 1.442695, %v813_v3 }
 0x516   :  { %v825_v46 = vsel %vm486_vm10, %v6460_v11, 0.0  ;;  %v809_v6 = vpop.xlane.xlu0 %808  ;;  %v6477_v8 = vpop.permute.xlu1 %5589 }
 0x517   :  { %826 = vadd.xlane.f32.xlu1 %v825_v46  ;;  %v814_v7 = vsub.f32 %v6373_v59, %v809_v6  ;;  %5714 = vpow2.f32 %v821_v35 }
 0x519   :  { %v6464_v57 = vpop.eup %5710 }
 0x51a   :  { %v828_v16 = vsel %vm486_vm10, %v6464_v57, 0.0  ;;  %v6479_v9 = vpop.permute.xlu0 %858 }
 0x51b   :  { %829 = vadd.xlane.f32.xlu0 %v828_v16 }
 0x51d   :  { %v6482_v21 = vpop.eup %5712 }
 0x51e   :  { %v831_v26 = vsel %vm486_vm10, %v6482_v21, 0.0 }
 0x521   :  { %v6488_v30 = vpop.eup %5714 }
 0x528   :  { %5599 = vrot.lane.b32.xlu1 %v6105_v53, %s5964_s14  ;;  %v823_v53 = vmul.f32 1.442695, %v814_v7 }
 0x52a   :  { %5716 = vpow2.f32 %v823_v53 }
 0x52c   :  { %1164 = vrot.lane.b32.xlu1 %v6121_v63, %s5963_s13 }
 0x531   :  { %5594 = vrot.lane.b32.xlu0 %v6115_v60, %s5963_s13 }
 0x534   :  { %v6494_v37 = vpop.eup %5716 }
 0x535   :  { %v837_v16 = vsel %vm499_vm11, %v6494_v37, 0.0 }
 0x547   :  { %v1103_v10 = vpop.xlane.xlu1 %1102 }
 0x548   :  { %v1116_v13 = vsub.f32 %v6382_v39, %v1103_v10 }
 0x54a   :  { %v1121_v50 = vmul.f32 1.442695, %v1116_v13 }
 0x54b   :  { %v1106_v15 = vpop.xlane.xlu0 %1105  ;;  %v1109_v18 = vpop.xlane.xlu1 %1108 }
 0x54c   :  { %5718 = vpow2.f32 %v1121_v50  ;;  %v1117_v55 = vsub.f32 %v6385_v40, %v1106_v15  ;;  %v1118_v59 = vsub.f32 %v6388_v41, %v1109_v18  ;;  %v834_v41 = vsel %vm486_vm10, %v6488_v30, 0.0 }
 0x54e   :  { %v1123_v24 = vmul.f32 1.442695, %v1117_v55  ;;  %v1125_v14 = vmul.f32 1.442695, %v1118_v59 }
 0x54f   :  { %v1409_v20 = vpop.xlane.xlu0 %1408  ;;  %v1112_v28 = vpop.xlane.xlu1 %1111 }
 0x550   :  { %5720 = vpow2.f32 %v1123_v24  ;;  %v1119_v39 = vsub.f32 %v6393_v44, %v1112_v28  ;;  %832 = vadd.xlane.f32.xlu1 %v831_v26  ;;  %v1422_v33 = vsub.f32 %v6396_v45, %v1409_v20 }
 0x551   :  { %5722 = vpow2.f32 %v1125_v14 }
 0x552   :  { %v1127_v34 = vmul.f32 1.442695, %v1119_v39  ;;  %v1427_v48 = vmul.f32 1.442695, %v1422_v33 }
 0x553   :  { %v1412_v40 = vpop.xlane.xlu0 %1411  ;;  %v1115_v36 = vpop.xlane.xlu1 %1114 }
 0x554   :  { %v1120_v38 = vsub.f32 %v6403_v49, %v1115_v36  ;;  %835 = vadd.xlane.f32.xlu1 %v834_v41  ;;  %5724 = vpow2.f32 %v1127_v34  ;;  %v1423_v44 = vsub.f32 %v6406_v51, %v1412_v40  ;;  %v5582_v40 = vunpack.i.h.bf16 %v6431_v62 }
 0x555   :  { %v5581_v36 = vunpack.i.l.bf16 %v6431_v62 }
 0x556   :  { %v6497_v47 = vpop.eup %5718  ;;  %v1129_v52 = vmul.f32 1.442695, %v1120_v38  ;;  %v1429_v29 = vmul.f32 1.442695, %v1423_v44 }
 0x557   :  { %v1415_v46 = vpop.xlane.xlu0 %1414  ;;  %v1418_v45 = vpop.xlane.xlu1 %1417  ;;  %v1131_v61 = vsel %vm486_vm10, %v6497_v47, 0.0 }
 0x558   :  { %v1425_v23 = vsub.f32 %v6416_v56, %v1418_v45  ;;  %838 = vadd.xlane.f32.xlu1 %v837_v16  ;;  %1132 = vadd.xlane.f32.xlu0 %v1131_v61  ;;  %5726 = vpow2.f32 %v1129_v52  ;;  %v1424_v51 = vsub.f32 %v6413_v54, %v1415_v46 }
 0x559   :  { %5728 = vpow2.f32 %v1427_v48  ;;  %v5335_v48 = vpack.c.bf16 %v5582_v40, %v5581_v36 }
 0x55a   :  { %v6505_v49 = vpop.eup %5720  ;;  %v1433_v2 = vmul.f32 1.442695, %v1425_v23  ;;  %v1431_v35 = vmul.f32 1.442695, %v1424_v51 }
 0x55b   :  { %v1134_v3 = vsel %vm486_vm10, %v6505_v49, 0.0  ;;  %v6510_v6 = vpop.eup %5722  ;;  %v1421_v20 = vpop.xlane.xlu0 %1420 }
 0x55c   :  { %1135 = vadd.xlane.f32.xlu1 %v1134_v3  ;;  %5730 = vpow2.f32 %v1433_v2  ;;  %v1137_v56 = vsel %vm486_vm10, %v6510_v6, 0.0  ;;  %v1426_v28 = vsub.f32 %v6423_v58, %v1421_v20  ;;  %v5586_v58 = vunpack.i.l.bf16 %v6260_v4 }
 0x55d   :  { %5732 = vpow2.f32 %v1429_v29 }
 0x55e   :  { %v6514_v7 = vpop.eup %5724  ;;  %5734 = vpow2.f32 %v1431_v35  ;;  %v1435_v39 = vmul.f32 1.442695, %v1426_v28 }
 0x55f   :  { %v1140_v54 = vsel %vm486_vm10, %v6514_v7, 0.0 }
 0x560   :  { %1138 = vadd.xlane.f32.xlu1 %v1137_v56  ;;  %v5592_v56 = vunpack.i.h.bf16 %v6477_v8 }
 0x562   :  { %v6516_v53 = vpop.eup %5726 }
 0x563   :  { %v6520_v10 = vpop.eup %5728  ;;  %v1143_v13 = vsel %vm499_vm11, %v6516_v53, 0.0 }
 0x564   :  { %1141 = vadd.xlane.f32.xlu1 %v1140_v54  ;;  %1144 = vadd.xlane.f32.xlu0 %v1143_v13  ;;  %v1437_v15 = vsel %vm486_vm10, %v6520_v10, 0.0  ;;  %v5591_v54 = vunpack.i.l.bf16 %v6477_v8 }
 0x566   :  { %v6524_v50 = vpop.eup %5730 }
 0x567   :  { %v6528_v18 = vpop.eup %5732  ;;  %v1446_v55 = vsel %vm486_vm10, %v6524_v50, 0.0 }
 0x568   :  { %1438 = vadd.xlane.f32.xlu1 %v1437_v15  ;;  %1447 = vadd.xlane.f32.xlu0 %v1446_v55  ;;  %v1440_v59 = vsel %vm486_vm10, %v6528_v18, 0.0  ;;  %v6534_v24 = vpop.eup %5734  ;;  %v5349_v55 = vpack.c.bf16 %v5592_v56, %v5591_v54 }
 0x569   :  { %v1443_v14 = vsel %vm486_vm10, %v6534_v24, 0.0 }
 0x56c   :  { %1441 = vadd.xlane.f32.xlu1 %v1440_v59 }
 0x570   :  { %1444 = vadd.xlane.f32.xlu1 %v1443_v14 }
 0x57e   :  { %1470 = vrot.lane.b32.xlu0 %v6121_v63, %s5964_s14 }
 0x581   :  { %5604 = vrot.lane.b32.xlu1 %v6115_v60, %s5964_s14  ;;  %v5587_v60 = vunpack.i.h.bf16 %v6260_v4 }
 0x583   :  { %v5338_v46 = vpack.c.bf16 %v5587_v60, %v5586_v58 }
 0x590   :  { %v520_v26 = vpop.xlane.xlu1 %519 }
 0x591   :  { %5736 = vrcp.f32 %v520_v26 }
 0x594   :  { %v523_v33 = vpop.xlane.xlu0 %522 }
 0x595   :  { %5738 = vrcp.f32 %v523_v33 }
 0x596   :  { %5740 = vpow2.f32 %v1435_v39 }
 0x598   :  { %v526_v34 = vpop.xlane.xlu1 %525 }
 0x599   :  { %5742 = vrcp.f32 %v526_v34 }
 0x59b   :  { %v5737_v41 = vpop.eup %5736 }
 0x59c   :  { %v538_v63 = vmul.f32 %v5737_v41, %v6437_v19  ;;  %v529_v38 = vpop.xlane.xlu0 %528 }
 0x59d   :  { %5744 = vrcp.f32 %v529_v38 }
 0x59e   :  { %4729 = vmatmul.mubr.msk.f32.vlgmr.msra.gmra.mrb[10].mxu1 %vm486_vm10, %v538_v63 }
 0x59f   :  { %v5739_v44 = vpop.eup %5738  ;;  %5336 = vmatpush3.bf16.msra.mxu1 %v5335_v48  ;;  %4731 = vmatprep.mubr.msk.f32.mxu1 %vm5951_vm0, %v5952_v1 }
 0x5a0   :  { %v532_v52 = vpop.xlane.xlu1 %531  ;;  %5337 = vmatprep.subr.bf16.mxu1 %v5950_v0  ;;  %v539_v62 = vmul.f32 %v5739_v44, %v6442_v25  ;;  %v6553_v19 = vpop.eup %5740 }
 0x5a1   :  { %5746 = vrcp.f32 %v532_v52  ;;  %v1449_v16 = vsel %vm499_vm11, %v6553_v19, 0.0 }
 0x5a2   :  { %4732 = vmatmul.mubr.msk.f32.gmra.mrb[12].mxu1 %vm486_vm10, %v539_v62 }
 0x5a3   :  { %v5743_v4 = vpop.eup %5742  ;;  %5339 = vmatpush3.bf16.msra.mxu1 %v5338_v46  ;;  %4734 = vmatprep.mubr.msk.f32.mxu1 %vm5951_vm0, %v5952_v1 }
 0x5a4   :  { %v827_v45 = vpop.xlane.xlu1 %826  ;;  %4776 = vmatprep.subr.mxu1 %v5952_v1  ;;  %v540_v61 = vmul.f32 %v5743_v4, %v6447_v31 }
 0x5a5   :  { %5748 = vrcp.f32 %v827_v45  ;;  %1450 = vadd.xlane.f32.xlu1 %v1449_v16 }
 0x5a6   :  { %4735 = vmatmul.mubr.msk.f32.gmra.mrb[14].mxu1 %vm486_vm10, %v540_v61 }
 0x5a7   :  { %v5745_v25 = vpop.eup %5744  ;;  %4777 = vmatpush3.msk.msra.mxu1 %vm572_vm9, %v6479_v9  ;;  %4737 = vmatprep.mubr.msk.f32.mxu1 %vm5951_vm0, %v5952_v1 }
 0x5a8   :  { %v830_v23 = vpop.xlane.xlu0 %829  ;;  %v5600_v29 = vpop.permute.xlu1 %5599  ;;  %v541_v51 = vmul.f32 %v5745_v25, %v6452_v43  ;;  %5348 = vmatprep.subr.bf16.mxu1 %v5950_v0 }
 0x5a9   :  { %5750 = vrcp.f32 %v830_v23  ;;  %v5602_v2 = vunpack.i.h.bf16 %v5600_v29  ;;  %v5601_v31 = vunpack.i.l.bf16 %v5600_v29 }
 0x5aa   :  { %4738 = vmatmul.mubr.msk.f32.gmra.mrb[16].mxu1 %vm486_vm10, %v541_v51 }
 0x5ab   :  { %v5747_v3 = vpop.eup %5746  ;;  %v5363_v35 = vpack.c.bf16 %v5602_v2, %v5601_v31  ;;  %4740 = vmatprep.mubr.msk.f32.mxu1 %vm5951_vm0, %v5952_v1 }
 0x5ac   :  { %v542_v9 = vmul.f32 %v5747_v3, %v6456_v42  ;;  %v5595_v43 = vpop.permute.xlu0 %5594 }
 0x5ad   :  { %5364 = vmatpush3.bf16.msra.mxu0 %v5363_v35  ;;  %v5597_v59 = vunpack.i.h.bf16 %v5595_v43  ;;  %v5596_v14 = vunpack.i.l.bf16 %v5595_v43 }
 0x5ae   :  { %4741 = vmatmul.mubr.msk.f32.gmra.mrb[18].mxu1 %vm486_vm10, %v542_v9  ;;  %5365 = vmatprep.subr.bf16.mxu0 %v5950_v0 }
 0x5af   :  { %v5749_v13 = vpop.eup %5748  ;;  %4778 = vmatprep.mubr.msk.f32.mxu1 %vm5951_vm0, %v5952_v1  ;;  %v5352_v20 = vpack.c.bf16 %v5597_v59, %v5596_v14 }
 0x5b0   :  { %v845_v15 = vmul.f32 %v5749_v13, %v6460_v11  ;;  %v1165_v11 = vpop.permute.xlu1 %1164 }
 0x5b2   :  { %4779 = vmatmul.mubr.msk.f32.vlgmr.msra.gmra.mrb[20].mxu1 %vm486_vm10, %v845_v15 }
 0x5b3   :  { %v5751_v42 = vpop.eup %5750  ;;  %5350 = vmatpush3.bf16.msra.mxu1 %v5349_v55  ;;  %4781 = vmatprep.mubr.msk.f32.mxu1 %vm5951_vm0, %v5952_v1 }
 0x5b4   :  { %5351 = vmatprep.subr.bf16.mxu1 %v5950_v0  ;;  %v846_v8 = vmul.f32 %v5751_v42, %v6464_v57 }
 0x5b6   :  { %4782 = vmatmul.mubr.msk.f32.gmra.mrb[22].mxu1 %vm486_vm10, %v846_v8 }
 0x5b7   :  { %5353 = vmatpush3.bf16.msra.mxu1 %v5352_v20  ;;  %4784 = vmatprep.mubr.msk.f32.mxu1 %vm5951_vm0, %v5952_v1 }
 0x5b8   :  { %4826 = vmatprep.subr.mxu1 %v5952_v1 }
 0x5bb   :  { %4827 = vmatpush3.msk.msra.mxu1 %vm572_vm9, %v1165_v11 }
 0x5bc   :  { %5502 = vmatprep.subr.bf16.mxu1 %v5950_v0 }
 0x5dd   :  { %v833_v28 = vpop.xlane.xlu1 %832 }
 0x5de   :  { %5752 = vrcp.f32 %v833_v28 }
 0x5e1   :  { %v836_v26 = vpop.xlane.xlu1 %835 }
 0x5e2   :  { %5754 = vrcp.f32 %v836_v26 }
 0x5e5   :  { %v839_v39 = vpop.xlane.xlu1 %838  ;;  %v1133_v57 = vpop.xlane.xlu0 %1132 }
 0x5e6   :  { %5756 = vrcp.f32 %v839_v39 }
 0x5e7   :  { %5758 = vrcp.f32 %v1133_v57 }
 0x5e8   :  { %v5753_v33 = vpop.eup %5752 }
 0x5e9   :  { %v1136_v34 = vpop.xlane.xlu1 %1135  ;;  %v847_v40 = vmul.f32 %v5753_v33, %v6482_v21 }
 0x5ea   :  { %5760 = vrcp.f32 %v1136_v34 }
 0x5eb   :  { %4785 = vmatmul.mubr.msk.f32.gmra.mrb[24].mxu1 %vm486_vm10, %v847_v40 }
 0x5ec   :  { %v5755_v36 = vpop.eup %5754  ;;  %4787 = vmatprep.mubr.msk.f32.mxu1 %vm5951_vm0, %v5952_v1 }
 0x5ed   :  { %v1139_v41 = vpop.xlane.xlu1 %1138  ;;  %v848_v63 = vmul.f32 %v5755_v36, %v6488_v30  ;;  %v1660_v36 = vld [vmem:[#allocation2 + $0x58] sm:$0xff] }
 0x5ee   :  { %5762 = vrcp.f32 %v1139_v41  ;;  %v1661_v41 = vld [vmem:[#allocation2 + $0x60] sm:$0xff] }
 0x5ef   :  { %4788 = vmatmul.mubr.msk.f32.gmra.mrb[26].mxu1 %vm486_vm10, %v848_v63  ;;  %v1662_v63 = vld [vmem:[#allocation2 + $0x68] sm:$0xff] }
 0x5f0   :  { %4790 = vmatprep.mubr.msk.f32.mxu1 %vm5951_vm0, %v5952_v1  ;;  %v5757_v38 = vpop.eup %5756 }
 0x5f1   :  { %v1142_v60 = vpop.xlane.xlu1 %1141  ;;  %v849_v21 = vmul.f32 %v5757_v38, %v6494_v37  ;;  %v5759_v58 = vpop.eup %5758 }
 0x5f2   :  { %v1145_v48 = vpop.xlane.xlu0 %1144  ;;  %5764 = vrcp.f32 %v1142_v60  ;;  %v1151_v30 = vmul.f32 %v5759_v58, %v6497_v47  ;;  %v5369_v60 = vpack.c.bf16 %v1661_v41, %v1660_v36 }
 0x5f3   :  { %4791 = vmatmul.mubr.msk.f32.gmra.mrb[28].mxu1 %vm486_vm10, %v849_v21  ;;  %5766 = vrcp.f32 %v1145_v48  ;;  %v1663_v21 = vld [vmem:[#allocation2 + $0x70] sm:$0xff] }
 0x5f4   :  { %4828 = vmatprep.mubr.msk.f32.mxu1 %vm5951_vm0, %v5952_v1  ;;  %v5761_v52 = vpop.eup %5760  ;;  %v5372_v58 = vpack.c.bf16 %v1663_v21, %v1662_v63  ;;  %v4284_v63 = vld [vmem:[#allocation2 + $0x78] ss:$0 sm:$0xff] }
 0x5f5   :  { %v1439_v44 = vpop.xlane.xlu1 %1438  ;;  %v1152_v46 = vmul.f32 %v5761_v52, %v6505_v49 }
 0x5f6   :  { %v1448_v37 = vpop.xlane.xlu0 %1447  ;;  %5768 = vrcp.f32 %v1439_v44 }
 0x5f7   :  { %4829 = vmatmul.mubr.msk.f32.vlgmr.msra.gmra.mrb[30].mxu1 %vm486_vm10, %v1151_v30  ;;  %5770 = vrcp.f32 %v1448_v37 }
 0x5f8   :  { %5505 = vmatpush3.bf16.msra.mxu1 %v5363_v35  ;;  %4831 = vmatprep.mubr.msk.f32.mxu1 %vm5951_vm0, %v5952_v1  ;;  %v5763_v4 = vpop.eup %5762 }
 0x5f9   :  { %v1442_v62 = vpop.xlane.xlu1 %1441  ;;  %5503 = vmatprep.subr.bf16.mxu1 %v5950_v0  ;;  %v1153_v45 = vmul.f32 %v5763_v4, %v6510_v6 }
 0x5fa   :  { %5772 = vrcp.f32 %v1442_v62  ;;  %v1471_v3 = vpop.permute.xlu0 %1470 }
 0x5fb   :  { %4832 = vmatmul.mubr.msk.f32.gmra.mrb[32].mxu1 %vm486_vm10, %v1152_v46 }
 0x5fc   :  { %4834 = vmatprep.mubr.msk.f32.mxu1 %vm5951_vm0, %v5952_v1  ;;  %v5765_v16 = vpop.eup %5764 }
 0x5fd   :  { %v1445_v47 = vpop.xlane.xlu1 %1444  ;;  %v1154_v23 = vmul.f32 %v5765_v16, %v6514_v7  ;;  %v5767_v29 = vpop.eup %5766 }
 0x5fe   :  { %5774 = vrcp.f32 %v1445_v47  ;;  %v1155_v2 = vmul.f32 %v5767_v29, %v6516_v53 }
 0x5ff   :  { %4835 = vmatmul.mubr.msk.f32.gmra.mrb[34].mxu1 %vm486_vm10, %v1153_v45 }
 0x600   :  { %4837 = vmatprep.mubr.msk.f32.mxu1 %vm5951_vm0, %v5952_v1  ;;  %v5769_v6 = vpop.eup %5768 }
 0x601   :  { %v5605_v61 = vpop.permute.xlu1 %5604  ;;  %v5771_v31 = vpop.eup %5770  ;;  %v1457_v7 = vmul.f32 %v5769_v6, %v6520_v10 }
 0x602   :  { %v5607_v49 = vunpack.i.h.bf16 %v5605_v61  ;;  %v5606_v25 = vunpack.i.l.bf16 %v5605_v61  ;;  %v1460_v9 = vmul.f32 %v5771_v31, %v6524_v50 }
 0x603   :  { %4838 = vmatmul.mubr.msk.f32.gmra.mrb[36].mxu1 %vm486_vm10, %v1154_v23 }
 0x604   :  { %v5366_v51 = vpack.c.bf16 %v5607_v49, %v5606_v25  ;;  %4840 = vmatprep.mubr.msk.f32.mxu1 %vm5951_vm0, %v5952_v1  ;;  %v5773_v35 = vpop.eup %5772 }
 0x605   :  { %v1458_v53 = vmul.f32 %v5773_v35, %v6528_v18 }
 0x606   :  { %5367 = vmatpush3.bf16.msra.mxu0 %v5366_v51  ;;  %5506 = vmatpush3.bf16.msra.mxu1 %v5366_v51 }
 0x607   :  { %4876 = vmatprep.subr.mxu0 %v5952_v1  ;;  %5504 = vmatprep.subr.mxu1 %v5952_v1 }
 0x608   :  { %4841 = vmatmul.mubr.msk.f32.gmra.mrb[38].mxu1 %vm486_vm10, %v1155_v2  ;;  %v5775_v10 = vpop.eup %5774 }
 0x609   :  { %4887 = vmatprep.mubr.msk.f32.mxu1 %vm5951_vm0, %v5952_v1  ;;  %v1459_v50 = vmul.f32 %v5775_v10, %v6534_v24 }
 0x60a   :  { %4877 = vmatpush3.msk.msra.mxu0 %vm572_vm9, %v1471_v3  ;;  %5507 = vmatpush3.msk.msra.mxu1 %vm572_vm9, %v1471_v3 }
 0x60b   :  { %4879 = vmatmul.mubr.msk.f32.vlgmr.msra.gmra.mrb[50].mxu0 %vm486_vm10, %v1457_v7  ;;  %5368 = vmatprep.subr.bf16.mxu0 %v5950_v0 }
 0x60c   :  { %4888 = vmatmul.mubr.msk.f32.vlgmr.msra.gmra.mrb[40].mxu1 %vm486_vm10, %v1460_v9  ;;  %4881 = vmatprep.mubr.msk.f32.mxu0 %vm5951_vm0, %v5952_v1 }
 0x60d   :  { %4890 = vmatprep.mubr.msk.f32.mxu1 %vm5951_vm0, %v5952_v1  ;;  %5374 = vmatprep.subr.bf16.mxu1 %v5950_v0 }
 0x60e   :  { %5370 = vmatpush3.bf16.msra.mxu0 %v5369_v60 }
 0x60f   :  { %4882 = vmatmul.mubr.msk.f32.gmra.mrb[52].mxu0 %vm486_vm10, %v1458_v53  ;;  %5371 = vmatprep.subr.bf16.mxu0 %v5950_v0 }
 0x610   :  { %4884 = vmatprep.mubr.msk.f32.mxu0 %vm5951_vm0, %v5952_v1 }
 0x612   :  { %5373 = vmatpush3.bf16.msra.mxu0 %v5372_v58 }
 0x613   :  { %4885 = vmatmul.mubr.msk.f32.gmra.mrb[54].mxu0 %vm486_vm10, %v1459_v50  ;;  %5380 = vmatprep.subr.bf16.mxu0 %v5950_v0 }
 0x614   :  { %4901 = vmatprep.mubr.msk.f32.mxu0 %vm5951_vm0, %v5952_v1 }
 0x632   :  { %v1451_v56 = vpop.xlane.xlu1 %1450 }
 0x633   :  { %5776 = vrcp.f32 %v1451_v56 }
 0x63d   :  { %v5777_v18 = vpop.eup %5776 }
 0x63e   :  { %v1461_v54 = vmul.f32 %v5777_v18, %v6553_v19 }
 0x640   :  { %4891 = vmatmul.mubr.msk.f32.gmra.mrb[42].mxu1 %vm486_vm10, %v1461_v54 }
 0x641   :  { %4924 = vmatprep.mubr.msk.f32.mxu1 %vm5951_vm0, %v5952_v1 }
 0x671   :  { %v6650_v43 = vpop.f32.mrb[10].mxu1 }
 0x672   :  { %v4730_v13 = vpop.f32.mrb[11].mxu1 }
 0x675   :  { %v6652_v15 = vpop.f32.mrb[12].mxu1 }
 0x676   :  { %v4733_v24 = vpop.f32.mrb[13].mxu1 }
 0x679   :  { %v6654_v55 = vpop.f32.mrb[14].mxu1 }
 0x67a   :  { %v4736_v59 = vpop.f32.mrb[15].mxu1 }
 0x67d   :  { %v6656_v14 = vpop.f32.mrb[16].mxu1 }
 0x67e   :  { %v4739_v42 = vpop.f32.mrb[17].mxu1 }
 0x681   :  { %v6658_v8 = vpop.f32.mrb[18].mxu1 }
 0x682   :  { %v4742_v19 = vpop.f32.mrb[19].mxu1 }
 0x685   :  { %v947_v20 = vpop.f32.mrb[20].mxu1 }
 0x686   :  { %1588 = vrot.lane.b32.xlu0 %v947_v20, %s5949_s26  ;;  %v4780_v11 = vpop.f32.mrb[21].mxu1 }
 0x689   :  { %v952_v28 = vpop.f32.mrb[22].mxu1 }
 0x68a   :  { %1590 = vrot.lane.b32.xlu1 %v952_v28, %s5949_s26  ;;  %v4783_v26 = vpop.f32.mrb[23].mxu1 }
 0x6be   :  { %v957_v39 = vpop.f32.mrb[24].mxu1 }
 0x6bf   :  { %1592 = vrot.lane.b32.xlu0 %v957_v39, %s5949_s26  ;;  %v4786_v57 = vpop.f32.mrb[25].mxu1 }
 0x6c2   :  { %v962_v33 = vpop.f32.mrb[26].mxu1 }
 0x6c3   :  { %v4789_v34 = vpop.f32.mrb[27].mxu1 }
 0x6c6   :  { %v967_v40 = vpop.f32.mrb[28].mxu1 }
 0x6c7   :  { %v4792_v38 = vpop.f32.mrb[29].mxu1 }
 0x6ca   :  { %v1253_v48 = vpop.f32.mrb[30].mxu1 }
 0x6cb   :  { %1608 = vrot.lane.b32.xlu0 %v1253_v48, %s5965_s15  ;;  %v4830_v44 = vpop.f32.mrb[31].mxu1 }
 0x6ce   :  { %v1258_v30 = vpop.f32.mrb[32].mxu1 }
 0x6cf   :  { %1610 = vrot.lane.b32.xlu0 %v1258_v30, %s5965_s15  ;;  %v4833_v52 = vpop.f32.mrb[33].mxu1 }
 0x6d2   :  { %v1263_v62 = vpop.f32.mrb[34].mxu1 }
 0x6d3   :  { %1612 = vrot.lane.b32.xlu0 %v1263_v62, %s5965_s15  ;;  %v4836_v37 = vpop.f32.mrb[35].mxu1 }
 0x6d6   :  { %v1268_v46 = vpop.f32.mrb[36].mxu1 }
 0x6d7   :  { %v4839_v4 = vpop.f32.mrb[37].mxu1 }
 0x6db   :  { %v1273_v47 = vpop.f32.mrb[38].mxu1 }
 0x6dc   :  { %v4842_v45 = vpop.f32.mrb[39].mxu1 }
 0x6de   :  { %v1559_v16 = vpop.f32.mrb[50].mxu0 }
 0x6df   :  { %v1574_v61 = vpop.f32.mrb[40].mxu1  ;;  %v4880_v49 = vpop.f32.mrb[51].mxu0  ;;  %1628 = vrot.lane.b32.xlu0 %v1559_v16, %s5966_s0 }
 0x6e0   :  { %v4889_v25 = vpop.f32.mrb[41].mxu1 }
 0x6e2   :  { %v1564_v23 = vpop.f32.mrb[52].mxu0 }
 0x6e3   :  { %v4883_v29 = vpop.f32.mrb[53].mxu0  ;;  %1630 = vrot.lane.b32.xlu0 %v1564_v23, %s5966_s0 }
 0x6e6   :  { %v1569_v51 = vpop.f32.mrb[54].mxu0 }
 0x6e7   :  { %1632 = vrot.lane.b32.xlu1 %v1569_v51, %s5966_s0  ;;  %v4886_v6 = vpop.f32.mrb[55].mxu0  ;;  %1594 = vrot.lane.b32.xlu0 %v962_v33, %s5949_s26 }
 0x6eb   :  { %1614 = vrot.lane.b32.xlu1 %v1268_v46, %s5965_s15  ;;  %1634 = vrot.lane.b32.xlu0 %v1574_v61, %s5966_s0 }
 0x6ef   :  { %1596 = vrot.lane.b32.xlu1 %v967_v40, %s5949_s26  ;;  %1616 = vrot.lane.b32.xlu0 %v1273_v47, %s5965_s15 }
 0x6f8   :  { %v1589_v7 = vpop.permute.xlu0 %1588 }
 0x6f9   :  { %v1643_v10 = vsel %vm375_vm7, %v6650_v43, %v1589_v7 }
 0x6fc   :  { %v1591_v50 = vpop.permute.xlu1 %1590 }
 0x6fd   :  { %v1644_v13 = vsel %vm375_vm7, %v6652_v15, %v1591_v50 }
 0x713   :  { %v1579_v2 = vpop.f32.mrb[42].mxu1 }
 0x714   :  { %1636 = vrot.lane.b32.xlu1 %v1579_v2, %s5966_s0  ;;  %v4892_v31 = vpop.f32.mrb[43].mxu1 }
 0x731   :  { %v1593_v3 = vpop.permute.xlu0 %1592 }
 0x732   :  { %v1645_v43 = vsel %vm375_vm7, %v6654_v55, %v1593_v3 }
 0x73d   :  { %v1609_v35 = vpop.permute.xlu0 %1608 }
 0x73e   :  { %v1649_v56 = vsel %vm1648_vm12, %v1643_v10, %v1609_v35 }
 0x741   :  { %v1611_v9 = vpop.permute.xlu0 %1610 }
 0x742   :  { %v1650_v24 = vsel %vm1648_vm12, %v1644_v13, %v1611_v9 }
 0x745   :  { %v1613_v53 = vpop.permute.xlu0 %1612 }
 0x746   :  { %v1651_v19 = vsel %vm1648_vm12, %v1645_v43, %v1613_v53 }
 0x751   :  { %v1629_v18 = vpop.permute.xlu0 %1628 }
 0x752   :  { %v1655_v54 = vsel %vm1654_vm13, %v1649_v56, %v1629_v18 }
 0x753   :  { %4902 = vmatmul.mubr.msk.f32.vlgmr.msra.gmra.mrb[56].mxu0 %vm160_vm5, %v1655_v54 }
 0x754   :  { %4904 = vmatprep.mubr.msk.f32.mxu0 %vm5951_vm0, %v5952_v1 }
 0x755   :  { %v1631_v59 = vpop.permute.xlu0 %1630 }
 0x756   :  { %v1656_v42 = vsel %vm1654_vm13, %v1650_v24, %v1631_v59 }
 0x757   :  { %4905 = vmatmul.mubr.msk.f32.gmra.mrb[58].mxu0 %vm160_vm5, %v1656_v42 }
 0x758   :  { %4907 = vmatprep.mubr.msk.f32.mxu0 %vm5951_vm0, %v5952_v1 }
 0x759   :  { %v1633_v20 = vpop.permute.xlu1 %1632  ;;  %v1595_v15 = vpop.permute.xlu0 %1594 }
 0x75a   :  { %v1657_v11 = vsel %vm1654_vm13, %v1651_v19, %v1633_v20  ;;  %v1646_v28 = vsel %vm375_vm7, %v6656_v14, %v1595_v15  ;;  %v1864_v19 = vld [vmem:[#allocation2 + $0x90] sm:$0xff]  ;;  %v1865_v20 = vld [vmem:[#allocation2 + $0x98] sm:$0xff] }
 0x75b   :  { %4908 = vmatmul.mubr.msk.f32.gmra.mrb[60].mxu0 %vm160_vm5, %v1657_v11  ;;  %v5375_v15 = vpack.c.bf16 %v1865_v20, %v1864_v19  ;;  %v1866_v11 = vld [vmem:[#allocation2 + $0xa0] sm:$0xff]  ;;  %v2029_v20 = vld [vmem:[#allocation2 + $0xe8] sm:$0xff] }
 0x75c   :  { %4910 = vmatprep.mubr.msk.f32.mxu0 %vm5951_vm0, %v5952_v1 }
 0x75d   :  { %v1615_v26 = vpop.permute.xlu1 %1614  ;;  %v1635_v39 = vpop.permute.xlu0 %1634  ;;  %5376 = vmatpush3.bf16.msra.mxu1 %v5375_v15  ;;  %v2030_v15 = vld [vmem:[#allocation2 + $0xf0] sm:$0xff] }
 0x75e   :  { %v1652_v55 = vsel %vm1648_vm12, %v1646_v28, %v1615_v26  ;;  %5377 = vmatprep.subr.bf16.mxu1 %v5950_v0  ;;  %v1867_v28 = vld [vmem:[#allocation2 + $0xa8] sm:$0xff] }
 0x75f   :  { %v1658_v57 = vsel %vm1654_vm13, %v1652_v55, %v1635_v39  ;;  %v5378_v26 = vpack.c.bf16 %v1867_v28, %v1866_v11  ;;  %v5390_v11 = vpack.c.bf16 %v2030_v15, %v2029_v20  ;;  %v2031_v28 = vld [vmem:[#allocation2 + $0xf8] sm:$0xff] }
 0x760   :  { %4911 = vmatmul.mubr.msk.f32.gmra.mrb[62].mxu0 %vm160_vm5, %v1658_v57 }
 0x761   :  { %4913 = vmatprep.mubr.msk.f32.mxu0 %vm5951_vm0, %v5952_v1  ;;  %v1597_v33 = vpop.permute.xlu1 %1596  ;;  %v1617_v40 = vpop.permute.xlu0 %1616  ;;  %5379 = vmatpush3.bf16.msra.mxu1 %v5378_v26  ;;  %v2032_v26 = vld [vmem:[#allocation2 + $0x100] sm:$0xff] }
 0x762   :  { %v1647_v34 = vsel %vm375_vm7, %v6658_v8, %v1597_v33  ;;  %5404 = vmatprep.subr.bf16.mxu1 %v5950_v0 }
 0x763   :  { %v1653_v36 = vsel %vm1648_vm12, %v1647_v34, %v1617_v40  ;;  %v2023_v40 = vld [vmem:[#allocation2 + $0xb8] sm:$0xff] }
 0x786   :  { %v1637_v41 = vpop.permute.xlu1 %1636 }
 0x787   :  { %v1659_v14 = vsel %vm1654_vm13, %v1653_v36, %v1637_v41  ;;  %v2024_v36 = vld [vmem:[#allocation2 + $0xc0] sm:$0xff] }
 0x788   :  { %4914 = vmatmul.mubr.msk.f32.gmra.mrb[64].mxu0 %vm160_vm5, %v1659_v14  ;;  %v5381_v41 = vpack.c.bf16 %v2024_v36, %v2023_v40  ;;  %v2036_v40 = vld [vmem:[#allocation2 + $0x120] sm:$0xff] }
 0x789   :  { %4971 = vmatprep.mubr.msk.f32.mxu0 %vm5951_vm0, %v5952_v1 }
 0x78a   :  { %5382 = vmatpush3.bf16.msra.mxu0 %v5381_v41  ;;  %v2037_v41 = vld [vmem:[#allocation2 + $0x128] sm:$0xff] }
 0x78b   :  { %5383 = vmatprep.subr.bf16.mxu0 %v5950_v0 }
 0x826   :  { %v1750_v38 = vpop.f32.mrb[56].mxu0 }
 0x827   :  { %v1751_v60 = vadd.f32 %v4284_v63, %v1750_v38  ;;  %v4903_v21 = vpop.f32.mrb[57].mxu0 }
 0x829   :  { %v6713_v58 = vadd.f32 %v1751_v60, %v6040_v12 }
 0x82a   :  { %v1755_v48 = vpop.f32.mrb[58].mxu0 }
 0x82b   :  { %v1756_v8 = vadd.f32 %v4284_v63, %v1755_v48  ;;  %v4906_v44 = vpop.f32.mrb[59].mxu0  ;;  %v1781_v30 = vsel %vm160_vm5, %v6713_v58, 0.0 }
 0x82c   :  { %1782 = vadd.xlane.f32.xlu0 %v1781_v30 }
 0x82d   :  { %v6718_v52 = vadd.f32 %v1756_v8, %v6047_v17 }
 0x82e   :  { %v1760_v62 = vpop.f32.mrb[60].mxu0 }
 0x82f   :  { %v1761_v37 = vadd.f32 %v4284_v63, %v1760_v62  ;;  %v4909_v46 = vpop.f32.mrb[61].mxu0  ;;  %v1784_v4 = vsel %vm160_vm5, %v6718_v52, 0.0 }
 0x830   :  { %1785 = vadd.xlane.f32.xlu1 %v1784_v4  ;;  %v4290_v4 = vld [vmem:[#allocation2 + $0x80] ss:$0 sm:$0xff] }
 0x831   :  { %v6723_v12 = vadd.f32 %v1761_v37, %v6054_v22 }
 0x833   :  { %v1765_v47 = vpop.f32.mrb[62].mxu0  ;;  %v1787_v45 = vsel %vm160_vm5, %v6723_v12, 0.0 }
 0x834   :  { %v1766_v16 = vadd.f32 %v4284_v63, %v1765_v47  ;;  %1788 = vadd.xlane.f32.xlu0 %v1787_v45  ;;  %v4912_v61 = vpop.f32.mrb[63].mxu0 }
 0x836   :  { %v6728_v17 = vadd.f32 %v1766_v16, %v6061_v27  ;;  %v4291_v16 = vld [vmem:[#allocation2 + $0x88] ss:$0 sm:$0xff] }
 0x838   :  { %v1790_v49 = vsel %vm160_vm5, %v6728_v17, 0.0 }
 0x839   :  { %1791 = vadd.xlane.f32.xlu0 %v1790_v49 }
 0x85b   :  { %v1770_v25 = vpop.f32.mrb[64].mxu0 }
 0x85c   :  { %v1771_v23 = vadd.f32 %v4284_v63, %v1770_v25  ;;  %v4915_v29 = vpop.f32.mrb[65].mxu0 }
 0x85e   :  { %v6733_v22 = vadd.f32 %v1771_v23, %v6068_v32 }
 0x860   :  { %v1793_v51 = vsel %vm173_vm6, %v6733_v22, 0.0 }
 0x861   :  { %1794 = vadd.xlane.f32.xlu0 %v1793_v51 }
 0x8b9   :  { %v1783_v6 = vpop.xlane.xlu0 %1782 }
 0x8ba   :  { %v1796_v2 = vmul.f32 0.03125, %v1783_v6 }
 0x8bc   :  { %v1801_v31 = vsub.f32 %v6713_v58, %v1796_v2 }
 0x8bd   :  { %v1786_v27 = vpop.xlane.xlu1 %1785 }
 0x8be   :  { %v1797_v7 = vmul.f32 0.03125, %v1786_v27  ;;  %v1806_v3 = vmul.f32 %v1801_v31, %v1801_v31 }
 0x8c0   :  { %v1802_v35 = vsub.f32 %v6718_v52, %v1797_v7  ;;  %v1811_v9 = vsel %vm160_vm5, %v1806_v3, 0.0 }
 0x8c1   :  { %v1789_v53 = vpop.xlane.xlu0 %1788  ;;  %1812 = vadd.xlane.f32.xlu1 %v1811_v9 }
 0x8c2   :  { %v1798_v10 = vmul.f32 0.03125, %v1789_v53  ;;  %v1807_v32 = vmul.f32 %v1802_v35, %v1802_v35 }
 0x8c4   :  { %v1803_v50 = vsub.f32 %v6723_v12, %v1798_v10  ;;  %v1814_v56 = vsel %vm160_vm5, %v1807_v32, 0.0 }
 0x8c5   :  { %1815 = vadd.xlane.f32.xlu0 %v1814_v56 }
 0x8c6   :  { %v1792_v18 = vpop.xlane.xlu0 %1791  ;;  %v1808_v54 = vmul.f32 %v1803_v50, %v1803_v50 }
 0x8c7   :  { %v1799_v13 = vmul.f32 0.03125, %v1792_v18 }
 0x8c8   :  { %v1817_v24 = vsel %vm160_vm5, %v1808_v54, 0.0 }
 0x8c9   :  { %v1804_v59 = vsub.f32 %v6728_v17, %v1799_v13  ;;  %1818 = vadd.xlane.f32.xlu1 %v1817_v24  ;;  %v2025_v13 = vld [vmem:[#allocation2 + $0xc8] sm:$0xff]  ;;  %v2026_v24 = vld [vmem:[#allocation2 + $0xd0] sm:$0xff] }
 0x8cb   :  { %v1809_v42 = vmul.f32 %v1804_v59, %v1804_v59 }
 0x8cd   :  { %v1820_v43 = vsel %vm160_vm5, %v1809_v42, 0.0  ;;  %v2027_v42 = vld [vmem:[#allocation2 + $0xd8] sm:$0xff] }
 0x8ce   :  { %1821 = vadd.xlane.f32.xlu0 %v1820_v43  ;;  %v2028_v43 = vld [vmem:[#allocation2 + $0xe0] sm:$0xff] }
 0x8cf   :  { %v5387_v19 = vpack.c.bf16 %v2028_v43, %v2027_v42 }
 0x8ee   :  { %v1795_v39 = vpop.xlane.xlu0 %1794 }
 0x8ef   :  { %v1800_v55 = vmul.f32 0.03125, %v1795_v39  ;;  %v5393_v39 = vpack.c.bf16 %v2032_v26, %v2031_v28 }
 0x8f1   :  { %v1805_v57 = vsub.f32 %v6733_v22, %v1800_v55  ;;  %v2033_v55 = vld [vmem:[#allocation2 + $0x108] sm:$0xff] }
 0x8f3   :  { %v1810_v33 = vmul.f32 %v1805_v57, %v1805_v57 }
 0x8f5   :  { %v1823_v34 = vsel %vm173_vm6, %v1810_v33, 0.0 }
 0x8f6   :  { %1824 = vadd.xlane.f32.xlu1 %v1823_v34  ;;  %v2035_v34 = vld [vmem:[#allocation2 + $0x118] sm:$0xff] }
 0x8f7   :  { %v5399_v36 = vpack.c.bf16 %v2036_v40, %v2035_v34 }
 0x94e   :  { %v1813_v14 = vpop.xlane.xlu1 %1812 }
 0x94f   :  { %v1826_v63 = vmul.f32 0.03125, %v1813_v14  ;;  %v2038_v14 = vld [vmem:[#allocation2 + $0x130] sm:$0xff] }
 0x951   :  { %v1831_v38 = vadd.f32 1e-05, %v1826_v63  ;;  %v5402_v63 = vpack.c.bf16 %v2038_v14, %v2037_v41 }
 0x952   :  { %v1816_v60 = vpop.xlane.xlu0 %1815 }
 0x953   :  { %5778 = vrsqrt.f32 %v1831_v38  ;;  %v1827_v21 = vmul.f32 0.03125, %v1816_v60  ;;  %v4292_v38 = vld [vmem:[#allocation2 + $0xb0] ss:$0 sm:$0xff] }
 0x955   :  { %v1832_v48 = vadd.f32 1e-05, %v1827_v21 }
 0x956   :  { %v1819_v8 = vpop.xlane.xlu1 %1818 }
 0x957   :  { %5780 = vrsqrt.f32 %v1832_v48  ;;  %v1828_v44 = vmul.f32 0.03125, %v1819_v8 }
 0x959   :  { %v1833_v30 = vadd.f32 1e-05, %v1828_v44 }
 0x95b   :  { %5782 = vrsqrt.f32 %v1833_v30  ;;  %v1822_v62 = vpop.xlane.xlu0 %1821 }
 0x95c   :  { %v1829_v37 = vmul.f32 0.03125, %v1822_v62 }
 0x95d   :  { %v5779_v46 = vpop.eup %5778 }
 0x95e   :  { %v1841_v47 = vmul.f32 %v5779_v46, %v1801_v31  ;;  %v1834_v45 = vadd.f32 1e-05, %v1829_v37 }
 0x960   :  { %v1850_v61 = vmul.f32 %v4290_v4, %v1841_v47  ;;  %5784 = vrsqrt.f32 %v1834_v45 }
 0x961   :  { %v5781_v49 = vpop.eup %5780 }
 0x962   :  { %v1859_v25 = vadd.f32 %v4291_v16, %v1850_v61  ;;  %v1842_v23 = vmul.f32 %v5781_v49, %v1802_v35 }
 0x964   :  { %4925 = vmatmul.mubr.msk.f32.vlgmr.msra.gmra.mrb[44].mxu1 %vm160_vm5, %v1859_v25  ;;  %v1851_v29 = vmul.f32 %v4290_v4, %v1842_v23 }
 0x965   :  { %v5783_v51 = vpop.eup %5782  ;;  %4927 = vmatprep.mubr.msk.f32.mxu1 %vm5951_vm0, %v5952_v1 }
 0x966   :  { %v1860_v6 = vadd.f32 %v4291_v16, %v1851_v29  ;;  %v1843_v2 = vmul.f32 %v5783_v51, %v1803_v50 }
 0x968   :  { %4928 = vmatmul.mubr.msk.f32.gmra.mrb[46].mxu1 %vm160_vm5, %v1860_v6  ;;  %v1852_v27 = vmul.f32 %v4290_v4, %v1843_v2 }
 0x969   :  { %4930 = vmatprep.mubr.msk.f32.mxu1 %vm5951_vm0, %v5952_v1 }
 0x96a   :  { %v5785_v31 = vpop.eup %5784  ;;  %v1861_v7 = vadd.f32 %v4291_v16, %v1852_v27 }
 0x96b   :  { %v1844_v3 = vmul.f32 %v5785_v31, %v1804_v59  ;;  %v5384_v59 = vpack.c.bf16 %v2026_v24, %v2025_v13 }
 0x96c   :  { %4931 = vmatmul.mubr.msk.f32.gmra.mrb[48].mxu1 %vm160_vm5, %v1861_v7 }
 0x96d   :  { %4933 = vmatprep.mubr.msk.f32.mxu1 %vm5951_vm0, %v5952_v1  ;;  %v1853_v35 = vmul.f32 %v4290_v4, %v1844_v3  ;;  %5385 = vmatpush3.bf16.msra.mxu0 %v5384_v59 }
 0x96e   :  { %5386 = vmatprep.subr.bf16.mxu0 %v5950_v0 }
 0x96f   :  { %v1862_v9 = vadd.f32 %v4291_v16, %v1853_v35 }
 0x971   :  { %4934 = vmatmul.mubr.msk.f32.gmra.mrb[50].mxu1 %vm160_vm5, %v1862_v9  ;;  %5388 = vmatpush3.bf16.msra.mxu0 %v5387_v19 }
 0x972   :  { %4936 = vmatprep.mubr.msk.f32.mxu1 %vm5951_vm0, %v5952_v1  ;;  %5389 = vmatprep.subr.bf16.mxu0 %v5950_v0 }
 0x975   :  { %5391 = vmatpush3.bf16.msra.mxu0 %v5390_v11 }
 0x976   :  { %5392 = vmatprep.subr.bf16.mxu0 %v5950_v0 }
 0x979   :  { %5394 = vmatpush3.bf16.msra.mxu0 %v5393_v39 }
 0x97a   :  { %5395 = vmatprep.subr.bf16.mxu0 %v5950_v0 }
 0x983   :  { %v1825_v53 = vpop.xlane.xlu1 %1824 }
 0x984   :  { %v1830_v10 = vmul.f32 0.03125, %v1825_v53 }
 0x986   :  { %v1835_v32 = vadd.f32 1e-05, %v1830_v10 }
 0x988   :  { %5786 = vrsqrt.f32 %v1835_v32 }
 0x992   :  { %v5787_v50 = vpop.eup %5786 }
 0x993   :  { %v1845_v56 = vmul.f32 %v5787_v50, %v1805_v57  ;;  %v2034_v57 = vld [vmem:[#allocation2 + $0x110] sm:$0xff] }
 0x994   :  { %v5396_v33 = vpack.c.bf16 %v2034_v57, %v2033_v55 }
 0x995   :  { %v1854_v18 = vmul.f32 %v4290_v4, %v1845_v56 }
 0x996   :  { %5397 = vmatpush3.bf16.msra.mxu0 %v5396_v33 }
 0x997   :  { %v1863_v54 = vadd.f32 %v4291_v16, %v1854_v18  ;;  %5398 = vmatprep.subr.bf16.mxu0 %v5950_v0 }
 0x999   :  { %4937 = vmatmul.mubr.msk.f32.gmra.mrb[52].mxu1 %vm160_vm5, %v1863_v54 }
 0x99a   :  { %4994 = vmatprep.mubr.msk.f32.mxu1 %vm5951_vm0, %v5952_v1  ;;  %5400 = vmatpush3.bf16.msra.mxu0 %v5399_v36 }
 0x99b   :  { %5401 = vmatprep.subr.bf16.mxu0 %v5950_v0 }
 0x99e   :  { %5403 = vmatpush3.bf16.msra.mxu0 %v5402_v63 }
 0x99f   :  { %5418 = vmatprep.subr.bf16.mxu0 %v5950_v0 }
 0xa37   :  { %v1954_v60 = vpop.f32.mrb[44].mxu1 }
 0xa38   :  { %v1955_v21 = vadd.f32 %v4292_v38, %v1954_v60  ;;  %v4926_v48 = vpop.f32.mrb[45].mxu1 }
 0xa3a   :  { %v1978_v8 = vmul.f32 %v1955_v21, %v1955_v21 }
 0xa3b   :  { %v1959_v44 = vpop.f32.mrb[46].mxu1 }
 0xa3c   :  { %v1983_v30 = vmul.f32 %v1978_v8, %v1955_v21  ;;  %v1960_v62 = vadd.f32 %v4292_v38, %v1959_v44  ;;  %v4929_v37 = vpop.f32.mrb[47].mxu1 }
 0xa3e   :  { %v1988_v46 = vmul.f32 0.044715, %v1983_v30  ;;  %v1979_v4 = vmul.f32 %v1960_v62, %v1960_v62  ;;  %v4298_v30 = vld [vmem:[#allocation2 + $0x138] ss:$0 sm:$0xff] }
 0xa3f   :  { %v1964_v47 = vpop.f32.mrb[48].mxu1 }
 0xa40   :  { %v1993_v45 = vadd.f32 %v1988_v46, %v1955_v21  ;;  %v1984_v16 = vmul.f32 %v1979_v4, %v1960_v62  ;;  %v1965_v61 = vadd.f32 %v4292_v38, %v1964_v47  ;;  %v4932_v49 = vpop.f32.mrb[49].mxu1 }
 0xa42   :  { %v1998_v25 = vmul.f32 0.7978846, %v1993_v45  ;;  %v1989_v23 = vmul.f32 0.044715, %v1984_v16  ;;  %v1980_v29 = vmul.f32 %v1965_v61, %v1965_v61 }
 0xa44   :  { %5788 = vtanh.f32 %v1998_v25  ;;  %v1994_v51 = vadd.f32 %v1989_v23, %v1960_v62  ;;  %v1985_v6 = vmul.f32 %v1980_v29, %v1965_v61  ;;  %v1969_v2 = vpop.f32.mrb[50].mxu1 }
 0xa45   :  { %v1970_v27 = vadd.f32 %v4292_v38, %v1969_v2  ;;  %v4935_v31 = vpop.f32.mrb[51].mxu1 }
 0xa46   :  { %v1999_v7 = vmul.f32 0.7978846, %v1994_v51  ;;  %v1990_v3 = vmul.f32 0.044715, %v1985_v6 }
 0xa47   :  { %v1981_v35 = vmul.f32 %v1970_v27, %v1970_v27 }
 0xa48   :  { %v1995_v9 = vadd.f32 %v1990_v3, %v1965_v61  ;;  %5790 = vtanh.f32 %v1999_v7 }
 0xa49   :  { %v1986_v53 = vmul.f32 %v1981_v35, %v1970_v27 }
 0xa4a   :  { %v2000_v10 = vmul.f32 0.7978846, %v1995_v9 }
 0xa4b   :  { %v1991_v32 = vmul.f32 0.044715, %v1986_v53 }
 0xa4c   :  { %5792 = vtanh.f32 %v2000_v10 }
 0xa4d   :  { %v1996_v50 = vadd.f32 %v1991_v32, %v1970_v27 }
 0xa4e   :  { %v5789_v56 = vpop.eup %5788 }
 0xa4f   :  { %v2008_v18 = vadd.f32 1.0, %v5789_v56  ;;  %v2001_v54 = vmul.f32 0.7978846, %v1996_v50 }
 0xa51   :  { %v2013_v13 = vmul.f32 0.5, %v2008_v18  ;;  %5794 = vtanh.f32 %v2001_v54 }
 0xa52   :  { %v5791_v24 = vpop.eup %5790 }
 0xa53   :  { %v2018_v59 = vmul.f32 %v2013_v13, %v1955_v21  ;;  %v2009_v42 = vadd.f32 1.0, %v5791_v24 }
 0xa55   :  { %4972 = vmatmul.mubr.f32.vlgmr.msra.gmra.mrb[66].mxu0 %v2018_v59  ;;  %v2014_v43 = vmul.f32 0.5, %v2009_v42 }
 0xa56   :  { %v5793_v19 = vpop.eup %5792  ;;  %4974 = vmatprep.mubr.msk.f32.mxu0 %vm5951_vm0, %v5952_v1 }
 0xa57   :  { %v2019_v20 = vmul.f32 %v2014_v43, %v1960_v62  ;;  %v2010_v15 = vadd.f32 1.0, %v5793_v19 }
 0xa59   :  { %4975 = vmatmul.mubr.f32.gmra.mrb[68].mxu0 %v2019_v20  ;;  %v2015_v11 = vmul.f32 0.5, %v2010_v15 }
 0xa5a   :  { %4977 = vmatprep.mubr.msk.f32.mxu0 %vm5951_vm0, %v5952_v1 }
 0xa5b   :  { %v5795_v28 = vpop.eup %5794  ;;  %v2020_v26 = vmul.f32 %v2015_v11, %v1965_v61 }
 0xa5c   :  { %v2011_v39 = vadd.f32 1.0, %v5795_v28 }
 0xa5d   :  { %4978 = vmatmul.mubr.f32.gmra.mrb[70].mxu0 %v2020_v26 }
 0xa5e   :  { %4980 = vmatprep.mubr.msk.f32.mxu0 %vm5951_vm0, %v5952_v1  ;;  %v2016_v55 = vmul.f32 0.5, %v2011_v39  ;;  %v2224_v39 = vld [vmem:[#allocation2 + $0x150] sm:$0xff] }
 0xa60   :  { %v2021_v57 = vmul.f32 %v2016_v55, %v1970_v27  ;;  %v2225_v55 = vld [vmem:[#allocation2 + $0x158] sm:$0xff] }
 0xa62   :  { %4981 = vmatmul.mubr.f32.gmra.mrb[72].mxu0 %v2021_v57  ;;  %v5405_v57 = vpack.c.bf16 %v2225_v55, %v2224_v39 }
 0xa63   :  { %4983 = vmatprep.mubr.msk.f32.mxu0 %vm5951_vm0, %v5952_v1 }
 0xa64   :  { %5406 = vmatpush3.bf16.msra.mxu1 %v5405_v57 }
 0xa65   :  { %5407 = vmatprep.subr.bf16.mxu1 %v5950_v0 }
 0xa6c   :  { %v1974_v33 = vpop.f32.mrb[52].mxu1 }
 0xa6d   :  { %v1975_v34 = vadd.f32 %v4292_v38, %v1974_v33  ;;  %v4938_v40 = vpop.f32.mrb[53].mxu1  ;;  %v2226_v33 = vld [vmem:[#allocation2 + $0x160] sm:$0xff] }
 0xa6f   :  { %v1982_v36 = vmul.f32 %v1975_v34, %v1975_v34 }
 0xa71   :  { %v1987_v41 = vmul.f32 %v1982_v36, %v1975_v34 }
 0xa73   :  { %v1992_v14 = vmul.f32 0.044715, %v1987_v41 }
 0xa75   :  { %v1997_v63 = vadd.f32 %v1992_v14, %v1975_v34 }
 0xa77   :  { %v2002_v60 = vmul.f32 0.7978846, %v1997_v63 }
 0xa79   :  { %5796 = vtanh.f32 %v2002_v60 }
 0xa83   :  { %v5797_v21 = vpop.eup %5796 }
 0xa84   :  { %v2012_v48 = vadd.f32 1.0, %v5797_v21 }
 0xa86   :  { %v2017_v8 = vmul.f32 0.5, %v2012_v48 }
 0xa88   :  { %v2022_v44 = vmul.f32 %v2017_v8, %v1975_v34  ;;  %v2227_v34 = vld [vmem:[#allocation2 + $0x168] sm:$0xff] }
 0xa89   :  { %v5408_v40 = vpack.c.bf16 %v2227_v34, %v2226_v33 }
 0xa8a   :  { %4984 = vmatmul.mubr.f32.gmra.mrb[74].mxu0 %v2022_v44 }
 0xa8b   :  { %5044 = vmatprep.mubr.msk.f32.mxu0 %vm5951_vm0, %v5952_v1  ;;  %5409 = vmatpush3.bf16.msra.mxu1 %v5408_v40 }
 0xa8c   :  { %5410 = vmatprep.subr.bf16.mxu1 %v5950_v0 }
 0xb28   :  { %v2110_v62 = vpop.f32.mrb[66].mxu0 }
 0xb29   :  { %v2111_v37 = vadd.f32 %v4298_v30, %v2110_v62  ;;  %v4973_v46 = vpop.f32.mrb[67].mxu0 }
 0xb2b   :  { %v6783_v38 = vadd.f32 %v2111_v37, %v6713_v58 }
 0xb2c   :  { %v2115_v4 = vpop.f32.mrb[68].mxu0 }
 0xb2d   :  { %v2116_v47 = vadd.f32 %v4298_v30, %v2115_v4  ;;  %v4976_v45 = vpop.f32.mrb[69].mxu0  ;;  %v2141_v16 = vsel %vm160_vm5, %v6783_v38, 0.0 }
 0xb2e   :  { %2142 = vadd.xlane.f32.xlu0 %v2141_v16 }
 0xb2f   :  { %v6788_v61 = vadd.f32 %v2116_v47, %v6718_v52 }
 0xb30   :  { %v2120_v49 = vpop.f32.mrb[70].mxu0 }
 0xb31   :  { %v2121_v25 = vadd.f32 %v4298_v30, %v2120_v49  ;;  %v4979_v23 = vpop.f32.mrb[71].mxu0  ;;  %v2144_v29 = vsel %vm160_vm5, %v6788_v61, 0.0  ;;  %v4299_v49 = vld [vmem:[#allocation2 + $0x140] ss:$0 sm:$0xff] }
 0xb32   :  { %2145 = vadd.xlane.f32.xlu1 %v2144_v29  ;;  %v4300_v29 = vld [vmem:[#allocation2 + $0x148] ss:$0 sm:$0xff] }
 0xb33   :  { %v6793_v58 = vadd.f32 %v2121_v25, %v6723_v12 }
 0xb35   :  { %v2125_v51 = vpop.f32.mrb[72].mxu0  ;;  %v2147_v6 = vsel %vm160_vm5, %v6793_v58, 0.0 }
 0xb36   :  { %v2126_v2 = vadd.f32 %v4298_v30, %v2125_v51  ;;  %2148 = vadd.xlane.f32.xlu0 %v2147_v6  ;;  %v4982_v27 = vpop.f32.mrb[73].mxu0 }
 0xb38   :  { %v6798_v52 = vadd.f32 %v2126_v2, %v6728_v17 }
 0xb3a   :  { %v2150_v31 = vsel %vm160_vm5, %v6798_v52, 0.0 }
 0xb3b   :  { %2151 = vadd.xlane.f32.xlu1 %v2150_v31 }
 0xb5d   :  { %v2130_v7 = vpop.f32.mrb[74].mxu0 }
 0xb5e   :  { %v2131_v3 = vadd.f32 %v4298_v30, %v2130_v7  ;;  %v4985_v35 = vpop.f32.mrb[75].mxu0 }
 0xb60   :  { %v6803_v12 = vadd.f32 %v2131_v3, %v6733_v22 }
 0xb62   :  { %v2153_v9 = vsel %vm173_vm6, %v6803_v12, 0.0 }
 0xb63   :  { %2154 = vadd.xlane.f32.xlu0 %v2153_v9 }
 0xbbb   :  { %v2143_v53 = vpop.xlane.xlu0 %2142 }
 0xbbc   :  { %v2156_v10 = vmul.f32 0.03125, %v2143_v53 }
 0xbbe   :  { %v2161_v32 = vsub.f32 %v6783_v38, %v2156_v10 }
 0xbbf   :  { %v2146_v17 = vpop.xlane.xlu1 %2145 }
 0xbc0   :  { %v2157_v50 = vmul.f32 0.03125, %v2146_v17  ;;  %v2166_v56 = vmul.f32 %v2161_v32, %v2161_v32 }
 0xbc2   :  { %v2162_v18 = vsub.f32 %v6788_v61, %v2157_v50  ;;  %v2171_v54 = vsel %vm160_vm5, %v2166_v56, 0.0 }
 0xbc3   :  { %v2149_v13 = vpop.xlane.xlu0 %2148  ;;  %2172 = vadd.xlane.f32.xlu1 %v2171_v54 }
 0xbc4   :  { %v2158_v24 = vmul.f32 0.03125, %v2149_v13  ;;  %v2167_v22 = vmul.f32 %v2162_v18, %v2162_v18 }
 0xbc6   :  { %v2163_v59 = vsub.f32 %v6793_v58, %v2158_v24  ;;  %v2174_v42 = vsel %vm160_vm5, %v2167_v22, 0.0 }
 0xbc7   :  { %2175 = vadd.xlane.f32.xlu0 %v2174_v42 }
 0xbc8   :  { %v2152_v43 = vpop.xlane.xlu1 %2151  ;;  %v2168_v19 = vmul.f32 %v2163_v59, %v2163_v59 }
 0xbc9   :  { %v2159_v20 = vmul.f32 0.03125, %v2152_v43 }
 0xbca   :  { %v2177_v15 = vsel %vm160_vm5, %v2168_v19, 0.0  ;;  %v4301_v19 = vld [vmem:[#allocation2 + $0x170] ss:$0 sm:$0xff] }
 0xbcb   :  { %v2164_v11 = vsub.f32 %v6798_v52, %v2159_v20  ;;  %2178 = vadd.xlane.f32.xlu1 %v2177_v15 }
 0xbcd   :  { %v2169_v28 = vmul.f32 %v2164_v11, %v2164_v11 }
 0xbcf   :  { %v2180_v26 = vsel %vm160_vm5, %v2169_v28, 0.0 }
 0xbd0   :  { %2181 = vadd.xlane.f32.xlu0 %v2180_v26 }
 0xbf0   :  { %v2155_v36 = vpop.xlane.xlu0 %2154 }
 0xbf1   :  { %v2160_v41 = vmul.f32 0.03125, %v2155_v36 }
 0xbf3   :  { %v2165_v14 = vsub.f32 %v6803_v12, %v2160_v41 }
 0xbf5   :  { %v2170_v63 = vmul.f32 %v2165_v14, %v2165_v14 }
 0xbf7   :  { %v2183_v60 = vsel %vm173_vm6, %v2170_v63, 0.0 }
 0xbf8   :  { %2184 = vadd.xlane.f32.xlu1 %v2183_v60 }
 0xc50   :  { %v2173_v21 = vpop.xlane.xlu1 %2172 }
 0xc51   :  { %v2186_v48 = vmul.f32 0.03125, %v2173_v21 }
 0xc53   :  { %v2191_v8 = vadd.f32 1e-05, %v2186_v48 }
 0xc54   :  { %v2176_v44 = vpop.xlane.xlu0 %2175 }
 0xc55   :  { %5798 = vrsqrt.f32 %v2191_v8  ;;  %v2187_v30 = vmul.f32 0.03125, %v2176_v44 }
 0xc57   :  { %v2192_v62 = vadd.f32 1e-05, %v2187_v30 }
 0xc58   :  { %v2179_v37 = vpop.xlane.xlu1 %2178 }
 0xc59   :  { %5800 = vrsqrt.f32 %v2192_v62  ;;  %v2188_v46 = vmul.f32 0.03125, %v2179_v37 }
 0xc5b   :  { %v2193_v4 = vadd.f32 1e-05, %v2188_v46 }
 0xc5d   :  { %5802 = vrsqrt.f32 %v2193_v4  ;;  %v2182_v47 = vpop.xlane.xlu0 %2181 }
 0xc5e   :  { %v2189_v45 = vmul.f32 0.03125, %v2182_v47 }
 0xc5f   :  { %v5799_v16 = vpop.eup %5798 }
 0xc60   :  { %v2201_v25 = vmul.f32 %v5799_v16, %v2161_v32  ;;  %v2194_v23 = vadd.f32 1e-05, %v2189_v45 }
 0xc62   :  { %v2210_v51 = vmul.f32 %v4299_v49, %v2201_v25  ;;  %5804 = vrsqrt.f32 %v2194_v23 }
 0xc63   :  { %v5801_v6 = vpop.eup %5800 }
 0xc64   :  { %v2219_v2 = vadd.f32 %v4300_v29, %v2210_v51  ;;  %v2202_v27 = vmul.f32 %v5801_v6, %v2162_v18 }
 0xc66   :  { %4995 = vmatmul.mubr.msk.f32.vlgmr.msra.gmra.mrb[54].mxu1 %vm160_vm5, %v2219_v2  ;;  %v2211_v31 = vmul.f32 %v4299_v49, %v2202_v27 }
 0xc67   :  { %v5803_v7 = vpop.eup %5802  ;;  %4997 = vmatprep.mubr.msk.f32.mxu1 %vm5951_vm0, %v5952_v1 }
 0xc68   :  { %v2220_v3 = vadd.f32 %v4300_v29, %v2211_v31  ;;  %v2203_v35 = vmul.f32 %v5803_v7, %v2163_v59 }
 0xc6a   :  { %4998 = vmatmul.mubr.msk.f32.gmra.mrb[56].mxu1 %vm160_vm5, %v2220_v3  ;;  %v2212_v9 = vmul.f32 %v4299_v49, %v2203_v35 }
 0xc6b   :  { %5000 = vmatprep.mubr.msk.f32.mxu1 %vm5951_vm0, %v5952_v1 }
 0xc6c   :  { %v5805_v53 = vpop.eup %5804  ;;  %v2221_v10 = vadd.f32 %v4300_v29, %v2212_v9 }
 0xc6d   :  { %v2204_v32 = vmul.f32 %v5805_v53, %v2164_v11 }
 0xc6e   :  { %5001 = vmatmul.mubr.msk.f32.gmra.mrb[58].mxu1 %vm160_vm5, %v2221_v10 }
 0xc6f   :  { %5003 = vmatprep.mubr.msk.f32.mxu1 %vm5951_vm0, %v5952_v1  ;;  %v2213_v17 = vmul.f32 %v4299_v49, %v2204_v32 }
 0xc71   :  { %v2222_v50 = vadd.f32 %v4300_v29, %v2213_v17 }
 0xc73   :  { %5004 = vmatmul.mubr.msk.f32.gmra.mrb[60].mxu1 %vm160_vm5, %v2222_v50 }
 0xc74   :  { %5006 = vmatprep.mubr.msk.f32.mxu1 %vm5951_vm0, %v5952_v1 }
 0xc85   :  { %v2185_v56 = vpop.xlane.xlu1 %2184 }
 0xc86   :  { %v2190_v18 = vmul.f32 0.03125, %v2185_v56 }
 0xc88   :  { %v2195_v54 = vadd.f32 1e-05, %v2190_v18 }
 0xc8a   :  { %5806 = vrsqrt.f32 %v2195_v54 }
 0xc94   :  { %v5807_v13 = vpop.eup %5806 }
 0xc95   :  { %v2205_v24 = vmul.f32 %v5807_v13, %v2165_v14 }
 0xc97   :  { %v2214_v22 = vmul.f32 %v4299_v49, %v2205_v24 }
 0xc99   :  { %v2223_v59 = vadd.f32 %v4300_v29, %v2214_v22 }
 0xc9b   :  { %5007 = vmatmul.mubr.msk.f32.gmra.mrb[62].mxu1 %vm160_vm5, %v2223_v59 }
 0xc9c   :  { %5019 = vmatprep.mubr.msk.f32.mxu1 %vm5951_vm0, %v5952_v1 }
 0xd39   :  { %v2314_v42 = vpop.f32.mrb[54].mxu1 }
 0xd3a   :  { %v4996_v43 = vpop.f32.mrb[55].mxu1  ;;  %v6834_v15 = vadd.f32 %v4301_v19, %v2314_v42 }
 0xd3d   :  { %v2319_v20 = vpop.f32.mrb[56].mxu1 }
 0xd3e   :  { %v6836_v11 = vadd.f32 %v4301_v19, %v2319_v20  ;;  %v4999_v28 = vpop.f32.mrb[57].mxu1 }
 0xd40   :  { %v6840_v26 = vpack.i.bf16 %v6836_v11, %v6834_v15 }
 0xd41   :  { %v2324_v39 = vpop.f32.mrb[58].mxu1 }
 0xd42   :  { %5609 = vrot.lane.b32.xlu0 %v6840_v26, %s5954_s1  ;;  %v5002_v55 = vpop.f32.mrb[59].mxu1  ;;  %v6844_v33 = vadd.f32 %v4301_v19, %v2324_v39 }
 0xd46   :  { %v2329_v57 = vpop.f32.mrb[60].mxu1 }
 0xd47   :  { %v6846_v34 = vadd.f32 %v4301_v19, %v2329_v57  ;;  %v5005_v40 = vpop.f32.mrb[61].mxu1 }
 0xd49   :  { %v6850_v36 = vpack.i.bf16 %v6846_v34, %v6844_v33 }
 0xd4b   :  { %5624 = vrot.lane.b32.xlu0 %v6850_v36, %s5955_s21  ;;  %5614 = vrot.lane.b32.xlu1 %v6850_v36, %s5954_s1 }
 0xd4f   :  { %5629 = vrot.lane.b32.xlu0 %v6840_v26, %s5956_s22 }
 0xd53   :  { %2641 = vrot.lane.b32.xlu0 %v6836_v11, %s5957_s23 }
 0xd57   :  { %2643 = vrot.lane.b32.xlu0 %v6844_v33, %s5957_s23 }
 0xd6e   :  { %v2334_v41 = vpop.f32.mrb[62].mxu1 }
 0xd6f   :  { %v6862_v14 = vadd.f32 %v4301_v19, %v2334_v41  ;;  %v5008_v63 = vpop.f32.mrb[63].mxu1 }
 0xd71   :  { %2647 = vrot.lane.b32.xlu0 %v6862_v14, %s5957_s23  ;;  %2351 = vrot.lane.b32.xlu1 %v6862_v14, %s5954_s1 }
 0xd75   :  { %5639 = vrot.lane.b32.xlu0 %v6840_v26, %s5958_s24  ;;  %5619 = vrot.lane.b32.xlu1 %v6840_v26, %s5955_s21 }
 0xd79   :  { %2947 = vrot.lane.b32.xlu0 %v6836_v11, %s5959_s25  ;;  %2657 = vrot.lane.b32.xlu1 %v6862_v14, %s5955_s21 }
 0xd7d   :  { %2949 = vrot.lane.b32.xlu0 %v6844_v33, %s5959_s25  ;;  %2639 = vrot.lane.b32.xlu1 %v6834_v15, %s5957_s23 }
 0xd81   :  { %2953 = vrot.lane.b32.xlu0 %v6862_v14, %s5959_s25  ;;  %5634 = vrot.lane.b32.xlu1 %v6850_v36, %s5956_s22 }
 0xd85   :  { %3251 = vrot.lane.b32.xlu0 %v6834_v15, %s5960_s27  ;;  %2645 = vrot.lane.b32.xlu1 %v6846_v34, %s5957_s23 }
 0xd89   :  { %3255 = vrot.lane.b32.xlu0 %v6844_v33, %s5960_s27  ;;  %2963 = vrot.lane.b32.xlu1 %v6862_v14, %s5956_s22 }
 0xd8d   :  { %3259 = vrot.lane.b32.xlu0 %v6862_v14, %s5960_s27  ;;  %2945 = vrot.lane.b32.xlu1 %v6834_v15, %s5959_s25 }
 0xd91   :  { %5649 = vrot.lane.b32.xlu0 %v6840_v26, %s5961_s28  ;;  %5644 = vrot.lane.b32.xlu1 %v6850_v36, %s5958_s24 }
 0xd95   :  { %5664 = vrot.lane.b32.xlu0 %v6850_v36, %s5962_s3  ;;  %2951 = vrot.lane.b32.xlu1 %v6846_v34, %s5959_s25 }
 0xd99   :  { %2526 = vrot.lane.b32.xlu0 %v6862_v14, %s5961_s28  ;;  %3269 = vrot.lane.b32.xlu1 %v6862_v14, %s5958_s24 }
 0xd9d   :  { %2832 = vrot.lane.b32.xlu0 %v6862_v14, %s5962_s3  ;;  %3253 = vrot.lane.b32.xlu1 %v6836_v11, %s5960_s27 }
 0xda1   :  { %3257 = vrot.lane.b32.xlu1 %v6846_v34, %s5960_s27 }
 0xda5   :  { %5654 = vrot.lane.b32.xlu1 %v6850_v36, %s5961_s28 }
 0xda9   :  { %5659 = vrot.lane.b32.xlu1 %v6840_v26, %s5962_s3 }
 0xdb4   :  { %v5610_v60 = vpop.permute.xlu0 %5609 }
 0xdb5   :  { %v5612_v21 = vunpack.i.h.bf16 %v5610_v60  ;;  %v5611_v48 = vunpack.i.l.bf16 %v5610_v60 }
 0xdb7   :  { %v5411_v8 = vpack.c.bf16 %v5612_v21, %v5611_v48 }
 0xdb9   :  { %5413 = vmatpush3.bf16.xpose.msk.msra.mxu1 %vm6183_vm8, %v5411_v8 }
 0xdba   :  { %5414 = vmatprep.subr.bf16.mxu1 %v5950_v0 }
 0xdbd   :  { %v5615_v44 = vpop.permute.xlu1 %5614  ;;  %v5625_v46 = vpop.permute.xlu0 %5624 }
 0xdbe   :  { %v5617_v30 = vunpack.i.h.bf16 %v5615_v44  ;;  %v5616_v62 = vunpack.i.l.bf16 %v5615_v44  ;;  %v5627_v31 = vunpack.i.h.bf16 %v5625_v46  ;;  %v5626_v7 = vunpack.i.l.bf16 %v5625_v46  ;;  %v7049_v46 = vld [vmem:[%s7571_s2] sm:$0xff] }
 0xdc0   :  { %v5415_v37 = vpack.c.bf16 %v5617_v30, %v5616_v62  ;;  %v5429_v9 = vpack.c.bf16 %v5627_v31, %v5626_v7 }
 0xdc1   :  { %v5630_v4 = vpop.permute.xlu0 %5629 }
 0xdc2   :  { %5417 = vmatpush3.bf16.xpose.msk.msra.mxu1 %vm6183_vm8, %v5415_v37  ;;  %v5632_v50 = vunpack.i.h.bf16 %v5630_v4  ;;  %v5631_v56 = vunpack.i.l.bf16 %v5630_v4 }
 0xdc3   :  { %5017 = vmatprep.subr.mxu1 %v5952_v1 }
 0xdc4   :  { %v5439_v13 = vpack.c.bf16 %v5632_v50, %v5631_v56 }
 0xdc5   :  { %v2642_v47 = vpop.permute.xlu0 %2641 }
 0xdc9   :  { %v2644_v45 = vpop.permute.xlu0 %2643 }
 0xde3   :  { %v6924_v16 = vpop.permute.xlu0 %2647  ;;  %v2352_v49 = vpop.permute.xlu1 %2351 }
 0xde4   :  { %5018 = vmatpush3.xpose.msk.msra.mxu1 %vm375_vm7, %v2352_v49  ;;  %v7059_v49 = vld [vmem:[%s7571_s2 + $0x8] sm:$0xff] }
 0xde5   :  { %5424 = vmatprep.subr.bf16.mxu1 %v5950_v0 }
 0xde7   :  { %v6928_v25 = vpop.permute.xlu0 %5639  ;;  %5020 = vmatmul.mubr.msk.f32.vlgmr.msra.gmra.mrb[64].mxu1 %vm375_vm7, %v6834_v15  ;;  %v5620_v23 = vpop.permute.xlu1 %5619 }
 0xde8   :  { %v5622_v29 = vunpack.i.h.bf16 %v5620_v23  ;;  %v5621_v51 = vunpack.i.l.bf16 %v5620_v23  ;;  %5022 = vmatprep.mubr.msk.f32.mxu1 %vm5951_vm0, %v5952_v1  ;;  %v5642_v57 = vunpack.i.h.bf16 %v6928_v25 }
 0xdea   :  { %v5425_v6 = vpack.c.bf16 %v5622_v29, %v5621_v51 }
 0xdeb   :  { %v6934_v2 = vpop.permute.xlu0 %2947  ;;  %5023 = vmatmul.mubr.msk.f32.gmra.mrb[66].mxu1 %vm375_vm7, %v6836_v11  ;;  %v2658_v27 = vpop.permute.xlu1 %2657 }
 0xdec   :  { %5427 = vmatpush3.bf16.xpose.msk.msra.mxu1 %vm6183_vm8, %v5425_v6  ;;  %5025 = vmatprep.mubr.msk.f32.mxu1 %vm5951_vm0, %v5952_v1  ;;  %v7069_v6 = vld [vmem:[%s7571_s2 + $0x10] sm:$0xff] }
 0xded   :  { %5428 = vmatprep.subr.bf16.mxu1 %v5950_v0 }
 0xdef   :  { %v6943_v3 = vpop.permute.xlu0 %2949  ;;  %5026 = vmatmul.mubr.msk.f32.gmra.mrb[68].mxu1 %vm375_vm7, %v6844_v33  ;;  %v2640_v35 = vpop.permute.xlu1 %2639  ;;  %v5641_v33 = vunpack.i.l.bf16 %v6928_v25 }
 0xdf0   :  { %5028 = vmatprep.mubr.msk.f32.mxu1 %vm5951_vm0, %v5952_v1 }
 0xdf1   :  { %v5453_v40 = vpack.c.bf16 %v5642_v57, %v5641_v33 }
 0xdf3   :  { %v6949_v53 = vpop.permute.xlu0 %2953  ;;  %5029 = vmatmul.mubr.msk.f32.gmra.mrb[70].mxu1 %vm375_vm7, %v6846_v34  ;;  %v5635_v10 = vpop.permute.xlu1 %5634 }
 0xdf4   :  { %5431 = vmatpush3.bf16.xpose.msk.msra.mxu1 %vm6183_vm8, %v5429_v9  ;;  %5031 = vmatprep.mubr.msk.f32.mxu1 %vm5951_vm0, %v5952_v1  ;;  %v5637_v59 = vunpack.i.h.bf16 %v5635_v10  ;;  %v5636_v42 = vunpack.i.l.bf16 %v5635_v10 }
 0xdf5   :  { %5067 = vmatprep.subr.mxu1 %v5952_v1 }
 0xdf6   :  { %v5443_v11 = vpack.c.bf16 %v5637_v59, %v5636_v42 }
 0xdf7   :  { %v6958_v32 = vpop.permute.xlu0 %3251  ;;  %5032 = vmatmul.mubr.msk.f32.gmra.mrb[72].mxu1 %vm375_vm7, %v6862_v14  ;;  %v2646_v17 = vpop.permute.xlu1 %2645 }
 0xdf8   :  { %5069 = vmatprep.mubr.msk.f32.mxu1 %vm5951_vm0, %v5952_v1 }
 0xdfb   :  { %v6964_v18 = vpop.permute.xlu0 %3255  ;;  %v2964_v54 = vpop.permute.xlu1 %2963 }
 0xdfc   :  { %5068 = vmatpush3.xpose.msk.msra.mxu1 %vm375_vm7, %v2658_v27 }
 0xdfd   :  { %5438 = vmatprep.subr.bf16.mxu1 %v5950_v0 }
 0xdff   :  { %v6968_v24 = vpop.permute.xlu0 %3259  ;;  %v2946_v22 = vpop.permute.xlu1 %2945  ;;  %5070 = vmatmul.mubr.msk.f32.vlgmr.msra.gmra.mrb[74].mxu1 %vm375_vm7, %v2640_v35 }
 0xe00   :  { %5441 = vmatpush3.bf16.xpose.msk.msra.mxu1 %vm6183_vm8, %v5439_v13  ;;  %5072 = vmatprep.mubr.msk.f32.mxu1 %vm5951_vm0, %v5952_v1 }
 0xe01   :  { %5442 = vmatprep.subr.bf16.mxu1 %v5950_v0 }
 0xe03   :  { %v5650_v43 = vpop.permute.xlu0 %5649  ;;  %v5645_v19 = vpop.permute.xlu1 %5644  ;;  %5073 = vmatmul.mubr.msk.f32.gmra.mrb[76].mxu1 %vm375_vm7, %v2642_v47 }
 0xe04   :  { %v5652_v20 = vunpack.i.h.bf16 %v5650_v43  ;;  %v5651_v15 = vunpack.i.l.bf16 %v5650_v43  ;;  %5075 = vmatprep.mubr.msk.f32.mxu1 %vm5951_vm0, %v5952_v1  ;;  %v5647_v63 = vunpack.i.h.bf16 %v5645_v19  ;;  %v5646_v60 = vunpack.i.l.bf16 %v5645_v19 }
 0xe06   :  { %v5419_v28 = vpack.c.bf16 %v5652_v20, %v5651_v15  ;;  %v5457_v30 = vpack.c.bf16 %v5647_v63, %v5646_v60 }
 0xe07   :  { %v2952_v39 = vpop.permute.xlu1 %2951  ;;  %5076 = vmatmul.mubr.msk.f32.gmra.mrb[78].mxu1 %vm375_vm7, %v2644_v45  ;;  %v7007_v44 = vpop.permute.xlu0 %5664 }
 0xe08   :  { %5420 = vmatpush3.bf16.msra.mxu0 %v5419_v28  ;;  %5445 = vmatpush3.bf16.xpose.msk.msra.mxu1 %vm6183_vm8, %v5443_v11 }
 0xe09   :  { %5078 = vmatprep.mubr.msk.f32.mxu1 %vm5951_vm0, %v5952_v1  ;;  %5117 = vmatprep.subr.mxu1 %v5952_v1 }
 0xe0a   :  { %5421 = vmatprep.subr.bf16.mxu0 %v5950_v0 }
 0xe0b   :  { %v3270_v55 = vpop.permute.xlu1 %3269  ;;  %5079 = vmatmul.mubr.msk.f32.gmra.mrb[80].mxu1 %vm375_vm7, %v2646_v17  ;;  %v2527_v37 = vpop.permute.xlu0 %2526 }
 0xe0c   :  { %5081 = vmatprep.mubr.msk.f32.mxu1 %vm5951_vm0, %v5952_v1 }
 0xe0f   :  { %v3254_v34 = vpop.permute.xlu1 %3253  ;;  %5082 = vmatmul.mubr.msk.f32.gmra.mrb[82].mxu1 %vm375_vm7, %v6924_v16 }
 0xe10   :  { %5118 = vmatpush3.xpose.msk.msra.mxu1 %vm375_vm7, %v2964_v54  ;;  %5119 = vmatprep.mubr.msk.f32.mxu1 %vm5951_vm0, %v5952_v1 }
 0xe11   :  { %5452 = vmatprep.subr.bf16.mxu1 %v5950_v0 }
 0xe13   :  { %v3258_v41 = vpop.permute.xlu1 %3257  ;;  %5120 = vmatmul.mubr.msk.f32.vlgmr.msra.gmra.mrb[84].mxu1 %vm375_vm7, %v2946_v22 }
 0xe14   :  { %5455 = vmatpush3.bf16.xpose.msk.msra.mxu1 %vm6183_vm8, %v5453_v40  ;;  %5122 = vmatprep.mubr.msk.f32.mxu1 %vm5951_vm0, %v5952_v1 }
 0xe15   :  { %5456 = vmatprep.subr.bf16.mxu1 %v5950_v0 }
 0xe17   :  { %v5655_v21 = vpop.permute.xlu1 %5654  ;;  %5123 = vmatmul.mubr.msk.f32.gmra.mrb[86].mxu1 %vm375_vm7, %v6934_v2 }
 0xe18   :  { %v5657_v48 = vunpack.i.h.bf16 %v5655_v21  ;;  %v5656_v8 = vunpack.i.l.bf16 %v5655_v21  ;;  %5125 = vmatprep.mubr.msk.f32.mxu1 %vm5951_vm0, %v5952_v1 }
 0xe1a   :  { %v5422_v62 = vpack.c.bf16 %v5657_v48, %v5656_v8 }
 0xe1b   :  { %5126 = vmatmul.mubr.msk.f32.gmra.mrb[88].mxu1 %vm375_vm7, %v6943_v3  ;;  %v7079_v3 = vld [vmem:[%s7571_s2 + $0x18] sm:$0xff] }
 0xe1c   :  { %5423 = vmatpush3.bf16.msra.mxu0 %v5422_v62  ;;  %5459 = vmatpush3.bf16.xpose.msk.msra.mxu1 %vm6183_vm8, %v5457_v30 }
 0xe1d   :  { %5128 = vmatprep.mubr.msk.f32.mxu1 %vm5951_vm0, %v5952_v1  ;;  %5042 = vmatprep.subr.mxu0 %v5952_v1 }
 0xe1e   :  { %5167 = vmatprep.subr.mxu1 %v5952_v1 }
 0xe1f   :  { %5129 = vmatmul.mubr.msk.f32.gmra.mrb[90].mxu1 %vm375_vm7, %v2952_v39 }
 0xe20   :  { %5043 = vmatpush3.msk.msra.mxu0 %vm572_vm9, %v2527_v37  ;;  %5131 = vmatprep.mubr.msk.f32.mxu1 %vm5951_vm0, %v5952_v1 }
 0xe21   :  { %5432 = vmatprep.subr.bf16.mxu0 %v5950_v0 }
 0xe23   :  { %5132 = vmatmul.mubr.msk.f32.gmra.mrb[92].mxu1 %vm375_vm7, %v6949_v53 }
 0xe24   :  { %5168 = vmatpush3.xpose.msk.msra.mxu1 %vm375_vm7, %v3270_v55  ;;  %5169 = vmatprep.mubr.msk.f32.mxu1 %vm5951_vm0, %v5952_v1 }
 0xe25   :  { %5466 = vmatprep.subr.bf16.mxu1 %v5950_v0 }
 0xe27   :  { %5170 = vmatmul.mubr.msk.f32.vlgmr.msra.gmra.mrb[94].mxu1 %vm375_vm7, %v6958_v32  ;;  %v7089_v32 = vld [vmem:[%s7571_s2 + $0x20] sm:$0x3] }
 0xe28   :  { %5172 = vmatprep.mubr.msk.f32.mxu1 %vm5951_vm0, %v5952_v1 }
 0xe2b   :  { %5173 = vmatmul.mubr.msk.f32.gmra.mrb[96].mxu1 %vm375_vm7, %v3254_v34 }
 0xe2c   :  { %5175 = vmatprep.mubr.msk.f32.mxu1 %vm5951_vm0, %v5952_v1 }
 0xe2f   :  { %5176 = vmatmul.mubr.msk.f32.gmra.mrb[98].mxu1 %vm375_vm7, %v6964_v18 }
 0xe30   :  { %5178 = vmatprep.mubr.msk.f32.mxu1 %vm5951_vm0, %v5952_v1 }
 0xe33   :  { %5179 = vmatmul.mubr.msk.f32.gmra.mrb[100].mxu1 %vm375_vm7, %v3258_v41 }
 0xe34   :  { %5181 = vmatprep.mubr.msk.f32.mxu1 %vm5951_vm0, %v5952_v1 }
 0xe37   :  { %5182 = vmatmul.mubr.msk.f32.gmra.mrb[102].mxu1 %vm375_vm7, %v6968_v24 }
 0xe38   :  { %5217 = vmatprep.mubr.msk.f32.mxu1 %vm5951_vm0, %v5952_v1 }
 0xeba   :  { %v2439_v5 = vpop.f32.mrb[64].mxu1 }
 0xebb   :  { %v7052_v4 = vadd.f32 %v7049_v46, %v2439_v5  ;;  %v5021_v47 = vpop.f32.mrb[65].mxu1 }
 0xebd   :  { %v2463_v45 = vsel %vm486_vm10, %v7052_v4, -inf }
 0xebe   :  { %2464 = vmax.xlane.f32.xlu1 %v2463_v45  ;;  %v2444_v16 = vpop.f32.mrb[66].mxu1 }
 0xebf   :  { %v7062_v25 = vadd.f32 %v7059_v49, %v2444_v16  ;;  %v5024_v23 = vpop.f32.mrb[67].mxu1 }
 0xec1   :  { %v2466_v29 = vsel %vm486_vm10, %v7062_v25, -inf }
 0xec2   :  { %2467 = vmax.xlane.f32.xlu0 %v2466_v29  ;;  %v2449_v51 = vpop.f32.mrb[68].mxu1 }
 0xec3   :  { %v7072_v2 = vadd.f32 %v7069_v6, %v2449_v51  ;;  %v5027_v27 = vpop.f32.mrb[69].mxu1 }
 0xec5   :  { %v2469_v31 = vsel %vm486_vm10, %v7072_v2, -inf }
 0xec6   :  { %2470 = vmax.xlane.f32.xlu0 %v2469_v31  ;;  %v2454_v7 = vpop.f32.mrb[70].mxu1 }
 0xec7   :  { %v7082_v35 = vadd.f32 %v7079_v3, %v2454_v7  ;;  %v5030_v9 = vpop.f32.mrb[71].mxu1 }
 0xec9   :  { %v2472_v53 = vsel %vm486_vm10, %v7082_v35, -inf }
 0xeca   :  { %2473 = vmax.xlane.f32.xlu0 %v2472_v53  ;;  %v2459_v10 = vpop.f32.mrb[72].mxu1 }
 0xecb   :  { %v7092_v17 = vadd.f32 %v7089_v32, %v2459_v10  ;;  %v5033_v50 = vpop.f32.mrb[73].mxu1 }
 0xecd   :  { %v2475_v56 = vsel %vm499_vm11, %v7092_v17, -inf }
 0xece   :  { %2476 = vmax.xlane.f32.xlu1 %v2475_v56 }
 0xed2   :  { %v2745_v18 = vpop.f32.mrb[74].mxu1 }
 0xed3   :  { %v7097_v54 = vadd.f32 %v7049_v46, %v2745_v18  ;;  %v5071_v13 = vpop.f32.mrb[75].mxu1 }
 0xed5   :  { %v2769_v24 = vsel %vm486_vm10, %v7097_v54, -inf }
 0xed6   :  { %2770 = vmax.xlane.f32.xlu0 %v2769_v24  ;;  %v2750_v22 = vpop.f32.mrb[76].mxu1 }
 0xed7   :  { %v7102_v59 = vadd.f32 %v7059_v49, %v2750_v22  ;;  %v5074_v42 = vpop.f32.mrb[77].mxu1 }
 0xed9   :  { %v2772_v43 = vsel %vm486_vm10, %v7102_v59, -inf }
 0xeda   :  { %2773 = vmax.xlane.f32.xlu1 %v2772_v43  ;;  %v2755_v19 = vpop.f32.mrb[78].mxu1 }
 0xedb   :  { %v7107_v20 = vadd.f32 %v7069_v6, %v2755_v19  ;;  %v5077_v15 = vpop.f32.mrb[79].mxu1 }
 0xedd   :  { %v2775_v11 = vsel %vm486_vm10, %v7107_v20, -inf }
 0xede   :  { %2776 = vmax.xlane.f32.xlu0 %v2775_v11  ;;  %v2760_v28 = vpop.f32.mrb[80].mxu1 }
 0xedf   :  { %v7112_v39 = vadd.f32 %v7079_v3, %v2760_v28  ;;  %v5080_v55 = vpop.f32.mrb[81].mxu1 }
 0xee1   :  { %v2778_v57 = vsel %vm486_vm10, %v7112_v39, -inf }
 0xee2   :  { %2779 = vmax.xlane.f32.xlu1 %v2778_v57  ;;  %v2765_v33 = vpop.f32.mrb[82].mxu1 }
 0xee3   :  { %v7117_v34 = vadd.f32 %v7089_v32, %v2765_v33  ;;  %v5083_v40 = vpop.f32.mrb[83].mxu1 }
 0xee5   :  { %v2781_v41 = vsel %vm499_vm11, %v7117_v34, -inf }
 0xee6   :  { %2782 = vmax.xlane.f32.xlu0 %v2781_v41  ;;  %v3051_v63 = vpop.f32.mrb[84].mxu1  ;;  %v7173_v41 = vpop.permute.xlu1 %5659 }
 0xee7   :  { %v7122_v60 = vadd.f32 %v7049_v46, %v3051_v63  ;;  %v5121_v21 = vpop.f32.mrb[85].mxu1  ;;  %v7175_v63 = vpop.permute.xlu0 %2832 }
 0xee9   :  { %v3075_v48 = vsel %vm486_vm10, %v7122_v60, -inf }
 0xeea   :  { %3076 = vmax.xlane.f32.xlu1 %v3075_v48  ;;  %v3056_v8 = vpop.f32.mrb[86].mxu1 }
 0xeeb   :  { %v7127_v30 = vadd.f32 %v7059_v49, %v3056_v8  ;;  %v5124_v62 = vpop.f32.mrb[87].mxu1 }
 0xeed   :  { %v3078_v37 = vsel %vm486_vm10, %v7127_v30, -inf }
 0xeee   :  { %3079 = vmax.xlane.f32.xlu0 %v3078_v37  ;;  %v3061_v5 = vpop.f32.mrb[88].mxu1 }
 0xeef   :  { %v7132_v47 = vadd.f32 %v7069_v6, %v3061_v5  ;;  %v5127_v45 = vpop.f32.mrb[89].mxu1 }
 0xef1   :  { %v3081_v16 = vsel %vm486_vm10, %v7132_v47, -inf }
 0xef2   :  { %3082 = vmax.xlane.f32.xlu1 %v3081_v16  ;;  %v3066_v23 = vpop.f32.mrb[90].mxu1 }
 0xef3   :  { %v7137_v29 = vadd.f32 %v7079_v3, %v3066_v23  ;;  %v5130_v51 = vpop.f32.mrb[91].mxu1 }
 0xef5   :  { %v3084_v27 = vsel %vm486_vm10, %v7137_v29, -inf }
 0xef6   :  { %3085 = vmax.xlane.f32.xlu0 %v3084_v27  ;;  %v3071_v31 = vpop.f32.mrb[92].mxu1 }
 0xef7   :  { %v7142_v7 = vadd.f32 %v7089_v32, %v3071_v31  ;;  %v5133_v9 = vpop.f32.mrb[93].mxu1 }
 0xef9   :  { %v3087_v53 = vsel %vm499_vm11, %v7142_v7, -inf }
 0xefa   :  { %3088 = vmax.xlane.f32.xlu1 %v3087_v53  ;;  %v3357_v10 = vpop.f32.mrb[94].mxu1 }
 0xefb   :  { %v7147_v50 = vadd.f32 %v7049_v46, %v3357_v10  ;;  %v5171_v56 = vpop.f32.mrb[95].mxu1 }
 0xefd   :  { %v3381_v18 = vsel %vm486_vm10, %v7147_v50, -inf }
 0xefe   :  { %3382 = vmax.xlane.f32.xlu0 %v3381_v18  ;;  %v3362_v13 = vpop.f32.mrb[96].mxu1 }
 0xeff   :  { %v7152_v24 = vadd.f32 %v7059_v49, %v3362_v13  ;;  %v5174_v22 = vpop.f32.mrb[97].mxu1 }
 0xf01   :  { %v3384_v42 = vsel %vm486_vm10, %v7152_v24, -inf }
 0xf02   :  { %3385 = vmax.xlane.f32.xlu1 %v3384_v42  ;;  %v3367_v43 = vpop.f32.mrb[98].mxu1 }
 0xf03   :  { %v7157_v19 = vadd.f32 %v7069_v6, %v3367_v43  ;;  %v5177_v46 = vpop.f32.mrb[99].mxu1 }
 0xf05   :  { %v3387_v15 = vsel %vm486_vm10, %v7157_v19, -inf }
 0xf06   :  { %3388 = vmax.xlane.f32.xlu0 %v3387_v15  ;;  %v3372_v11 = vpop.f32.mrb[100].mxu1 }
 0xf07   :  { %v5180_v28 = vpop.f32.mrb[101].mxu1  ;;  %v7169_v6 = vadd.f32 %v7079_v3, %v3372_v11 }
 0xf09   :  { %v3390_v40 = vsel %vm486_vm10, %v7169_v6, -inf }
 0xf0a   :  { %v3377_v55 = vpop.f32.mrb[102].mxu1 }
 0xf0b   :  { %v7162_v49 = vadd.f32 %v7089_v32, %v3377_v55  ;;  %v5183_v57 = vpop.f32.mrb[103].mxu1 }
 0xf0d   :  { %v3393_v33 = vsel %vm499_vm11, %v7162_v49, -inf }
 0xf0e   :  { %3394 = vmax.xlane.f32.xlu0 %v3393_v33 }
 0xf13   :  { %5669 = vrot.lane.b32.xlu1 %v6840_v26, %s5963_s13 }
 0xf37   :  { %3391 = vmax.xlane.f32.xlu1 %v3390_v40 }
 0xf4b   :  { %v2465_v32 = vpop.xlane.xlu1 %2464 }
 0xf4c   :  { %v2478_v21 = vsub.f32 %v7052_v4, %v2465_v32 }
 0xf4e   :  { %v2483_v48 = vmul.f32 1.442695, %v2478_v21 }
 0xf4f   :  { %v2468_v8 = vpop.xlane.xlu0 %2467 }
 0xf50   :  { %5808 = vpow2.f32 %v2483_v48  ;;  %v2479_v62 = vsub.f32 %v7062_v25, %v2468_v8 }
 0xf52   :  { %v2485_v37 = vmul.f32 1.442695, %v2479_v62 }
 0xf53   :  { %v2471_v5 = vpop.xlane.xlu0 %2470 }
 0xf54   :  { %5810 = vpow2.f32 %v2485_v37  ;;  %v2480_v3 = vsub.f32 %v7072_v2, %v2471_v5 }
 0xf56   :  { %v2487_v45 = vmul.f32 1.442695, %v2480_v3 }
 0xf57   :  { %v2474_v25 = vpop.xlane.xlu0 %2473 }
 0xf58   :  { %5812 = vpow2.f32 %v2487_v45 }
 0xf5a   :  { %v7180_v16 = vpop.eup %5808 }
 0xf5b   :  { %v2477_v23 = vpop.xlane.xlu1 %2476  ;;  %v2493_v51 = vsel %vm486_vm10, %v7180_v16, 0.0 }
 0xf5c   :  { %v2482_v4 = vsub.f32 %v7092_v17, %v2477_v23  ;;  %2494 = vadd.xlane.f32.xlu1 %v2493_v51 }
 0xf5e   :  { %v7185_v27 = vpop.eup %5810  ;;  %v2491_v31 = vmul.f32 1.442695, %v2482_v4 }
 0xf5f   :  { %v2496_v9 = vsel %vm486_vm10, %v7185_v27, 0.0 }
 0xf60   :  { %5814 = vpow2.f32 %v2491_v31  ;;  %2497 = vadd.xlane.f32.xlu0 %v2496_v9 }
 0xf62   :  { %v7189_v2 = vpop.eup %5812 }
 0xf63   :  { %v2771_v53 = vpop.xlane.xlu0 %2770  ;;  %v2499_v10 = vsel %vm486_vm10, %v7189_v2, 0.0 }
 0xf64   :  { %v2784_v56 = vsub.f32 %v7097_v54, %v2771_v53  ;;  %2500 = vadd.xlane.f32.xlu1 %v2499_v10 }
 0xf66   :  { %v2789_v17 = vmul.f32 1.442695, %v2784_v56 }
 0xf67   :  { %v2774_v13 = vpop.xlane.xlu1 %2773 }
 0xf68   :  { %5816 = vpow2.f32 %v2789_v17 }
 0xf6a   :  { %v7194_v18 = vpop.eup %5814 }
 0xf6b   :  { %v2777_v22 = vpop.xlane.xlu0 %2776  ;;  %v2505_v42 = vsel %vm499_vm11, %v7194_v18, 0.0 }
 0xf6c   :  { %v2786_v43 = vsub.f32 %v7107_v20, %v2777_v22  ;;  %2506 = vadd.xlane.f32.xlu1 %v2505_v42 }
 0xf6e   :  { %v2793_v46 = vmul.f32 1.442695, %v2786_v43 }
 0xf6f   :  { %v2780_v15 = vpop.xlane.xlu1 %2779 }
 0xf70   :  { %5818 = vpow2.f32 %v2793_v46  ;;  %v2787_v11 = vsub.f32 %v7112_v39, %v2780_v15 }
 0xf72   :  { %v7200_v28 = vpop.eup %5816  ;;  %v2795_v54 = vmul.f32 1.442695, %v2787_v11 }
 0xf73   :  { %v2783_v55 = vpop.xlane.xlu0 %2782  ;;  %v2799_v57 = vsel %vm486_vm10, %v7200_v28, 0.0 }
 0xf74   :  { %5820 = vpow2.f32 %v2795_v54  ;;  %v2788_v33 = vsub.f32 %v7117_v34, %v2783_v55  ;;  %2800 = vadd.xlane.f32.xlu1 %v2799_v57  ;;  %v2481_v34 = vsub.f32 %v7082_v35, %v2474_v25 }
 0xf76   :  { %v2797_v40 = vmul.f32 1.442695, %v2788_v33  ;;  %5674 = vrot.lane.b32.xlu0 %v6850_v36, %s5963_s13  ;;  %v2489_v51 = vmul.f32 1.442695, %v2481_v34 }
 0xf77   :  { %v3077_v32 = vpop.xlane.xlu1 %3076 }
 0xf78   :  { %5822 = vpow2.f32 %v2797_v40 }
 0xf7a   :  { %v7207_v20 = vpop.eup %5818 }
 0xf7b   :  { %v3080_v39 = vpop.xlane.xlu0 %3079  ;;  %v2805_v21 = vsel %vm486_vm10, %v7207_v20, 0.0 }
 0xf7c   :  { %v3091_v48 = vsub.f32 %v7127_v30, %v3080_v39  ;;  %2806 = vadd.xlane.f32.xlu1 %v2805_v21  ;;  %v2785_v30 = vsub.f32 %v7102_v59, %v2774_v13 }
 0xf7e   :  { %v7212_v8 = vpop.eup %5820  ;;  %v3097_v62 = vmul.f32 1.442695, %v3091_v48  ;;  %v2791_v9 = vmul.f32 1.442695, %v2785_v30 }
 0xf7f   :  { %v3083_v37 = vpop.xlane.xlu1 %3082  ;;  %v2808_v5 = vsel %vm486_vm10, %v7212_v8, 0.0 }
 0xf80   :  { %5824 = vpow2.f32 %v3097_v62  ;;  %v3092_v3 = vsub.f32 %v7132_v47, %v3083_v37  ;;  %2809 = vadd.xlane.f32.xlu1 %v2808_v5  ;;  %v3090_v47 = vsub.f32 %v7122_v60, %v3077_v32 }
 0xf82   :  { %v7218_v45 = vpop.eup %5822  ;;  %v3099_v23 = vmul.f32 1.442695, %v3092_v3  ;;  %v3095_v17 = vmul.f32 1.442695, %v3090_v47 }
 0xf83   :  { %v3086_v4 = vpop.xlane.xlu0 %3085  ;;  %v2811_v31 = vsel %vm499_vm11, %v7218_v45, 0.0 }
 0xf84   :  { %5826 = vpow2.f32 %v3099_v23  ;;  %v3093_v35 = vsub.f32 %v7137_v29, %v3086_v4  ;;  %2812 = vadd.xlane.f32.xlu1 %v2811_v31 }
 0xf85   :  { %5828 = vpow2.f32 %v2489_v51 }
 0xf86   :  { %v3101_v25 = vmul.f32 1.442695, %v3093_v35 }
 0xf87   :  { %v3089_v53 = vpop.xlane.xlu1 %3088 }
 0xf88   :  { %5830 = vpow2.f32 %v3101_v25  ;;  %v3094_v10 = vsub.f32 %v7142_v7, %v3089_v53 }
 0xf89   :  { %5832 = vpow2.f32 %v2791_v9 }
 0xf8a   :  { %v7226_v56 = vpop.eup %5824  ;;  %v3103_v59 = vmul.f32 1.442695, %v3094_v10 }
 0xf8b   :  { %v3383_v13 = vpop.xlane.xlu0 %3382  ;;  %v3108_v22 = vsel %vm486_vm10, %v7226_v56, 0.0 }
 0xf8c   :  { %5834 = vpow2.f32 %v3103_v59  ;;  %v3396_v29 = vsub.f32 %v7147_v50, %v3383_v13  ;;  %3109 = vadd.xlane.f32.xlu1 %v3108_v22  ;;  %v5662_v13 = vunpack.i.h.bf16 %v7173_v41  ;;  %v5661_v22 = vunpack.i.l.bf16 %v7173_v41 }
 0xf8d   :  { %5836 = vpow2.f32 %v3095_v17 }
 0xf8e   :  { %v7231_v42 = vpop.eup %5826  ;;  %v3401_v60 = vmul.f32 1.442695, %v3396_v29 }
 0xf8f   :  { %v3386_v43 = vpop.xlane.xlu1 %3385  ;;  %v3111_v7 = vsel %vm486_vm10, %v7231_v42, 0.0  ;;  %v7236_v15 = vpop.eup %5828 }
 0xf90   :  { %v3397_v46 = vsub.f32 %v7152_v24, %v3386_v43  ;;  %3112 = vadd.xlane.f32.xlu1 %v3111_v7  ;;  %5838 = vpow2.f32 %v3401_v60  ;;  %v2502_v33 = vsel %vm486_vm10, %v7236_v15, 0.0  ;;  %v5666_v43 = vunpack.i.l.bf16 %v7007_v44 }
 0xf91   :  { %v5433_v7 = vpack.c.bf16 %v5662_v13, %v5661_v22 }
 0xf92   :  { %v7238_v11 = vpop.eup %5830  ;;  %v3403_v54 = vmul.f32 1.442695, %v3397_v46 }
 0xf93   :  { %v3389_v55 = vpop.xlane.xlu0 %3388  ;;  %v3114_v50 = vsel %vm486_vm10, %v7238_v11, 0.0  ;;  %v7245_v40 = vpop.eup %5832 }
 0xf94   :  { %5840 = vpow2.f32 %v3403_v54  ;;  %v3398_v57 = vsub.f32 %v7157_v19, %v3389_v55  ;;  %3115 = vadd.xlane.f32.xlu1 %v3114_v50  ;;  %v2802_v21 = vsel %vm486_vm10, %v7245_v40, 0.0  ;;  %v7271_v30 = vpop.permute.xlu1 %5669 }
 0xf95   :  { %2503 = vadd.xlane.f32.xlu0 %v2502_v33 }
 0xf96   :  { %v7247_v24 = vpop.eup %5834  ;;  %v3405_v32 = vmul.f32 1.442695, %v3398_v57 }
 0xf97   :  { %v3117_v39 = vsel %vm499_vm11, %v7247_v24, 0.0  ;;  %v7253_v48 = vpop.eup %5836 }
 0xf98   :  { %5842 = vpow2.f32 %v3405_v32  ;;  %3118 = vadd.xlane.f32.xlu1 %v3117_v39  ;;  %v3105_v19 = vsel %vm486_vm10, %v7253_v48, 0.0 }
 0xf99   :  { %2803 = vadd.xlane.f32.xlu0 %v2802_v21 }
 0xf9a   :  { %v7257_v62 = vpop.eup %5838 }
 0xf9b   :  { %v3411_v5 = vsel %vm486_vm10, %v7257_v62, 0.0  ;;  %v3395_v51 = vpop.xlane.xlu0 %3394 }
 0xf9c   :  { %v3400_v4 = vsub.f32 %v7162_v49, %v3395_v51 }
 0xf9d   :  { %3106 = vadd.xlane.f32.xlu0 %v3105_v19  ;;  %v5672_v19 = vunpack.i.h.bf16 %v7271_v30 }
 0xf9e   :  { %v7259_v34 = vpop.eup %5840  ;;  %v3409_v31 = vmul.f32 1.442695, %v3400_v4 }
 0xf9f   :  { %v3414_v37 = vsel %vm486_vm10, %v7259_v34, 0.0 }
 0xfa0   :  { %3415 = vadd.xlane.f32.xlu1 %v3414_v37  ;;  %5844 = vpow2.f32 %v3409_v31  ;;  %v5671_v37 = vunpack.i.l.bf16 %v7271_v30 }
 0xfa1   :  { %3412 = vadd.xlane.f32.xlu0 %v3411_v5 }
 0xfa2   :  { %v7265_v3 = vpop.eup %5842  ;;  %v5447_v4 = vpack.c.bf16 %v5672_v19, %v5671_v37 }
 0xfa3   :  { %v3417_v23 = vsel %vm486_vm10, %v7265_v3, 0.0 }
 0xfa4   :  { %3418 = vadd.xlane.f32.xlu1 %v3417_v23 }
 0xfaa   :  { %v7275_v47 = vpop.eup %5844 }
 0xfab   :  { %v3423_v59 = vsel %vm499_vm11, %v7275_v47, 0.0 }
 0xfb7   :  { %3138 = vrot.lane.b32.xlu0 %v6862_v14, %s5963_s13 }
 0xfc4   :  { %v3392_v35 = vpop.xlane.xlu1 %3391 }
 0xfc5   :  { %v3399_v25 = vsub.f32 %v7169_v6, %v3392_v35 }
 0xfc7   :  { %v3407_v9 = vmul.f32 1.442695, %v3399_v25 }
 0xfc9   :  { %5846 = vpow2.f32 %v3407_v9 }
 0xfd3   :  { %v7277_v53 = vpop.eup %5846 }
 0xfd4   :  { %v3420_v10 = vsel %vm486_vm10, %v7277_v53, 0.0 }
 0xfd5   :  { %3421 = vadd.xlane.f32.xlu1 %v3420_v10 }
 0xfd6   :  { %3424 = vadd.xlane.f32.xlu0 %v3423_v59 }
 0xfe6   :  { %5679 = vrot.lane.b32.xlu1 %v6840_v26, %s5964_s14  ;;  %v5667_v26 = vunpack.i.h.bf16 %v7007_v44 }
 0xfe8   :  { %v5436_v41 = vpack.c.bf16 %v5667_v26, %v5666_v43 }
 0xfe9   :  { %v2495_v49 = vpop.xlane.xlu1 %2494 }
 0xfea   :  { %5848 = vrcp.f32 %v2495_v49  ;;  %5684 = vrot.lane.b32.xlu1 %v6850_v36, %s5964_s14 }
 0xfed   :  { %v2498_v6 = vpop.xlane.xlu0 %2497 }
 0xfee   :  { %5850 = vrcp.f32 %v2498_v6  ;;  %3444 = vrot.lane.b32.xlu1 %v6862_v14, %s5964_s14 }
 0xff1   :  { %v2501_v17 = vpop.xlane.xlu1 %2500 }
 0xff2   :  { %5852 = vrcp.f32 %v2501_v17 }
 0xff4   :  { %v5849_v29 = vpop.eup %5848 }
 0xff5   :  { %v2513_v60 = vmul.f32 %v5849_v29, %v7180_v16 }
 0xff7   :  { %5045 = vmatmul.mubr.msk.f32.vlgmr.msra.gmra.mrb[76].mxu0 %vm486_vm10, %v2513_v60 }
 0xff8   :  { %v5851_v36 = vpop.eup %5850  ;;  %5434 = vmatpush3.bf16.msra.mxu0 %v5433_v7  ;;  %5047 = vmatprep.mubr.msk.f32.mxu0 %vm5951_vm0, %v5952_v1 }
 0xff9   :  { %5435 = vmatprep.subr.bf16.mxu0 %v5950_v0  ;;  %v2514_v14 = vmul.f32 %v5851_v36, %v7185_v27  ;;  %v5675_v27 = vpop.permute.xlu0 %5674  ;;  %v2507_v46 = vpop.xlane.xlu1 %2506 }
 0xffa   :  { %v5677_v31 = vunpack.i.h.bf16 %v5675_v27  ;;  %v5676_v35 = vunpack.i.l.bf16 %v5675_v27 }
 0xffb   :  { %5048 = vmatmul.mubr.msk.f32.gmra.mrb[78].mxu0 %vm486_vm10, %v2514_v14 }
 0xffc   :  { %v5853_v16 = vpop.eup %5852  ;;  %5437 = vmatpush3.bf16.msra.mxu0 %v5436_v41  ;;  %5050 = vmatprep.mubr.msk.f32.mxu0 %vm5951_vm0, %v5952_v1  ;;  %v5450_v10 = vpack.c.bf16 %v5677_v31, %v5676_v35 }
 0xffd   :  { %5092 = vmatprep.subr.mxu0 %v5952_v1  ;;  %v2515_v44 = vmul.f32 %v5853_v16, %v7189_v2 }
 0xfff   :  { %5051 = vmatmul.mubr.msk.f32.gmra.mrb[80].mxu0 %vm486_vm10, %v2515_v44 }
0x1000   :  { %5093 = vmatpush3.msk.msra.mxu0 %vm572_vm9, %v7175_v63  ;;  %5053 = vmatprep.mubr.msk.f32.mxu0 %vm5951_vm0, %v5952_v1 }
0x1001   :  { %5446 = vmatprep.subr.bf16.mxu0 %v5950_v0  ;;  %v2801_v55 = vpop.xlane.xlu1 %2800 }
0x1009   :  { %v2807_v50 = vpop.xlane.xlu1 %2806 }
0x100d   :  { %v2810_v33 = vpop.xlane.xlu1 %2809 }
0x1011   :  { %v2813_v5 = vpop.xlane.xlu1 %2812 }
0x1022   :  { %v2504_v54 = vpop.xlane.xlu0 %2503 }
0x1023   :  { %5854 = vrcp.f32 %v2504_v54 }
0x1024   :  { %5856 = vrcp.f32 %v2507_v46 }
0x1025   :  { %5858 = vrcp.f32 %v2801_v55 }
0x1026   :  { %v2804_v57 = vpop.xlane.xlu0 %2803 }
0x1027   :  { %5860 = vrcp.f32 %v2804_v57 }
0x1028   :  { %5862 = vrcp.f32 %v2807_v50 }
0x1029   :  { %5864 = vrcp.f32 %v2810_v33 }
0x102a   :  { %v3107_v23 = vpop.xlane.xlu0 %3106  ;;  %5866 = vrcp.f32 %v2813_v5 }
0x102b   :  { %5868 = vrcp.f32 %v3107_v23 }
0x102d   :  { %v5855_v2 = vpop.eup %5854 }
0x102e   :  { %v2516_v32 = vmul.f32 %v5855_v2, %v7236_v15  ;;  %v5857_v63 = vpop.eup %5856  ;;  %v3413_v30 = vpop.xlane.xlu0 %3412 }
0x102f   :  { %v2517_v39 = vmul.f32 %v5857_v63, %v7194_v18  ;;  %v5859_v21 = vpop.eup %5858  ;;  %v3110_v18 = vpop.xlane.xlu1 %3109 }
0x1030   :  { %5054 = vmatmul.mubr.msk.f32.gmra.mrb[82].mxu0 %vm486_vm10, %v2516_v32  ;;  %v2819_v15 = vmul.f32 %v5859_v21, %v7200_v28  ;;  %5870 = vrcp.f32 %v3110_v18 }
0x1031   :  { %5056 = vmatprep.mubr.msk.f32.mxu0 %vm5951_vm0, %v5952_v1  ;;  %v5861_v51 = vpop.eup %5860 }
0x1032   :  { %v2820_v25 = vmul.f32 %v5861_v51, %v7245_v40  ;;  %v5863_v9 = vpop.eup %5862  ;;  %v3139_v6 = vpop.permute.xlu0 %3138 }
0x1033   :  { %v3113_v28 = vpop.xlane.xlu1 %3112  ;;  %v2821_v59 = vmul.f32 %v5863_v9, %v7207_v20  ;;  %v5865_v49 = vpop.eup %5864 }
0x1034   :  { %5057 = vmatmul.mubr.msk.f32.gmra.mrb[84].mxu0 %vm486_vm10, %v2517_v39  ;;  %v2822_v40 = vmul.f32 %v5865_v49, %v7212_v8  ;;  %v5867_v17 = vpop.eup %5866  ;;  %5872 = vrcp.f32 %v3113_v28 }
0x1035   :  { %5094 = vmatprep.mubr.msk.f32.mxu0 %vm5951_vm0, %v5952_v1  ;;  %v2823_v20 = vmul.f32 %v5867_v17, %v7218_v45  ;;  %v5869_v22 = vpop.eup %5868  ;;  %v3632_v17 = vld [vmem:[#allocation2 + $0x178] sm:$0xff] }
0x1036   :  { %v3125_v29 = vmul.f32 %v5869_v22, %v7253_v48 }
0x1037   :  { %v3116_v13 = vpop.xlane.xlu1 %3115 }
0x1038   :  { %5095 = vmatmul.mubr.msk.f32.vlgmr.msra.gmra.mrb[86].mxu0 %vm486_vm10, %v2819_v15  ;;  %5874 = vrcp.f32 %v3116_v13  ;;  %v3633_v13 = vld [vmem:[#allocation2 + $0x180] sm:$0xff] }
0x1039   :  { %5448 = vmatpush3.bf16.msra.mxu0 %v5447_v4  ;;  %5097 = vmatprep.mubr.msk.f32.mxu0 %vm5951_vm0, %v5952_v1 }
0x103a   :  { %5449 = vmatprep.subr.bf16.mxu0 %v5950_v0  ;;  %v5871_v60 = vpop.eup %5870 }
0x103b   :  { %v3119_v8 = vpop.xlane.xlu1 %3118  ;;  %v3126_v26 = vmul.f32 %v5871_v60, %v7226_v56 }
0x103c   :  { %5098 = vmatmul.mubr.msk.f32.gmra.mrb[88].mxu0 %vm486_vm10, %v2820_v25  ;;  %5876 = vrcp.f32 %v3119_v8  ;;  %v5467_v8 = vpack.c.bf16 %v3633_v13, %v3632_v17  ;;  %v4371_v17 = vld [vmem:[#allocation2 + $0x198] ss:$0 sm:$0xff] }
0x103d   :  { %5451 = vmatpush3.bf16.msra.mxu0 %v5450_v10  ;;  %5100 = vmatprep.mubr.msk.f32.mxu0 %vm5951_vm0, %v5952_v1  ;;  %5878 = vrcp.f32 %v3413_v30 }
0x103e   :  { %5142 = vmatprep.subr.mxu0 %v5952_v1  ;;  %v5873_v45 = vpop.eup %5872  ;;  %5468 = vmatpush3.bf16.msra.mxu1 %v5467_v8 }
0x103f   :  { %v3127_v43 = vmul.f32 %v5873_v45, %v7231_v42  ;;  %v3416_v14 = vpop.xlane.xlu1 %3415  ;;  %5469 = vmatprep.subr.bf16.mxu1 %v5950_v0 }
0x1040   :  { %5101 = vmatmul.mubr.msk.f32.gmra.mrb[90].mxu0 %vm486_vm10, %v2821_v59  ;;  %5880 = vrcp.f32 %v3416_v14 }
0x1041   :  { %5143 = vmatpush3.msk.msra.mxu0 %vm572_vm9, %v3139_v6  ;;  %5103 = vmatprep.mubr.msk.f32.mxu0 %vm5951_vm0, %v5952_v1 }
0x1042   :  { %5460 = vmatprep.subr.bf16.mxu0 %v5950_v0  ;;  %v5875_v7 = vpop.eup %5874 }
0x1043   :  { %v3128_v48 = vmul.f32 %v5875_v7, %v7238_v11  ;;  %v3419_v42 = vpop.xlane.xlu1 %3418 }
0x1044   :  { %5104 = vmatmul.mubr.msk.f32.gmra.mrb[92].mxu0 %vm486_vm10, %v2822_v40  ;;  %5882 = vrcp.f32 %v3419_v42 }
0x1045   :  { %5106 = vmatprep.mubr.msk.f32.mxu0 %vm5951_vm0, %v5952_v1 }
0x1046   :  { %v5877_v36 = vpop.eup %5876 }
0x1047   :  { %v3129_v56 = vmul.f32 %v5877_v36, %v7247_v24  ;;  %v5879_v50 = vpop.eup %5878 }
0x1048   :  { %5107 = vmatmul.mubr.msk.f32.gmra.mrb[94].mxu0 %vm486_vm10, %v2823_v20  ;;  %v3431_v57 = vmul.f32 %v5879_v50, %v7257_v62  ;;  %v3634_v20 = vld [vmem:[#allocation2 + $0x188] sm:$0xff] }
0x1049   :  { %5144 = vmatprep.mubr.msk.f32.mxu0 %vm5951_vm0, %v5952_v1 }
0x104a   :  { %v5881_v32 = vpop.eup %5880 }
0x104b   :  { %v3432_v63 = vmul.f32 %v5881_v32, %v7259_v34 }
0x104c   :  { %5145 = vmatmul.mubr.msk.f32.vlgmr.msra.gmra.mrb[96].mxu0 %vm486_vm10, %v3125_v29  ;;  %v3635_v29 = vld [vmem:[#allocation2 + $0x190] sm:$0xff] }
0x104d   :  { %5147 = vmatprep.mubr.msk.f32.mxu0 %vm5951_vm0, %v5952_v1 }
0x104e   :  { %v5883_v39 = vpop.eup %5882 }
0x104f   :  { %v3433_v62 = vmul.f32 %v5883_v39, %v7265_v3 }
0x1050   :  { %5148 = vmatmul.mubr.msk.f32.gmra.mrb[98].mxu0 %vm486_vm10, %v3126_v26  ;;  %v5470_v26 = vpack.c.bf16 %v3635_v29, %v3634_v20 }
0x1051   :  { %5150 = vmatprep.mubr.msk.f32.mxu0 %vm5951_vm0, %v5952_v1 }
0x1052   :  { %5471 = vmatpush3.bf16.msra.mxu1 %v5470_v26 }
0x1053   :  { %5478 = vmatprep.subr.bf16.mxu1 %v5950_v0 }
0x1054   :  { %5151 = vmatmul.mubr.msk.f32.gmra.mrb[100].mxu0 %vm486_vm10, %v3127_v43 }
0x1055   :  { %5153 = vmatprep.mubr.msk.f32.mxu0 %vm5951_vm0, %v5952_v1 }
0x1058   :  { %5154 = vmatmul.mubr.msk.f32.gmra.mrb[102].mxu0 %vm486_vm10, %v3128_v48 }
0x1059   :  { %5156 = vmatprep.mubr.msk.f32.mxu0 %vm5951_vm0, %v5952_v1 }
0x105c   :  { %5157 = vmatmul.mubr.msk.f32.gmra.mrb[104].mxu0 %vm486_vm10, %v3129_v56 }
0x105d   :  { %5194 = vmatprep.mubr.msk.f32.mxu0 %vm5951_vm0, %v5952_v1 }
0x1062   :  { %v3422_v41 = vpop.xlane.xlu1 %3421 }
0x1063   :  { %5884 = vrcp.f32 %v3422_v41  ;;  %v3425_v2 = vpop.xlane.xlu0 %3424 }
0x1064   :  { %5886 = vrcp.f32 %v3425_v2 }
0x1066   :  { %v5680_v16 = vpop.permute.xlu1 %5679 }
0x1067   :  { %v5682_v44 = vunpack.i.h.bf16 %v5680_v16  ;;  %v5681_v11 = vunpack.i.l.bf16 %v5680_v16 }
0x1069   :  { %v5461_v27 = vpack.c.bf16 %v5682_v44, %v5681_v11 }
0x106a   :  { %v5685_v46 = vpop.permute.xlu1 %5684 }
0x106b   :  { %v5687_v54 = vunpack.i.h.bf16 %v5685_v46  ;;  %v5686_v55 = vunpack.i.l.bf16 %v5685_v46  ;;  %5462 = vmatpush3.bf16.msra.mxu0 %v5461_v27 }
0x106c   :  { %5463 = vmatprep.subr.bf16.mxu0 %v5950_v0 }
0x106d   :  { %v5464_v24 = vpack.c.bf16 %v5687_v54, %v5686_v55  ;;  %v5885_v21 = vpop.eup %5884 }
0x106e   :  { %v3445_v33 = vpop.permute.xlu1 %3444  ;;  %v3434_v19 = vmul.f32 %v5885_v21, %v7277_v53  ;;  %v5887_v37 = vpop.eup %5886 }
0x106f   :  { %5465 = vmatpush3.bf16.msra.mxu0 %v5464_v24  ;;  %v3435_v34 = vmul.f32 %v5887_v37, %v7275_v47 }
0x1070   :  { %5192 = vmatprep.subr.mxu0 %v5952_v1 }
0x1073   :  { %5193 = vmatpush3.msk.msra.mxu0 %vm572_vm9, %v3445_v33 }
0x1074   :  { %5195 = vmatmul.mubr.msk.f32.vlgmr.msra.gmra.mrb[106].mxu0 %vm486_vm10, %v3431_v57  ;;  %5472 = vmatprep.subr.bf16.mxu0 %v5950_v0 }
0x1075   :  { %5197 = vmatprep.mubr.msk.f32.mxu0 %vm5951_vm0, %v5952_v1 }
0x1078   :  { %5198 = vmatmul.mubr.msk.f32.gmra.mrb[108].mxu0 %vm486_vm10, %v3432_v63 }
0x1079   :  { %5200 = vmatprep.mubr.msk.f32.mxu0 %vm5951_vm0, %v5952_v1 }
0x107c   :  { %5201 = vmatmul.mubr.msk.f32.gmra.mrb[110].mxu0 %vm486_vm10, %v3433_v62 }
0x107d   :  { %5203 = vmatprep.mubr.msk.f32.mxu0 %vm5951_vm0, %v5952_v1 }
0x1080   :  { %5204 = vmatmul.mubr.msk.f32.gmra.mrb[112].mxu0 %vm486_vm10, %v3434_v19 }
0x1081   :  { %5206 = vmatprep.mubr.msk.f32.mxu0 %vm5951_vm0, %v5952_v1 }
0x1084   :  { %5207 = vmatmul.mubr.msk.f32.gmra.mrb[114].mxu0 %vm486_vm10, %v3435_v34 }
0x1085   :  { %5240 = vmatprep.mubr.msk.f32.mxu0 %vm5951_vm0, %v5952_v1 }
0x10ca   :  { %v7388_v3 = vpop.f32.mrb[76].mxu0 }
0x10cb   :  { %v5046_v5 = vpop.f32.mrb[77].mxu0 }
0x10ce   :  { %v7390_v23 = vpop.f32.mrb[78].mxu0 }
0x10cf   :  { %v5049_v15 = vpop.f32.mrb[79].mxu0 }
0x10d2   :  { %v7392_v53 = vpop.f32.mrb[80].mxu0 }
0x10d3   :  { %v5052_v51 = vpop.f32.mrb[81].mxu0 }
0x1103   :  { %v7394_v4 = vpop.f32.mrb[82].mxu0 }
0x1104   :  { %v5055_v31 = vpop.f32.mrb[83].mxu0 }
0x1107   :  { %v7396_v35 = vpop.f32.mrb[84].mxu0 }
0x1108   :  { %v5058_v47 = vpop.f32.mrb[85].mxu0 }
0x110b   :  { %v2921_v18 = vpop.f32.mrb[86].mxu0 }
0x110c   :  { %3562 = vrot.lane.b32.xlu1 %v2921_v18, %s5949_s26  ;;  %v5096_v30 = vpop.f32.mrb[87].mxu0 }
0x110f   :  { %v2926_v25 = vpop.f32.mrb[88].mxu0 }
0x1110   :  { %3564 = vrot.lane.b32.xlu1 %v2926_v25, %s5949_s26  ;;  %v5099_v9 = vpop.f32.mrb[89].mxu0 }
0x1113   :  { %v2931_v10 = vpop.f32.mrb[90].mxu0 }
0x1114   :  { %3566 = vrot.lane.b32.xlu1 %v2931_v10, %s5949_s26  ;;  %v5102_v28 = vpop.f32.mrb[91].mxu0 }
0x1117   :  { %v2936_v59 = vpop.f32.mrb[92].mxu0 }
0x1118   :  { %v5105_v49 = vpop.f32.mrb[93].mxu0 }
0x111b   :  { %v2941_v6 = vpop.f32.mrb[94].mxu0 }
0x111c   :  { %v5108_v40 = vpop.f32.mrb[95].mxu0 }
0x111f   :  { %v3227_v22 = vpop.f32.mrb[96].mxu0 }
0x1120   :  { %3582 = vrot.lane.b32.xlu0 %v3227_v22, %s5965_s15  ;;  %v5146_v60 = vpop.f32.mrb[97].mxu0 }
0x1123   :  { %v3232_v45 = vpop.f32.mrb[98].mxu0 }
0x1124   :  { %3584 = vrot.lane.b32.xlu1 %v3232_v45, %s5965_s15  ;;  %v5149_v43 = vpop.f32.mrb[99].mxu0 }
0x1127   :  { %v3237_v7 = vpop.f32.mrb[100].mxu0 }
0x1128   :  { %3586 = vrot.lane.b32.xlu1 %v3237_v7, %s5965_s15  ;;  %v5152_v48 = vpop.f32.mrb[101].mxu0 }
0x112b   :  { %v3242_v36 = vpop.f32.mrb[102].mxu0 }
0x112c   :  { %3588 = vrot.lane.b32.xlu0 %v3242_v36, %s5965_s15  ;;  %v5155_v14 = vpop.f32.mrb[103].mxu0 }
0x112f   :  { %v3247_v56 = vpop.f32.mrb[104].mxu0 }
0x1130   :  { %v5158_v42 = vpop.f32.mrb[105].mxu0 }
0x1147   :  { %v3533_v41 = vpop.f32.mrb[106].mxu0 }
0x1148   :  { %3602 = vrot.lane.b32.xlu1 %v3533_v41, %s5966_s0  ;;  %v5196_v16 = vpop.f32.mrb[107].mxu0 }
0x114b   :  { %v3538_v44 = vpop.f32.mrb[108].mxu0 }
0x114c   :  { %3604 = vrot.lane.b32.xlu1 %v3538_v44, %s5966_s0  ;;  %v5199_v11 = vpop.f32.mrb[109].mxu0 }
0x114f   :  { %v3543_v27 = vpop.f32.mrb[110].mxu0 }
0x1150   :  { %3568 = vrot.lane.b32.xlu1 %v2936_v59, %s5949_s26  ;;  %3606 = vrot.lane.b32.xlu0 %v3543_v27, %s5966_s0  ;;  %v5202_v46 = vpop.f32.mrb[111].mxu0 }
0x1153   :  { %v3548_v54 = vpop.f32.mrb[112].mxu0 }
0x1154   :  { %3570 = vrot.lane.b32.xlu0 %v2941_v6, %s5949_s26  ;;  %3608 = vrot.lane.b32.xlu1 %v3548_v54, %s5966_s0  ;;  %v5205_v55 = vpop.f32.mrb[113].mxu0 }
0x1157   :  { %v3553_v24 = vpop.f32.mrb[114].mxu0 }
0x1158   :  { %3590 = vrot.lane.b32.xlu1 %v3247_v56, %s5965_s15  ;;  %3610 = vrot.lane.b32.xlu0 %v3553_v24, %s5966_s0  ;;  %v5208_v50 = vpop.f32.mrb[115].mxu0 }
0x117e   :  { %v3563_v57 = vpop.permute.xlu1 %3562 }
0x117f   :  { %v3617_v62 = vsel %vm375_vm7, %v7388_v3, %v3563_v57 }
0x1182   :  { %v3565_v2 = vpop.permute.xlu1 %3564 }
0x1183   :  { %v3618_v34 = vsel %vm375_vm7, %v7390_v23, %v3565_v2 }
0x1186   :  { %v3567_v33 = vpop.permute.xlu1 %3566 }
0x1187   :  { %v3619_v3 = vsel %vm375_vm7, %v7392_v53, %v3567_v33 }
0x1192   :  { %v3583_v39 = vpop.permute.xlu0 %3582 }
0x1193   :  { %v3622_v21 = vsel %vm1648_vm12, %v3617_v62, %v3583_v39 }
0x1196   :  { %v3585_v32 = vpop.permute.xlu1 %3584 }
0x1197   :  { %v3623_v5 = vsel %vm1648_vm12, %v3618_v34, %v3585_v32 }
0x119a   :  { %v3587_v63 = vpop.permute.xlu1 %3586 }
0x119b   :  { %v3624_v47 = vsel %vm1648_vm12, %v3619_v3, %v3587_v63 }
0x119e   :  { %v3589_v15 = vpop.permute.xlu0 %3588 }
0x11ba   :  { %v3603_v19 = vpop.permute.xlu1 %3602 }
0x11bb   :  { %v3627_v37 = vsel %vm1654_vm13, %v3622_v21, %v3603_v19 }
0x11bc   :  { %5218 = vmatmul.mubr.msk.f32.vlgmr.msra.gmra.mrb[104].mxu1 %vm160_vm5, %v3627_v37 }
0x11bd   :  { %5220 = vmatprep.mubr.msk.f32.mxu1 %vm5951_vm0, %v5952_v1 }
0x11be   :  { %v3605_v51 = vpop.permute.xlu1 %3604 }
0x11bf   :  { %v3628_v31 = vsel %vm1654_vm13, %v3623_v5, %v3605_v51 }
0x11c0   :  { %5221 = vmatmul.mubr.msk.f32.gmra.mrb[106].mxu1 %vm160_vm5, %v3628_v31 }
0x11c1   :  { %5223 = vmatprep.mubr.msk.f32.mxu1 %vm5951_vm0, %v5952_v1 }
0x11c2   :  { %v3569_v23 = vpop.permute.xlu1 %3568  ;;  %v3607_v18 = vpop.permute.xlu0 %3606 }
0x11c3   :  { %v3620_v30 = vsel %vm375_vm7, %v7394_v4, %v3569_v23  ;;  %v3629_v25 = vsel %vm1654_vm13, %v3624_v47, %v3607_v18 }
0x11c4   :  { %5224 = vmatmul.mubr.msk.f32.gmra.mrb[108].mxu1 %vm160_vm5, %v3629_v25  ;;  %v3625_v53 = vsel %vm1648_vm12, %v3620_v30, %v3589_v15  ;;  %v3836_v30 = vld [vmem:[#allocation2 + $0x1b0] sm:$0xff]  ;;  %v3837_v25 = vld [vmem:[#allocation2 + $0x1b8] sm:$0xff] }
0x11c5   :  { %5226 = vmatprep.mubr.msk.f32.mxu1 %vm5951_vm0, %v5952_v1 }
0x11c6   :  { %v3571_v9 = vpop.permute.xlu0 %3570  ;;  %v3609_v10 = vpop.permute.xlu1 %3608 }
0x11c7   :  { %v3630_v28 = vsel %vm1654_vm13, %v3625_v53, %v3609_v10  ;;  %v3621_v4 = vsel %vm375_vm7, %v7396_v35, %v3571_v9  ;;  %v5473_v9 = vpack.c.bf16 %v3837_v25, %v3836_v30  ;;  %v3838_v53 = vld [vmem:[#allocation2 + $0x1c0] sm:$0xff]  ;;  %v3839_v10 = vld [vmem:[#allocation2 + $0x1c8] sm:$0xff] }
0x11c8   :  { %5227 = vmatmul.mubr.msk.f32.gmra.mrb[110].mxu1 %vm160_vm5, %v3630_v28  ;;  %v5476_v28 = vpack.c.bf16 %v3839_v10, %v3838_v53  ;;  %v4005_v25 = vld [vmem:[#allocation2 + $0x228] sm:$0xff]  ;;  %v4007_v10 = vld [vmem:[#allocation2 + $0x238] sm:$0xff] }
0x11c9   :  { %5229 = vmatprep.mubr.msk.f32.mxu1 %vm5951_vm0, %v5952_v1  ;;  %5474 = vmatpush3.bf16.msra.mxu0 %v5473_v9  ;;  %v4006_v9 = vld [vmem:[#allocation2 + $0x230] sm:$0xff] }
0x11ca   :  { %v3591_v59 = vpop.permute.xlu1 %3590  ;;  %v3611_v49 = vpop.permute.xlu0 %3610  ;;  %5475 = vmatprep.subr.bf16.mxu0 %v5950_v0  ;;  %v5494_v53 = vpack.c.bf16 %v4006_v9, %v4005_v25 }
0x11cb   :  { %v3626_v6 = vsel %vm1648_vm12, %v3621_v4, %v3591_v59  ;;  %v3995_v4 = vld [vmem:[#allocation2 + $0x1d8] sm:$0xff]  ;;  %v3996_v59 = vld [vmem:[#allocation2 + $0x1e0] sm:$0xff] }
0x11cc   :  { %v3631_v40 = vsel %vm1654_vm13, %v3626_v6, %v3611_v49  ;;  %v5479_v49 = vpack.c.bf16 %v3996_v59, %v3995_v4  ;;  %v4009_v59 = vld [vmem:[#allocation2 + $0x248] sm:$0xff] }
0x11cd   :  { %5230 = vmatmul.mubr.msk.f32.gmra.mrb[112].mxu1 %vm160_vm5, %v3631_v40  ;;  %5477 = vmatpush3.bf16.msra.mxu0 %v5476_v28  ;;  %v4008_v28 = vld [vmem:[#allocation2 + $0x240] sm:$0xff] }
0x11ce   :  { %5287 = vmatprep.mubr.msk.f32.mxu1 %vm5951_vm0, %v5952_v1  ;;  %5480 = vmatpush3.bf16.msra.mxu1 %v5479_v49  ;;  %v5497_v4 = vpack.c.bf16 %v4008_v28, %v4007_v10  ;;  %v4010_v49 = vld [vmem:[#allocation2 + $0x250] sm:$0xff] }
0x11cf   :  { %5481 = vmatprep.subr.bf16.mxu1 %v5950_v0 }
0x128f   :  { %v3722_v13 = vpop.f32.mrb[104].mxu1 }
0x1290   :  { %v3723_v20 = vadd.f32 %v4371_v17, %v3722_v13  ;;  %v5219_v22 = vpop.f32.mrb[105].mxu1 }
0x1292   :  { %v7451_v8 = vadd.f32 %v3723_v20, %v6783_v38 }
0x1293   :  { %v3727_v29 = vpop.f32.mrb[106].mxu1 }
0x1294   :  { %v3728_v35 = vadd.f32 %v4371_v17, %v3727_v29  ;;  %v5222_v60 = vpop.f32.mrb[107].mxu1  ;;  %v3753_v26 = vsel %vm160_vm5, %v7451_v8, 0.0 }
0x1295   :  { %3754 = vadd.xlane.f32.xlu1 %v3753_v26 }
0x1296   :  { %v7456_v45 = vadd.f32 %v3728_v35, %v6788_v61 }
0x1297   :  { %v3732_v43 = vpop.f32.mrb[108].mxu1 }
0x1298   :  { %v3733_v7 = vadd.f32 %v4371_v17, %v3732_v43  ;;  %v5225_v48 = vpop.f32.mrb[109].mxu1  ;;  %v3756_v36 = vsel %vm160_vm5, %v7456_v45, 0.0 }
0x1299   :  { %3757 = vadd.xlane.f32.xlu0 %v3756_v36  ;;  %v4377_v48 = vld [vmem:[#allocation2 + $0x1a0] ss:$0 sm:$0xff] }
0x129a   :  { %v7461_v38 = vadd.f32 %v3733_v7, %v6793_v58 }
0x129b   :  { %v3737_v14 = vpop.f32.mrb[110].mxu1 }
0x129c   :  { %v3738_v56 = vadd.f32 %v4371_v17, %v3737_v14  ;;  %v5228_v42 = vpop.f32.mrb[111].mxu1  ;;  %v3759_v41 = vsel %vm160_vm5, %v7461_v38, 0.0 }
0x129d   :  { %3760 = vadd.xlane.f32.xlu0 %v3759_v41 }
0x129e   :  { %v7466_v61 = vadd.f32 %v3738_v56, %v6798_v52  ;;  %v4378_v56 = vld [vmem:[#allocation2 + $0x1a8] ss:$0 sm:$0xff] }
0x12a0   :  { %v3742_v16 = vpop.f32.mrb[112].mxu1  ;;  %v3762_v44 = vsel %vm160_vm5, %v7466_v61, 0.0 }
0x12a1   :  { %v3743_v11 = vadd.f32 %v4371_v17, %v3742_v16  ;;  %3763 = vadd.xlane.f32.xlu1 %v3762_v44  ;;  %v5231_v27 = vpop.f32.mrb[113].mxu1 }
0x12a3   :  { %v7471_v58 = vadd.f32 %v3743_v11, %v6803_v12 }
0x12a5   :  { %v3765_v46 = vsel %vm173_vm6, %v7471_v58, 0.0 }
0x12a6   :  { %3766 = vadd.xlane.f32.xlu0 %v3765_v46 }
0x1322   :  { %v3755_v54 = vpop.xlane.xlu1 %3754 }
0x1323   :  { %v3768_v55 = vmul.f32 0.03125, %v3755_v54 }
0x1325   :  { %v3773_v24 = vsub.f32 %v7451_v8, %v3768_v55 }
0x1326   :  { %v3758_v52 = vpop.xlane.xlu0 %3757 }
0x1327   :  { %v3769_v50 = vmul.f32 0.03125, %v3758_v52  ;;  %v3778_v57 = vmul.f32 %v3773_v24, %v3773_v24 }
0x1329   :  { %v7477_v2 = vsub.f32 %v7456_v45, %v3769_v50  ;;  %v3783_v33 = vsel %vm160_vm5, %v3778_v57, 0.0 }
0x132a   :  { %v3761_v32 = vpop.xlane.xlu0 %3760  ;;  %3784 = vadd.xlane.f32.xlu1 %v3783_v33 }
0x132b   :  { %v3770_v12 = vmul.f32 0.03125, %v3761_v32  ;;  %v3779_v63 = vmul.f32 %v7477_v2, %v7477_v2 }
0x132d   :  { %v7483_v39 = vsub.f32 %v7461_v38, %v3770_v12  ;;  %v3786_v62 = vsel %vm160_vm5, %v3779_v63, 0.0 }
0x132e   :  { %v3764_v21 = vpop.xlane.xlu1 %3763  ;;  %3787 = vadd.xlane.f32.xlu0 %v3786_v62 }
0x132f   :  { %v3771_v19 = vmul.f32 0.03125, %v3764_v21  ;;  %v3780_v37 = vmul.f32 %v7483_v39, %v7483_v39 }
0x1331   :  { %v7489_v34 = vsub.f32 %v7466_v61, %v3771_v19  ;;  %v3789_v5 = vsel %vm160_vm5, %v3780_v37, 0.0  ;;  %v3997_v19 = vld [vmem:[#allocation2 + $0x1e8] sm:$0xff]  ;;  %v3998_v37 = vld [vmem:[#allocation2 + $0x1f0] sm:$0xff] }
0x1332   :  { %3790 = vadd.xlane.f32.xlu1 %v3789_v5  ;;  %v3999_v5 = vld [vmem:[#allocation2 + $0x1f8] sm:$0xff] }
0x1333   :  { %v3767_v15 = vpop.xlane.xlu0 %3766  ;;  %v3781_v51 = vmul.f32 %v7489_v34, %v7489_v34 }
0x1334   :  { %v3772_v31 = vmul.f32 0.03125, %v3767_v15  ;;  %v4000_v15 = vld [vmem:[#allocation2 + $0x200] sm:$0xff] }
0x1335   :  { %v3792_v3 = vsel %vm160_vm5, %v3781_v51, 0.0  ;;  %v5485_v51 = vpack.c.bf16 %v4000_v15, %v3999_v5 }
0x1336   :  { %v7496_v47 = vsub.f32 %v7471_v58, %v3772_v31  ;;  %3793 = vadd.xlane.f32.xlu0 %v3792_v3  ;;  %v4001_v31 = vld [vmem:[#allocation2 + $0x208] sm:$0xff]  ;;  %v4002_v3 = vld [vmem:[#allocation2 + $0x210] sm:$0xff] }
0x1338   :  { %v3782_v23 = vmul.f32 %v7496_v47, %v7496_v47 }
0x133a   :  { %v3795_v18 = vsel %vm173_vm6, %v3782_v23, 0.0  ;;  %v4003_v23 = vld [vmem:[#allocation2 + $0x218] sm:$0xff] }
0x133b   :  { %3796 = vadd.xlane.f32.xlu1 %v3795_v18  ;;  %v4004_v18 = vld [vmem:[#allocation2 + $0x220] sm:$0xff] }
0x133c   :  { %v5491_v30 = vpack.c.bf16 %v4004_v18, %v4003_v23 }
0x13b7   :  { %v3785_v6 = vpop.xlane.xlu1 %3784 }
0x13b8   :  { %v3798_v40 = vmul.f32 0.03125, %v3785_v6  ;;  %v5500_v6 = vpack.c.bf16 %v4010_v49, %v4009_v59 }
0x13ba   :  { %v3803_v17 = vadd.f32 1e-05, %v3798_v40  ;;  %v4379_v40 = vld [vmem:[#allocation2 + $0x1d0] ss:$0 sm:$0xff] }
0x13bb   :  { %v3788_v13 = vpop.xlane.xlu0 %3787 }
0x13bc   :  { %5888 = vrsqrt.f32 %v3803_v17  ;;  %v3799_v20 = vmul.f32 0.03125, %v3788_v13 }
0x13be   :  { %v3804_v22 = vadd.f32 1e-05, %v3799_v20 }
0x13bf   :  { %v3791_v29 = vpop.xlane.xlu1 %3790 }
0x13c0   :  { %5890 = vrsqrt.f32 %v3804_v22  ;;  %v3800_v35 = vmul.f32 0.03125, %v3791_v29 }
0x13c2   :  { %v3805_v60 = vadd.f32 1e-05, %v3800_v35 }
0x13c3   :  { %v3794_v26 = vpop.xlane.xlu0 %3793 }
0x13c4   :  { %5892 = vrsqrt.f32 %v3805_v60  ;;  %v3801_v43 = vmul.f32 0.03125, %v3794_v26 }
0x13c6   :  { %v5889_v7 = vpop.eup %5888  ;;  %v3806_v36 = vadd.f32 1e-05, %v3801_v43 }
0x13c7   :  { %v3813_v14 = vmul.f32 %v5889_v7, %v3773_v24 }
0x13c8   :  { %5894 = vrsqrt.f32 %v3806_v36  ;;  %v3797_v42 = vpop.xlane.xlu1 %3796 }
0x13c9   :  { %v3822_v41 = vmul.f32 %v4377_v48, %v3813_v14  ;;  %v3802_v16 = vmul.f32 0.03125, %v3797_v42 }
0x13ca   :  { %v5891_v44 = vpop.eup %5890 }
0x13cb   :  { %v3831_v11 = vadd.f32 %v4378_v56, %v3822_v41  ;;  %v3807_v27 = vadd.f32 1e-05, %v3802_v16  ;;  %v3814_v46 = vmul.f32 %v5891_v44, %v7477_v2 }
0x13cd   :  { %5896 = vrsqrt.f32 %v3807_v27  ;;  %5241 = vmatmul.mubr.msk.f32.vlgmr.msra.gmra.mrb[116].mxu0 %vm160_vm5, %v3831_v11  ;;  %v3823_v54 = vmul.f32 %v4377_v48, %v3814_v46 }
0x13ce   :  { %v5893_v55 = vpop.eup %5892  ;;  %5243 = vmatprep.mubr.msk.f32.mxu0 %vm5951_vm0, %v5952_v1 }
0x13cf   :  { %v3832_v52 = vadd.f32 %v4378_v56, %v3823_v54  ;;  %v3815_v24 = vmul.f32 %v5893_v55, %v7483_v39 }
0x13d1   :  { %5244 = vmatmul.mubr.msk.f32.gmra.mrb[118].mxu0 %vm160_vm5, %v3832_v52  ;;  %v3824_v50 = vmul.f32 %v4377_v48, %v3815_v24 }
0x13d2   :  { %v5895_v57 = vpop.eup %5894  ;;  %5246 = vmatprep.mubr.msk.f32.mxu0 %vm5951_vm0, %v5952_v1 }
0x13d3   :  { %v3833_v33 = vadd.f32 %v4378_v56, %v3824_v50  ;;  %v3816_v2 = vmul.f32 %v5895_v57, %v7489_v34  ;;  %v5482_v34 = vpack.c.bf16 %v3998_v37, %v3997_v19 }
0x13d5   :  { %5247 = vmatmul.mubr.msk.f32.gmra.mrb[120].mxu0 %vm160_vm5, %v3833_v33  ;;  %v3825_v32 = vmul.f32 %v4377_v48, %v3816_v2  ;;  %5483 = vmatpush3.bf16.msra.mxu1 %v5482_v34 }
0x13d6   :  { %5249 = vmatprep.mubr.msk.f32.mxu0 %vm5951_vm0, %v5952_v1  ;;  %5484 = vmatprep.subr.bf16.mxu1 %v5950_v0 }
0x13d7   :  { %v5897_v12 = vpop.eup %5896  ;;  %v3834_v63 = vadd.f32 %v4378_v56, %v3825_v32 }
0x13d8   :  { %v3817_v39 = vmul.f32 %v5897_v12, %v7496_v47  ;;  %v5488_v47 = vpack.c.bf16 %v4002_v3, %v4001_v31 }
0x13d9   :  { %5250 = vmatmul.mubr.msk.f32.gmra.mrb[122].mxu0 %vm160_vm5, %v3834_v63  ;;  %5486 = vmatpush3.bf16.msra.mxu1 %v5485_v51 }
0x13da   :  { %5252 = vmatprep.mubr.msk.f32.mxu0 %vm5951_vm0, %v5952_v1  ;;  %v3826_v62 = vmul.f32 %v4377_v48, %v3817_v39  ;;  %5487 = vmatprep.subr.bf16.mxu1 %v5950_v0 }
0x13dc   :  { %v3835_v21 = vadd.f32 %v4378_v56, %v3826_v62 }
0x13dd   :  { %5489 = vmatpush3.bf16.msra.mxu1 %v5488_v47 }
0x13de   :  { %5253 = vmatmul.mubr.msk.f32.gmra.mrb[124].mxu0 %vm160_vm5, %v3835_v21  ;;  %5490 = vmatprep.subr.bf16.mxu1 %v5950_v0 }
0x13e1   :  { %5492 = vmatpush3.bf16.msra.mxu1 %v5491_v30 }
0x13e2   :  { %5493 = vmatprep.subr.bf16.mxu1 %v5950_v0 }
0x13e5   :  { %5495 = vmatpush3.bf16.msra.mxu1 %v5494_v53 }
0x13e6   :  { %5496 = vmatprep.subr.bf16.mxu1 %v5950_v0 }
0x13e9   :  { %5498 = vmatpush3.bf16.msra.mxu1 %v5497_v4 }
0x13ea   :  { %5499 = vmatprep.subr.bf16.mxu1 %v5950_v0 }
0x13ed   :  { %5501 = vmatpush3.bf16.msra.mxu1 %v5500_v6 }
0x14a0   :  { %v3926_v17 = vpop.f32.mrb[116].mxu0 }
0x14a1   :  { %v3927_v13 = vadd.f32 %v4379_v40, %v3926_v17  ;;  %v5242_v20 = vpop.f32.mrb[117].mxu0 }
0x14a2   :  { %v4385_v20 = vld [vmem:[#allocation2 + $0x258] ss:$0 sm:$0xff] }
0x14a3   :  { %v3950_v22 = vmul.f32 %v3927_v13, %v3927_v13 }
0x14a4   :  { %v3931_v29 = vpop.f32.mrb[118].mxu0 }
0x14a5   :  { %v3955_v35 = vmul.f32 %v3950_v22, %v3927_v13  ;;  %v3932_v60 = vadd.f32 %v4379_v40, %v3931_v29  ;;  %v5245_v26 = vpop.f32.mrb[119].mxu0 }
0x14a7   :  { %v3960_v43 = vmul.f32 0.044715, %v3955_v35  ;;  %v3951_v7 = vmul.f32 %v3932_v60, %v3932_v60 }
0x14a8   :  { %v3936_v48 = vpop.f32.mrb[120].mxu0 }
0x14a9   :  { %v3965_v36 = vadd.f32 %v3960_v43, %v3927_v13  ;;  %v3956_v14 = vmul.f32 %v3951_v7, %v3932_v60  ;;  %v3937_v56 = vadd.f32 %v4379_v40, %v3936_v48  ;;  %v5248_v0 = vpop.f32.mrb[121].mxu0 }
0x14ab   :  { %v3970_v42 = vmul.f32 0.7978846, %v3965_v36  ;;  %v3961_v41 = vmul.f32 0.044715, %v3956_v14  ;;  %v3952_v16 = vmul.f32 %v3937_v56, %v3937_v56 }
0x14ac   :  { %v3941_v44 = vpop.f32.mrb[122].mxu0 }
0x14ad   :  { %5898 = vtanh.f32 %v3970_v42  ;;  %v3966_v11 = vadd.f32 %v3961_v41, %v3932_v60  ;;  %v3957_v27 = vmul.f32 %v3952_v16, %v3937_v56  ;;  %v3942_v46 = vadd.f32 %v4379_v40, %v3941_v44  ;;  %v5251_v54 = vpop.f32.mrb[123].mxu0 }
0x14af   :  { %v3971_v55 = vmul.f32 0.7978846, %v3966_v11  ;;  %v3962_v52 = vmul.f32 0.044715, %v3957_v27  ;;  %v3953_v24 = vmul.f32 %v3942_v46, %v3942_v46 }
0x14b1   :  { %v3967_v50 = vadd.f32 %v3962_v52, %v3937_v56  ;;  %v3958_v57 = vmul.f32 %v3953_v24, %v3942_v46  ;;  %v3946_v33 = vpop.f32.mrb[124].mxu0  ;;  %5900 = vtanh.f32 %v3971_v55 }
0x14b2   :  { %v3947_v2 = vadd.f32 %v4379_v40, %v3946_v33  ;;  %v5254_v32 = vpop.f32.mrb[125].mxu0 }
0x14b3   :  { %v3972_v12 = vmul.f32 0.7978846, %v3967_v50  ;;  %v3963_v63 = vmul.f32 0.044715, %v3958_v57 }
0x14b4   :  { %v3954_v39 = vmul.f32 %v3947_v2, %v3947_v2 }
0x14b5   :  { %v3968_v62 = vadd.f32 %v3963_v63, %v3942_v46  ;;  %5902 = vtanh.f32 %v3972_v12 }
0x14b6   :  { %v3959_v21 = vmul.f32 %v3954_v39, %v3947_v2 }
0x14b7   :  { %v5899_v19 = vpop.eup %5898  ;;  %v3973_v37 = vmul.f32 0.7978846, %v3968_v62 }
0x14b8   :  { %v3980_v34 = vadd.f32 1.0, %v5899_v19  ;;  %v3964_v5 = vmul.f32 0.044715, %v3959_v21 }
0x14b9   :  { %5904 = vtanh.f32 %v3973_v37 }
0x14ba   :  { %v3985_v15 = vmul.f32 0.5, %v3980_v34  ;;  %v3969_v51 = vadd.f32 %v3964_v5, %v3947_v2 }
0x14bb   :  { %v5901_v31 = vpop.eup %5900 }
0x14bc   :  { %v3990_v3 = vmul.f32 %v3985_v15, %v3927_v13  ;;  %v3974_v47 = vmul.f32 0.7978846, %v3969_v51  ;;  %v3981_v23 = vadd.f32 1.0, %v5901_v31 }
0x14be   :  { %5288 = vmatmul.mubr.f32.vlgmr.msra.gmra.mrb[114].mxu1 %v3990_v3  ;;  %v3986_v18 = vmul.f32 0.5, %v3981_v23  ;;  %5906 = vtanh.f32 %v3974_v47 }
0x14bf   :  { %v5903_v30 = vpop.eup %5902  ;;  %5290 = vmatprep.mubr.msk.f32.mxu1 %vm5951_vm0, %v5952_v1 }
0x14c0   :  { %v3991_v25 = vmul.f32 %v3986_v18, %v3932_v60  ;;  %v3982_v9 = vadd.f32 1.0, %v5903_v30 }
0x14c2   :  { %5291 = vmatmul.mubr.f32.gmra.mrb[116].mxu1 %v3991_v25  ;;  %v3987_v53 = vmul.f32 0.5, %v3982_v9 }
0x14c3   :  { %v5905_v10 = vpop.eup %5904  ;;  %5293 = vmatprep.mubr.msk.f32.mxu1 %vm5951_vm0, %v5952_v1 }
0x14c4   :  { %v3992_v28 = vmul.f32 %v3987_v53, %v3937_v56  ;;  %v3983_v4 = vadd.f32 1.0, %v5905_v10 }
0x14c6   :  { %5294 = vmatmul.mubr.f32.gmra.mrb[118].mxu1 %v3992_v28  ;;  %v3988_v59 = vmul.f32 0.5, %v3983_v4 }
0x14c7   :  { %5296 = vmatprep.mubr.msk.f32.mxu1 %vm5951_vm0, %v5952_v1 }
0x14c8   :  { %v5907_v49 = vpop.eup %5906  ;;  %v3993_v6 = vmul.f32 %v3988_v59, %v3942_v46 }
0x14c9   :  { %v3984_v40 = vadd.f32 1.0, %v5907_v49 }
0x14ca   :  { %5297 = vmatmul.mubr.f32.gmra.mrb[120].mxu1 %v3993_v6 }
0x14cb   :  { %5299 = vmatprep.mubr.msk.f32.mxu1 %vm5951_vm0, %v5952_v1  ;;  %v3989_v17 = vmul.f32 0.5, %v3984_v40 }
0x14cd   :  { %v3994_v13 = vmul.f32 %v3989_v17, %v3947_v2 }
0x14cf   :  { %5300 = vmatmul.mubr.f32.gmra.mrb[122].mxu1 %v3994_v13  ;;  %v4386_v13 = vld [vmem:[#allocation2 + $0x10] ss:$0 sm:$0xff] }
0x1591   :  { %v4082_v22 = vpop.f32.mrb[114].mxu1 }
0x1592   :  { %v4083_v29 = vadd.f32 %v4385_v20, %v4082_v22  ;;  %v5289_v35 = vpop.f32.mrb[115].mxu1 }
0x1594   :  { %v4106_v60 = vadd.f32 %v4083_v29, %v7451_v8  ;;  %v4387_v29 = vld [vmem:[#allocation2 + $0x18] ss:$0 sm:$0xff] }
0x1595   :  { %v4087_v26 = vpop.f32.mrb[116].mxu1 }
0x1596   :  { %v4088_v43 = vadd.f32 %v4385_v20, %v4087_v26  ;;  %v5292_v7 = vpop.f32.mrb[117].mxu1  ;;  %v4113_v48 = vsel %vm160_vm5, %v4106_v60, 0.0 }
0x1597   :  { %4114 = vadd.xlane.f32.xlu0 %v4113_v48 }
0x1598   :  { %v4107_v36 = vadd.f32 %v4088_v43, %v7456_v45 }
0x1599   :  { %v4092_v14 = vpop.f32.mrb[118].mxu1 }
0x159a   :  { %v4093_v56 = vadd.f32 %v4385_v20, %v4092_v14  ;;  %v5295_v1 = vpop.f32.mrb[119].mxu1  ;;  %v4116_v0 = vsel %vm160_vm5, %v4107_v36, 0.0 }
0x159b   :  { %4117 = vadd.xlane.f32.xlu1 %v4116_v0 }
0x159c   :  { %v4108_v42 = vadd.f32 %v4093_v56, %v7461_v38 }
0x159d   :  { %v4097_v41 = vpop.f32.mrb[120].mxu1 }
0x159e   :  { %v4098_v16 = vadd.f32 %v4385_v20, %v4097_v41  ;;  %v5298_v44 = vpop.f32.mrb[121].mxu1  ;;  %v4119_v8 = vsel %vm160_vm5, %v4108_v42, 0.0 }
0x159f   :  { %4120 = vadd.xlane.f32.xlu0 %v4119_v8 }
0x15a0   :  { %v4109_v11 = vadd.f32 %v4098_v16, %v7466_v61 }
0x15a2   :  { %v4102_v27 = vpop.f32.mrb[122].mxu1  ;;  %v4122_v46 = vsel %vm160_vm5, %v4109_v11, 0.0 }
0x15a3   :  { %v4103_v45 = vadd.f32 %v4385_v20, %v4102_v27  ;;  %4123 = vadd.xlane.f32.xlu1 %v4122_v46  ;;  %v5301_v54 = vpop.f32.mrb[123].mxu1 }
0x15a5   :  { %v4110_v55 = vadd.f32 %v4103_v45, %v7471_v58 }
0x15a7   :  { %v4125_v52 = vsel %vm173_vm6, %v4110_v55, 0.0 }
0x15a8   :  { %4126 = vadd.xlane.f32.xlu0 %v4125_v52 }
0x1624   :  { %v4115_v38 = vpop.xlane.xlu0 %4114 }
0x1625   :  { %v4128_v24 = vmul.f32 0.03125, %v4115_v38 }
0x1627   :  { %v4133_v50 = vsub.f32 %v4106_v60, %v4128_v24 }
0x1628   :  { %v4118_v57 = vpop.xlane.xlu1 %4117 }
0x1629   :  { %v4129_v33 = vmul.f32 0.03125, %v4118_v57  ;;  %v4138_v2 = vmul.f32 %v4133_v50, %v4133_v50 }
0x162b   :  { %v4134_v32 = vsub.f32 %v4107_v36, %v4129_v33  ;;  %v4143_v61 = vsel %vm160_vm5, %v4138_v2, 0.0 }
0x162c   :  { %v4121_v12 = vpop.xlane.xlu0 %4120  ;;  %4144 = vadd.xlane.f32.xlu1 %v4143_v61 }
0x162d   :  { %v4130_v63 = vmul.f32 0.03125, %v4121_v12  ;;  %v4139_v39 = vmul.f32 %v4134_v32, %v4134_v32 }
0x162f   :  { %v4135_v62 = vsub.f32 %v4108_v42, %v4130_v63  ;;  %v4146_v21 = vsel %vm160_vm5, %v4139_v39, 0.0 }
0x1630   :  { %v4124_v58 = vpop.xlane.xlu1 %4123  ;;  %4147 = vadd.xlane.f32.xlu0 %v4146_v21 }
0x1631   :  { %v4131_v19 = vmul.f32 0.03125, %v4124_v58  ;;  %v4140_v37 = vmul.f32 %v4135_v62, %v4135_v62 }
0x1633   :  { %v4136_v34 = vsub.f32 %v4109_v11, %v4131_v19  ;;  %v4149_v5 = vsel %vm160_vm5, %v4140_v37, 0.0 }
0x1634   :  { %4150 = vadd.xlane.f32.xlu1 %v4149_v5 }
0x1635   :  { %v4127_v15 = vpop.xlane.xlu0 %4126  ;;  %v4141_v51 = vmul.f32 %v4136_v34, %v4136_v34 }
0x1636   :  { %v4132_v31 = vmul.f32 0.03125, %v4127_v15 }
0x1637   :  { %v4152_v3 = vsel %vm160_vm5, %v4141_v51, 0.0 }
0x1638   :  { %v4137_v47 = vsub.f32 %v4110_v55, %v4132_v31  ;;  %4153 = vadd.xlane.f32.xlu0 %v4152_v3 }
0x163a   :  { %v4142_v23 = vmul.f32 %v4137_v47, %v4137_v47 }
0x163c   :  { %v4155_v18 = vsel %vm173_vm6, %v4142_v23, 0.0 }
0x163d   :  { %4156 = vadd.xlane.f32.xlu1 %v4155_v18 }
0x16b9   :  { %v4145_v30 = vpop.xlane.xlu1 %4144 }
0x16ba   :  { %v4158_v25 = vmul.f32 0.03125, %v4145_v30 }
0x16bc   :  { %v4163_v9 = vadd.f32 1e-05, %v4158_v25 }
0x16bd   :  { %v4148_v53 = vpop.xlane.xlu0 %4147 }
0x16be   :  { %5908 = vrsqrt.f32 %v4163_v9  ;;  %v4159_v10 = vmul.f32 0.03125, %v4148_v53 }
0x16c0   :  { %v4164_v28 = vadd.f32 1e-05, %v4159_v10 }
0x16c1   :  { %v4151_v4 = vpop.xlane.xlu1 %4150 }
0x16c2   :  { %5910 = vrsqrt.f32 %v4164_v28  ;;  %v4160_v59 = vmul.f32 0.03125, %v4151_v4 }
0x16c4   :  { %v4165_v49 = vadd.f32 1e-05, %v4160_v59 }
0x16c5   :  { %v4154_v6 = vpop.xlane.xlu0 %4153 }
0x16c6   :  { %5912 = vrsqrt.f32 %v4165_v49  ;;  %v4161_v40 = vmul.f32 0.03125, %v4154_v6 }
0x16c8   :  { %v5909_v17 = vpop.eup %5908  ;;  %v4166_v20 = vadd.f32 1e-05, %v4161_v40 }
0x16c9   :  { %v4173_v22 = vmul.f32 %v5909_v17, %v4133_v50 }
0x16ca   :  { %5914 = vrsqrt.f32 %v4166_v20  ;;  %v4157_v35 = vpop.xlane.xlu1 %4156 }
0x16cb   :  { %v4182_v60 = vmul.f32 %v4386_v13, %v4173_v22  ;;  %v4162_v26 = vmul.f32 0.03125, %v4157_v35 }
0x16cc   :  { %v5911_v43 = vpop.eup %5910 }
0x16cd   :  { %v4191_v7 = vadd.f32 %v4387_v29, %v4182_v60  ;;  %v4174_v48 = vmul.f32 %v5911_v43, %v4134_v32  ;;  %v4167_v36 = vadd.f32 1e-05, %v4162_v26 }
0x16cf   :  { %4196 = vst.msk [vmem:[%s7573_s4] sm:$0xff] %vm160_vm5, %v4191_v7  ;;  %v4183_v14 = vmul.f32 %v4386_v13, %v4174_v48  ;;  %5916 = vrsqrt.f32 %v4167_v36 }
0x16d0   :  { %v5913_v56 = vpop.eup %5912 }
0x16d1   :  { %v4192_v1 = vadd.f32 %v4387_v29, %v4183_v14  ;;  %v4175_v0 = vmul.f32 %v5913_v56, %v4135_v62 }
0x16d3   :  { %4197 = vst.msk [vmem:[%s7573_s4 + $0x8] sm:$0xff] %vm160_vm5, %v4192_v1  ;;  %v4184_v42 = vmul.f32 %v4386_v13, %v4175_v0 }
0x16d4   :  { %v5915_v41 = vpop.eup %5914 }
0x16d5   :  { %v4193_v16 = vadd.f32 %v4387_v29, %v4184_v42  ;;  %v4176_v44 = vmul.f32 %v5915_v41, %v4136_v34 }
0x16d7   :  { %4198 = vst.msk [vmem:[%s7573_s4 + $0x10] sm:$0xff] %vm160_vm5, %v4193_v16  ;;  %v4185_v8 = vmul.f32 %v4386_v13, %v4176_v44 }
0x16d9   :  { %v5917_v11 = vpop.eup %5916  ;;  %v4194_v27 = vadd.f32 %v4387_v29, %v4185_v8 }
0x16da   :  { %v4177_v46 = vmul.f32 %v5917_v11, %v4137_v47 }
0x16db   :  { %4199 = vst.msk [vmem:[%s7573_s4 + $0x18] sm:$0xff] %vm160_vm5, %v4194_v27 }
0x16dc   :  { %v4186_v45 = vmul.f32 %v4386_v13, %v4177_v46 }
0x16de   :  { %v4195_v54 = vadd.f32 %v4387_v29, %v4186_v45 }
0x16e0   :  { %4200 = vst.msk [vmem:[%s7573_s4 + $0x20] sm:$0x3] %vm173_vm6, %v4195_v54 }
0x16e1   :  { %4205 = vsyncpa [#allocation3], 1 }

</bundles_post_ra>
